<compile_context>
chip_gen: v7x
topology: tpu7x:2x2x1
jax: 0.10.0
libtpu: 0.0.40
codegen_flags: <defaults>
</compile_context>

<pallas_src>
import functools

import numpy as np
import jax
import jax.numpy as jnp
from jax import lax
from jax.experimental import pallas as pl
from jax.experimental.pallas import tpu as pltpu

VMEM = pltpu.MemorySpace.VMEM
SMEM = pltpu.MemorySpace.SMEM

BN_EPS = 1e-5


# ---------------------------------------------------------------------------
# Host-side weight packing (done once, plain numpy).
# ---------------------------------------------------------------------------
def conv_band_np(w_pt, scale, win, wout, stride):
    """3x3 conv (PyTorch weight (Cout,Cin,3,3), BN scale folded) -> 3 banded
    matrices B[dy] of shape ((win+2)*Cin, (wout+2)*Cout).

    Input rows are flattened, zero-padded image rows (pixel-major, channel
    minor; block j <-> pixel j-1).  Output rows use the same padded layout
    (output pixel q at block q+1, blocks 0 / wout+1 are all-zero)."""
    w = np.asarray(w_pt, np.float32) * np.asarray(scale, np.float32)[:, None, None, None]
    cout, cin = w.shape[0], w.shape[1]
    B = np.zeros((3, win + 2, cin, wout + 2, cout), np.float32)
    for dy in range(3):
        for dx in range(3):
            for wo in range(wout):
                B[dy, stride * wo + dx, :, wo + 1, :] = w[:, :, dy, dx].T
    return B.reshape(3, (win + 2) * cin, (wout + 2) * cout)


def deconv_band_np(w_pt, scale, win, out_pad):
    """ConvTranspose2d(k=3, s=2, p=1, output_padding=1) weight ((Cin,Cout,3,3),
    BN scale folded) -> [Be, Bo0, Bo1] with
        out_even_rows[m] = in_row[m]   @ Be
        out_odd_rows [m] = in_row[m]   @ Bo0 + in_row[m+1] @ Bo1
    Input rows: (win+2) pixel blocks, block j <-> pixel j-1 (pads are zero).
    Output rows: 2*win pixels (+1 zero pixel each side if out_pad)."""
    w = np.asarray(w_pt, np.float32) * np.asarray(scale, np.float32)[None, :, None, None]
    cin, cout = w.shape[0], w.shape[1]
    nblk = 2 * win + (2 if out_pad else 0)
    off = 1 if out_pad else 0
    Be = np.zeros((win + 2, cin, nblk, cout), np.float32)
    Bo0 = np.zeros_like(Be)
    Bo1 = np.zeros_like(Be)
    for n in range(win):
        Be[n + 1, :, off + 2 * n, :] = w[:, :, 1, 1]
        Be[n + 1, :, off + 2 * n + 1, :] = w[:, :, 1, 2]
        Be[n + 2, :, off + 2 * n + 1, :] = w[:, :, 1, 0]
        Bo0[n + 1, :, off + 2 * n, :] = w[:, :, 2, 1]
        Bo0[n + 1, :, off + 2 * n + 1, :] = w[:, :, 2, 2]
        Bo0[n + 2, :, off + 2 * n + 1, :] = w[:, :, 2, 0]
        Bo1[n + 1, :, off + 2 * n, :] = w[:, :, 0, 1]
        Bo1[n + 1, :, off + 2 * n + 1, :] = w[:, :, 0, 2]
        Bo1[n + 2, :, off + 2 * n + 1, :] = w[:, :, 0, 0]
    return np.stack([Be, Bo0, Bo1], 0).reshape(3, (win + 2) * cin, nblk * cout)


def pack_params(raw, C, H, W):
    """Fold eval-mode BN into the (de)conv weights and build banded matrices +
    tiled bias rows for the fused kernel."""
    H2, W2, H4, W4 = H // 2, W // 2, H // 4, W // 4

    def fold(i):
        g, b, m, v = [np.asarray(t, np.float32) for t in raw["bn"][i]]
        s = g / np.sqrt(v + BN_EPS)
        return s, b - m * s

    def tile_bias(b, wdata, pad):
        t = np.tile(np.asarray(b, np.float32), wdata)
        if pad:
            z = np.zeros(C, np.float32)
            t = np.concatenate([z, t, z])
        return jnp.asarray(t[None, :])

    w = [np.asarray(t, np.float32) for t in raw["w"]]
    scales, biases = zip(*[fold(i) for i in range(6)])
    return {
        "B1": jnp.asarray(conv_band_np(w[0], scales[0], W, W2, 2)),
        "b1": tile_bias(biases[0], W2, True),
        "B2": jnp.asarray(conv_band_np(w[1], scales[1], W2, W2, 1)),
        "b2": tile_bias(biases[1], W2, True),
        "B3": jnp.asarray(conv_band_np(w[2], scales[2], W2, W4, 2)),
        "b3": tile_bias(biases[2], W4, True),
        "B4": jnp.asarray(conv_band_np(w[3], scales[3], W4, W4, 1)),
        "b4": tile_bias(biases[3], W4, True),
        "B5": jnp.asarray(deconv_band_np(w[4], scales[4], W4, out_pad=True)),
        "b5": tile_bias(biases[4], W2, True),
        "B6": jnp.asarray(deconv_band_np(w[5], scales[5], W2, out_pad=False)),
        "b6": tile_bias(biases[5], W, False),
        "alphas": jnp.asarray(np.asarray(raw["alphas"], np.float32)),
    }


# ---------------------------------------------------------------------------
# The fused Pallas kernel.
# ---------------------------------------------------------------------------
def _hourglass_kernel(dims, has_presqu, has_postsqu,
                      xp_ref, postsqu_ref, presqu_ref,
                      B1, b1, B2, b2, B3, b3, B4, b4, B5, b5, B6, b6,
                      alpha_ref,
                      out_ref, s1, sp, s3, s4, spost):
    N, C, H, W = dims
    H2, W2, H4, W4 = H // 2, W // 2, H // 4, W // 4
    PH = (W2 + 2) * C          # padded half-res row width
    PQ = (W4 + 2) * C          # padded quarter-res row width
    WC = W * C                 # full-res output row width
    M = N * H4                 # rows per matmul group

    def mm(a, b):
        return jnp.dot(a, b, preferred_element_type=jnp.float32)

    def prelu(v, a):
        return jnp.where(v > 0, v, a * v)

    def rows(v):               # (N, H4, cols) -> (N*H4, cols)
        return v.reshape(M, v.shape[-1])

    a1 = alpha_ref[0]
    a3 = alpha_ref[1]
    a4 = alpha_ref[2]
    ash = alpha_ref[3]

    # Pad rows / pad columns of the scratch buffers must read as zero.
    s1[...] = jnp.zeros_like(s1)
    sp[...] = jnp.zeros_like(sp)
    s3[...] = jnp.zeros_like(s3)
    s4[...] = jnp.zeros_like(s4)
    spost[...] = jnp.zeros_like(spost)

    # ---- conv1: 3x3 stride-2 + BN + PReLU(a1)   (H,W) -> (H/2,W/2) ---------
    bias1 = b1[...]
    c1e = (mm(rows(xp_ref[0, :, 0:H4, :]), B1[0]) +
           mm(rows(xp_ref[1, :, 0:H4, :]), B1[1]) +
           mm(rows(xp_ref[2, :, 0:H4, :]), B1[2]) + bias1)
    c1o = (mm(rows(xp_ref[2, :, 0:H4, :]), B1[0]) +
           mm(rows(xp_ref[3, :, 0:H4, :]), B1[1]) +
           mm(rows(xp_ref[0, :, 1:H4 + 1, :]), B1[2]) + bias1)
    c1e = prelu(c1e, a1)
    c1o = prelu(c1o, a1)
    # out1 row 2b   -> padded row 2b+1 -> (phase 1, block b)
    # out1 row 2b+1 -> padded row 2b+2 -> (phase 0, block b+1)
    s1[1, :, 0:H4, :] = c1e.reshape(N, H4, PH)
    s1[0, :, 1:H4 + 1, :] = c1o.reshape(N, H4, PH)

    # ---- conv2: 3x3 stride-1 + BN, (+postsqu), PReLU(a_shared) -> pre ------
    bias2 = b2[...]
    c2e = (mm(rows(s1[0, :, 0:H4, :]), B2[0]) +
           mm(rows(s1[1, :, 0:H4, :]), B2[1]) +
           mm(rows(s1[0, :, 1:H4 + 1, :]), B2[2]) + bias2)
    c2o = (mm(rows(s1[1, :, 0:H4, :]), B2[0]) +
           mm(rows(s1[0, :, 1:H4 + 1, :]), B2[1]) +
           mm(rows(s1[1, :, 1:H4 + 1, :]), B2[2]) + bias2)
    if has_postsqu:
        c2e = c2e + rows(postsqu_ref[0, :, :, :])
        c2o = c2o + rows(postsqu_ref[1, :, :, :])
    pre_e = prelu(c2e, ash)
    pre_o = prelu(c2o, ash)
    sp[1, :, 0:H4, :] = pre_e.reshape(N, H4, PH)
    sp[0, :, 1:H4 + 1, :] = pre_o.reshape(N, H4, PH)

    # ---- conv3: 3x3 stride-2 + BN + PReLU(a3)   (H/2) -> (H/4) -------------
    c3 = (mm(rows(sp[0, :, 0:H4, :]), B3[0]) +
          mm(rows(sp[1, :, 0:H4, :]), B3[1]) +
          mm(rows(sp[0, :, 1:H4 + 1, :]), B3[2]) + b3[...])
    c3 = prelu(c3, a3)
    s3[:, 1:H4 + 1, :] = c3.reshape(N, H4, PQ)

    # ---- conv4: 3x3 stride-1 + BN + PReLU(a4) ------------------------------
    c4 = (mm(rows(s3[:, 0:H4, :]), B4[0]) +
          mm(rows(s3[:, 1:H4 + 1, :]), B4[1]) +
          mm(rows(s3[:, 2:H4 + 2, :]), B4[2]) + b4[...])
    c4 = prelu(c4, a4)
    s4[:, 0:H4, :] = c4.reshape(N, H4, PQ)

    # ---- conv5: deconv(k3,s2,p1,op1) + BN, + (presqu | pre), PReLU(a_sh) ---
    bias5 = b5[...]
    d5_m = rows(s4[:, 0:H4, :])            # rows m
    d5_m1 = rows(s4[:, 1:H4 + 1, :])       # rows m+1 (last one is zero)
    c5e = mm(d5_m, B5[0]) + bias5                          # post rows 2m
    c5o = mm(d5_m, B5[1]) + mm(d5_m1, B5[2]) + bias5       # post rows 2m+1
    if has_presqu:
        add_e = rows(presqu_ref[0, :, :, :])
        add_o = rows(presqu_ref[1, :, :, :])
    else:
        add_e = rows(sp[1, :, 0:H4, :])        # pre rows 2m
        add_o = rows(sp[0, :, 1:H4 + 1, :])    # pre rows 2m+1
    post_e = prelu(c5e + add_e, ash)
    post_o = prelu(c5o + add_o, ash)
    spost[0, :, 0:H4, :] = post_e.reshape(N, H4, PH)
    spost[1, :, 0:H4, :] = post_o.reshape(N, H4, PH)

    # ---- conv6: deconv(k3,s2,p1,op1) + BN    (H/2) -> (H,W), no activation -
    bias6 = b6[...]
    p_e = rows(spost[0, :, 0:H4, :])       # post rows 2B
    p_o = rows(spost[1, :, 0:H4, :])       # post rows 2B+1
    p_o2 = rows(spost[0, :, 1:H4 + 1, :])  # post rows 2B+2 (last one is zero)
    # out_ref leading index = 2*(m parity) + (output row parity)
    out_ref[0, :, :, :] = (mm(p_e, B6[0]) + bias6).reshape(N, H4, WC)
    out_ref[1, :, :, :] = (mm(p_e, B6[1]) + mm(p_o, B6[2]) + bias6).reshape(N, H4, WC)
    out_ref[2, :, :, :] = (mm(p_o, B6[0]) + bias6).reshape(N, H4, WC)
    out_ref[3, :, :, :] = (mm(p_o, B6[1]) + mm(p_o2, B6[2]) + bias6).reshape(N, H4, WC)


# ---------------------------------------------------------------------------
# Wrapper: layout prep (pure reshapes/pads in XLA) + pallas_call.
# ---------------------------------------------------------------------------
def hourglass_forward(x_nchw, packed, presqu=None, postsqu=None):
    N, C, H, W = x_nchw.shape
    assert H % 4 == 0 and W % 4 == 0
    H2, W2, H4, W4 = H // 2, W // 2, H // 4, W // 4
    PF = (W + 2) * C
    PH = (W2 + 2) * C
    PQ = (W4 + 2) * C
    WC = W * C

    x = jnp.transpose(x_nchw, (0, 2, 3, 1)).astype(jnp.float32)       # NHWC
    # Full-res input, 4-row-blocked + zero padded:
    #   xp[q, n, b, :] = flattened (left/right padded) image row (4b + q - 1)
    xp = jnp.pad(x, ((0, 0), (1, 3), (1, 1), (0, 0)))
    xp = xp.reshape(N, H4 + 1, 4, PF).transpose(2, 0, 1, 3)

    def half_blocked(t_nchw):
        t = jnp.transpose(t_nchw, (0, 2, 3, 1)).astype(jnp.float32)   # (N,H2,W2,C)
        t = jnp.pad(t, ((0, 0), (0, 0), (1, 1), (0, 0)))
        return t.reshape(N, H4, 2, PH).transpose(2, 0, 1, 3)          # (2,N,H4,PH)

    zero_half = jnp.zeros((2, N, H4, PH), jnp.float32)
    postsqu_b = half_blocked(postsqu) if postsqu is not None else zero_half
    presqu_b = half_blocked(presqu) if presqu is not None else zero_half

    kernel = functools.partial(_hourglass_kernel, (N, C, H, W),
                               presqu is not None, postsqu is not None)
    out_raw = pl.pallas_call(
        kernel,
        out_shape=jax.ShapeDtypeStruct((4, N, H4, WC), jnp.float32),
        in_specs=[pl.BlockSpec(memory_space=VMEM)] * 15 +
                 [pl.BlockSpec(memory_space=SMEM)],
        out_specs=pl.BlockSpec(memory_space=VMEM),
        scratch_shapes=[
            pltpu.VMEM((2, N, H4 + 1, PH), jnp.float32),   # conv1 out (padded, blocked)
            pltpu.VMEM((2, N, H4 + 1, PH), jnp.float32),   # pre
            pltpu.VMEM((N, H4 + 2, PQ), jnp.float32),      # conv3 out
            pltpu.VMEM((N, H4 + 1, PQ), jnp.float32),      # conv4 out
            pltpu.VMEM((2, N, H4 + 1, PH), jnp.float32),   # post
        ],
    )(xp, postsqu_b, presqu_b,
      packed["B1"], packed["b1"], packed["B2"], packed["b2"],
      packed["B3"], packed["b3"], packed["B4"], packed["b4"],
      packed["B5"], packed["b5"], packed["B6"], packed["b6"],
      packed["alphas"])

    # (4, N, H4, W*C): leading index = 2*pm + po, output row = 4*B + 2*pm + po.
    out = out_raw.transpose(1, 2, 0, 3).reshape(N, H4, 2, 2, W, C).reshape(N, H, W, C)
    return jnp.transpose(out, (0, 3, 1, 2))                # back to NCHW


# ---------------------------------------------------------------------------
# Pure-JAX reference (lax.conv), eval-mode BN.
# ---------------------------------------------------------------------------
def _ref_convbn(x, w_pt, gamma, beta, mean, var, stride):
    w = jnp.transpose(w_pt, (2, 3, 1, 0))                  # HWIO
    y = lax.conv_general_dilated(
        x, w, (stride, stride), ((1, 1), (1, 1)),
        dimension_numbers=("NHWC", "HWIO", "NHWC"),
        precision=lax.Precision.HIGHEST)
    s = gamma / jnp.sqrt(var + BN_EPS)
    return y * s + (beta - mean * s)


def _ref_deconvbn(x, w_pt, gamma, beta, mean, var):
    # ConvTranspose2d(k=3, s=2, p=1, op=1) == dilated conv with flipped kernel.
    w = jnp.transpose(w_pt[:, :, ::-1, ::-1], (2, 3, 0, 1))
    y = lax.conv_general_dilated(
        x, w, (1, 1), ((1, 2), (1, 2)), lhs_dilation=(2, 2),
        dimension_numbers=("NHWC", "HWIO", "NHWC"),
        precision=lax.Precision.HIGHEST)
    s = gamma / jnp.sqrt(var + BN_EPS)
    return y * s + (beta - mean * s)


def hourglass_reference(x_nchw, raw, presqu=None, postsqu=None):
    prelu = lambda v, a: jnp.where(v > 0, v, a * v)
    a1, a3, a4, ash = raw["alphas"]
    x = jnp.transpose(x_nchw, (0, 2, 3, 1)).astype(jnp.float32)
    out = prelu(_ref_convbn(x, raw["w"][0], *raw["bn"][0], stride=2), a1)
    pre = _ref_convbn(out, raw["w"][1], *raw["bn"][1], stride=1)
    if postsqu is not None:
        pre = prelu(pre + jnp.transpose(postsqu, (0, 2, 3, 1)), ash)
    else:
        pre = prelu(pre, ash)
    out = prelu(_ref_convbn(pre, raw["w"][2], *raw["bn"][2], stride=2), a3)
    out = prelu(_ref_convbn(out, raw["w"][3], *raw["bn"][3], stride=1), a4)
    c5 = _ref_deconvbn(out, raw["w"][4], *raw["bn"][4])
    if presqu is not None:
        post = prelu(c5 + jnp.transpose(presqu, (0, 2, 3, 1)), ash)
    else:
        post = prelu(c5 + pre, ash)
    out = _ref_deconvbn(post, raw["w"][5], *raw["bn"][5])
    return jnp.transpose(out, (0, 3, 1, 2))


# ---------------------------------------------------------------------------
if __name__ == "__main__":
    N, C, H, W = 2, 16, 16, 16        # inplanes = 16
    H2, W2 = H // 2, W // 2

    keys = jax.random.split(jax.random.PRNGKey(0), 40)
    kit = iter(keys)
    nk = lambda: next(kit)

    raw = {
        # conv1..conv4: Conv2d weights (Cout, Cin, 3, 3)
        # conv5, conv6: ConvTranspose2d weights (Cin, Cout, 3, 3)
        "w": [0.08 * jax.random.normal(nk(), (C, C, 3, 3), jnp.float32)
              for _ in range(6)],
        # eval-mode BN: (gamma, beta, running_mean, running_var) per layer
        "bn": [(1.0 + 0.1 * jax.random.normal(nk(), (C,), jnp.float32),
                0.1 * jax.random.normal(nk(), (C,), jnp.float32),
                0.1 * jax.random.normal(nk(), (C,), jnp.float32),
                0.5 + jax.random.uniform(nk(), (C,), jnp.float32))
               for _ in range(6)],
        # PReLU alphas: conv1, conv3, conv4, shared self.prelu
        "alphas": [0.25, 0.2, 0.3, 0.15],
    }
    x = jax.random.normal(nk(), (N, C, H, W), jnp.float32)
    presqu = 0.5 * jax.random.normal(nk(), (N, C, H2, W2), jnp.float32)
    postsqu = 0.5 * jax.random.normal(nk(), (N, C, H2, W2), jnp.float32)

    packed = pack_params(raw, C, H, W)

    # Path 1: forward(x, None, None)
    out_a = jax.block_until_ready(hourglass_forward(x, packed, None, None))
    ref_a = jax.block_until_ready(hourglass_reference(x, raw, None, None))
    assert out_a.shape == (N, C, H, W)
    err_a = float(jnp.max(jnp.abs(out_a - ref_a)))
    assert jnp.allclose(out_a, ref_a, rtol=1e-3, atol=1e-3), \
        "mismatch without skip connections, max abs err = %e" % err_a

    # Path 2: forward(x, presqu, postsqu)
    out_b = jax.block_until_ready(hourglass_forward(x, packed, presqu, postsqu))
    ref_b = jax.block_until_ready(hourglass_reference(x, raw, presqu, postsqu))
    err_b = float(jnp.max(jnp.abs(out_b - ref_b)))
    assert jnp.allclose(out_b, ref_b, rtol=1e-3, atol=1e-3), \
        "mismatch with skip connections, max abs err = %e" % err_b

    print("KERNEL_OK")
</pallas_src>

<mosaic_0001>
module attributes {stable_mosaic.version = 11 : i64} {
  func.func @_hourglass_kernel(%arg0: memref<4x2x5x288xf32, #tpu.memory_space<vmem>>, %arg1: memref<2x2x4x160xf32, #tpu.memory_space<vmem>>, %arg2: memref<2x2x4x160xf32, #tpu.memory_space<vmem>>, %arg3: memref<3x288x160xf32, #tpu.memory_space<vmem>>, %arg4: memref<1x160xf32, #tpu.memory_space<vmem>>, %arg5: memref<3x160x160xf32, #tpu.memory_space<vmem>>, %arg6: memref<1x160xf32, #tpu.memory_space<vmem>>, %arg7: memref<3x160x96xf32, #tpu.memory_space<vmem>>, %arg8: memref<1x96xf32, #tpu.memory_space<vmem>>, %arg9: memref<3x96x96xf32, #tpu.memory_space<vmem>>, %arg10: memref<1x96xf32, #tpu.memory_space<vmem>>, %arg11: memref<3x96x160xf32, #tpu.memory_space<vmem>>, %arg12: memref<1x160xf32, #tpu.memory_space<vmem>>, %arg13: memref<3x160x256xf32, #tpu.memory_space<vmem>>, %arg14: memref<1x256xf32, #tpu.memory_space<vmem>>, %arg15: memref<4xf32, #tpu.memory_space<smem>>, %arg16: memref<4x2x4x256xf32, #tpu.memory_space<vmem>>, %arg17: memref<2x2x5x160xf32, #tpu.memory_space<vmem>>, %arg18: memref<2x2x5x160xf32, #tpu.memory_space<vmem>>, %arg19: memref<2x6x96xf32, #tpu.memory_space<vmem>>, %arg20: memref<2x5x96xf32, #tpu.memory_space<vmem>>, %arg21: memref<2x2x5x160xf32, #tpu.memory_space<vmem>>) attributes {dimension_semantics = [], scalar_prefetch = 0 : i64, scratch_operands = 5 : i64, tpu.core_type = #tpu.core_type<tc>} {
    %c0 = arith.constant 0 : index
    %0 = memref.load %arg15[%c0] : memref<4xf32, #tpu.memory_space<smem>>
    %c1 = arith.constant 1 : index
    %1 = memref.load %arg15[%c1] : memref<4xf32, #tpu.memory_space<smem>>
    %c2 = arith.constant 2 : index
    %2 = memref.load %arg15[%c2] : memref<4xf32, #tpu.memory_space<smem>>
    %c3 = arith.constant 3 : index
    %3 = memref.load %arg15[%c3] : memref<4xf32, #tpu.memory_space<smem>>
    %cst = arith.constant 0.000000e+00 : f32
    %4 = vector.broadcast %cst : f32 to vector<2x2x5x160xf32>
    %c0_0 = arith.constant 0 : index
    %c0_1 = arith.constant 0 : index
    %c0_2 = arith.constant 0 : index
    %c0_3 = arith.constant 0 : index
    %5 = vector.load %arg17[%c0_0, %c0_1, %c0_2, %c0_3] : memref<2x2x5x160xf32, #tpu.memory_space<vmem>>, vector<2x2x5x160xf32>
    tpu.vector_store %arg17[%c0_0, %c0_1, %c0_2, %c0_3], %4 {strides = array<i32>} : memref<2x2x5x160xf32, #tpu.memory_space<vmem>>, vector<2x2x5x160xf32>,
    %cst_4 = arith.constant 0.000000e+00 : f32
    %6 = vector.broadcast %cst_4 : f32 to vector<2x2x5x160xf32>
    %c0_5 = arith.constant 0 : index
    %c0_6 = arith.constant 0 : index
    %c0_7 = arith.constant 0 : index
    %c0_8 = arith.constant 0 : index
    %7 = vector.load %arg18[%c0_5, %c0_6, %c0_7, %c0_8] : memref<2x2x5x160xf32, #tpu.memory_space<vmem>>, vector<2x2x5x160xf32>
    tpu.vector_store %arg18[%c0_5, %c0_6, %c0_7, %c0_8], %6 {strides = array<i32>} : memref<2x2x5x160xf32, #tpu.memory_space<vmem>>, vector<2x2x5x160xf32>,
    %cst_9 = arith.constant 0.000000e+00 : f32
    %8 = vector.broadcast %cst_9 : f32 to vector<2x6x96xf32>
    %c0_10 = arith.constant 0 : index
    %c0_11 = arith.constant 0 : index
    %c0_12 = arith.constant 0 : index
    %9 = vector.load %arg19[%c0_10, %c0_11, %c0_12] : memref<2x6x96xf32, #tpu.memory_space<vmem>>, vector<2x6x96xf32>
    tpu.vector_store %arg19[%c0_10, %c0_11, %c0_12], %8 {strides = array<i32>} : memref<2x6x96xf32, #tpu.memory_space<vmem>>, vector<2x6x96xf32>,
    %cst_13 = arith.constant 0.000000e+00 : f32
    %10 = vector.broadcast %cst_13 : f32 to vector<2x5x96xf32>
    %c0_14 = arith.constant 0 : index
    %c0_15 = arith.constant 0 : index
    %c0_16 = arith.constant 0 : index
    %11 = vector.load %arg20[%c0_14, %c0_15, %c0_16] : memref<2x5x96xf32, #tpu.memory_space<vmem>>, vector<2x5x96xf32>
    tpu.vector_store %arg20[%c0_14, %c0_15, %c0_16], %10 {strides = array<i32>} : memref<2x5x96xf32, #tpu.memory_space<vmem>>, vector<2x5x96xf32>,
    %cst_17 = arith.constant 0.000000e+00 : f32
    %12 = vector.broadcast %cst_17 : f32 to vector<2x2x5x160xf32>
    %c0_18 = arith.constant 0 : index
    %c0_19 = arith.constant 0 : index
    %c0_20 = arith.constant 0 : index
    %c0_21 = arith.constant 0 : index
    %13 = vector.load %arg21[%c0_18, %c0_19, %c0_20, %c0_21] : memref<2x2x5x160xf32, #tpu.memory_space<vmem>>, vector<2x2x5x160xf32>
    tpu.vector_store %arg21[%c0_18, %c0_19, %c0_20, %c0_21], %12 {strides = array<i32>} : memref<2x2x5x160xf32, #tpu.memory_space<vmem>>, vector<2x2x5x160xf32>,
    %c0_22 = arith.constant 0 : index
    %c0_23 = arith.constant 0 : index
    %14 = vector.load %arg4[%c0_22, %c0_23] : memref<1x160xf32, #tpu.memory_space<vmem>>, vector<1x160xf32>
    %c0_24 = arith.constant 0 : index
    %c0_25 = arith.constant 0 : index
    %c0_26 = arith.constant 0 : index
    %c0_27 = arith.constant 0 : index
    %15 = vector.load %arg0[%c0_24, %c0_25, %c0_26, %c0_27] : memref<4x2x5x288xf32, #tpu.memory_space<vmem>>, vector<1x2x4x288xf32>
    %16 = vector.shape_cast %15 : vector<1x2x4x288xf32> to vector<2x4x288xf32>
    %17 = vector.shape_cast %16 : vector<2x4x288xf32> to vector<8x288xf32>
    %c0_28 = arith.constant 0 : index
    %c0_29 = arith.constant 0 : index
    %c0_30 = arith.constant 0 : index
    %18 = vector.load %arg3[%c0_28, %c0_29, %c0_30] : memref<3x288x160xf32, #tpu.memory_space<vmem>>, vector<1x288x160xf32>
    %19 = vector.shape_cast %18 : vector<1x288x160xf32> to vector<288x160xf32>
    %cst_31 = arith.constant dense<0.000000e+00> : vector<8x160xf32>
    %20 = tpu.matmul %17, %19, %cst_31 {dimension_numbers = #tpu.dot_dimension_numbers<[1], [0], [0], [1], [0, 0, 1, 1], [], []>} : vector<8x288xf32>, vector<288x160xf32>, vector<8x160xf32> -> vector<8x160xf32>
    %c1_32 = arith.constant 1 : index
    %c0_33 = arith.constant 0 : index
    %c0_34 = arith.constant 0 : index
    %c0_35 = arith.constant 0 : index
    %21 = vector.load %arg0[%c1_32, %c0_33, %c0_34, %c0_35] : memref<4x2x5x288xf32, #tpu.memory_space<vmem>>, vector<1x2x4x288xf32>
    %22 = vector.shape_cast %21 : vector<1x2x4x288xf32> to vector<2x4x288xf32>
    %23 = vector.shape_cast %22 : vector<2x4x288xf32> to vector<8x288xf32>
    %c1_36 = arith.constant 1 : index
    %c0_37 = arith.constant 0 : index
    %c0_38 = arith.constant 0 : index
    %24 = vector.load %arg3[%c1_36, %c0_37, %c0_38] : memref<3x288x160xf32, #tpu.memory_space<vmem>>, vector<1x288x160xf32>
    %25 = vector.shape_cast %24 : vector<1x288x160xf32> to vector<288x160xf32>
    %cst_39 = arith.constant dense<0.000000e+00> : vector<8x160xf32>
    %26 = tpu.matmul %23, %25, %cst_39 {dimension_numbers = #tpu.dot_dimension_numbers<[1], [0], [0], [1], [0, 0, 1, 1], [], []>} : vector<8x288xf32>, vector<288x160xf32>, vector<8x160xf32> -> vector<8x160xf32>
    %27 = arith.addf %20, %26 : vector<8x160xf32>
    %c2_40 = arith.constant 2 : index
    %c0_41 = arith.constant 0 : index
    %c0_42 = arith.constant 0 : index
    %c0_43 = arith.constant 0 : index
    %28 = vector.load %arg0[%c2_40, %c0_41, %c0_42, %c0_43] : memref<4x2x5x288xf32, #tpu.memory_space<vmem>>, vector<1x2x4x288xf32>
    %29 = vector.shape_cast %28 : vector<1x2x4x288xf32> to vector<2x4x288xf32>
    %30 = vector.shape_cast %29 : vector<2x4x288xf32> to vector<8x288xf32>
    %c2_44 = arith.constant 2 : index
    %c0_45 = arith.constant 0 : index
    %c0_46 = arith.constant 0 : index
    %31 = vector.load %arg3[%c2_44, %c0_45, %c0_46] : memref<3x288x160xf32, #tpu.memory_space<vmem>>, vector<1x288x160xf32>
    %32 = vector.shape_cast %31 : vector<1x288x160xf32> to vector<288x160xf32>
    %cst_47 = arith.constant dense<0.000000e+00> : vector<8x160xf32>
    %33 = tpu.matmul %30, %32, %cst_47 {dimension_numbers = #tpu.dot_dimension_numbers<[1], [0], [0], [1], [0, 0, 1, 1], [], []>} : vector<8x288xf32>, vector<288x160xf32>, vector<8x160xf32> -> vector<8x160xf32>
    %34 = arith.addf %27, %33 : vector<8x160xf32>
    %35 = vector.broadcast %14 : vector<1x160xf32> to vector<8x160xf32>
    %36 = arith.addf %34, %35 : vector<8x160xf32>
    %c2_48 = arith.constant 2 : index
    %c0_49 = arith.constant 0 : index
    %c0_50 = arith.constant 0 : index
    %c0_51 = arith.constant 0 : index
    %37 = vector.load %arg0[%c2_48, %c0_49, %c0_50, %c0_51] : memref<4x2x5x288xf32, #tpu.memory_space<vmem>>, vector<1x2x4x288xf32>
    %38 = vector.shape_cast %37 : vector<1x2x4x288xf32> to vector<2x4x288xf32>
    %39 = vector.shape_cast %38 : vector<2x4x288xf32> to vector<8x288xf32>
    %c0_52 = arith.constant 0 : index
    %c0_53 = arith.constant 0 : index
    %c0_54 = arith.constant 0 : index
    %40 = vector.load %arg3[%c0_52, %c0_53, %c0_54] : memref<3x288x160xf32, #tpu.memory_space<vmem>>, vector<1x288x160xf32>
    %41 = vector.shape_cast %40 : vector<1x288x160xf32> to vector<288x160xf32>
    %cst_55 = arith.constant dense<0.000000e+00> : vector<8x160xf32>
    %42 = tpu.matmul %39, %41, %cst_55 {dimension_numbers = #tpu.dot_dimension_numbers<[1], [0], [0], [1], [0, 0, 1, 1], [], []>} : vector<8x288xf32>, vector<288x160xf32>, vector<8x160xf32> -> vector<8x160xf32>
    %c3_56 = arith.constant 3 : index
    %c0_57 = arith.constant 0 : index
    %c0_58 = arith.constant 0 : index
    %c0_59 = arith.constant 0 : index
    %43 = vector.load %arg0[%c3_56, %c0_57, %c0_58, %c0_59] : memref<4x2x5x288xf32, #tpu.memory_space<vmem>>, vector<1x2x4x288xf32>
    %44 = vector.shape_cast %43 : vector<1x2x4x288xf32> to vector<2x4x288xf32>
    %45 = vector.shape_cast %44 : vector<2x4x288xf32> to vector<8x288xf32>
    %c1_60 = arith.constant 1 : index
    %c0_61 = arith.constant 0 : index
    %c0_62 = arith.constant 0 : index
    %46 = vector.load %arg3[%c1_60, %c0_61, %c0_62] : memref<3x288x160xf32, #tpu.memory_space<vmem>>, vector<1x288x160xf32>
    %47 = vector.shape_cast %46 : vector<1x288x160xf32> to vector<288x160xf32>
    %cst_63 = arith.constant dense<0.000000e+00> : vector<8x160xf32>
    %48 = tpu.matmul %45, %47, %cst_63 {dimension_numbers = #tpu.dot_dimension_numbers<[1], [0], [0], [1], [0, 0, 1, 1], [], []>} : vector<8x288xf32>, vector<288x160xf32>, vector<8x160xf32> -> vector<8x160xf32>
    %49 = arith.addf %42, %48 : vector<8x160xf32>
    %c0_64 = arith.constant 0 : index
    %c0_65 = arith.constant 0 : index
    %c1_66 = arith.constant 1 : index
    %c0_67 = arith.constant 0 : index
    %50 = vector.load %arg0[%c0_64, %c0_65, %c1_66, %c0_67] : memref<4x2x5x288xf32, #tpu.memory_space<vmem>>, vector<1x2x4x288xf32>
    %51 = vector.shape_cast %50 : vector<1x2x4x288xf32> to vector<2x4x288xf32>
    %52 = vector.shape_cast %51 : vector<2x4x288xf32> to vector<8x288xf32>
    %c2_68 = arith.constant 2 : index
    %c0_69 = arith.constant 0 : index
    %c0_70 = arith.constant 0 : index
    %53 = vector.load %arg3[%c2_68, %c0_69, %c0_70] : memref<3x288x160xf32, #tpu.memory_space<vmem>>, vector<1x288x160xf32>
    %54 = vector.shape_cast %53 : vector<1x288x160xf32> to vector<288x160xf32>
    %cst_71 = arith.constant dense<0.000000e+00> : vector<8x160xf32>
    %55 = tpu.matmul %52, %54, %cst_71 {dimension_numbers = #tpu.dot_dimension_numbers<[1], [0], [0], [1], [0, 0, 1, 1], [], []>} : vector<8x288xf32>, vector<288x160xf32>, vector<8x160xf32> -> vector<8x160xf32>
    %56 = arith.addf %49, %55 : vector<8x160xf32>
    %57 = vector.broadcast %14 : vector<1x160xf32> to vector<8x160xf32>
    %58 = arith.addf %56, %57 : vector<8x160xf32>
    %cst_72 = arith.constant 0.000000e+00 : f32
    %59 = vector.broadcast %cst_72 : f32 to vector<8x160xf32>
    %60 = arith.cmpf ogt, %36, %59 : vector<8x160xf32>
    %61 = vector.broadcast %0 : f32 to vector<8x160xf32>
    %62 = arith.mulf %61, %36 : vector<8x160xf32>
    %63 = arith.select %60, %36, %62 : vector<8x160xi1>, vector<8x160xf32>
    %cst_73 = arith.constant 0.000000e+00 : f32
    %64 = vector.broadcast %cst_73 : f32 to vector<8x160xf32>
    %65 = arith.cmpf ogt, %58, %64 : vector<8x160xf32>
    %66 = vector.broadcast %0 : f32 to vector<8x160xf32>
    %67 = arith.mulf %66, %58 : vector<8x160xf32>
    %68 = arith.select %65, %58, %67 : vector<8x160xi1>, vector<8x160xf32>
    %69 = vector.shape_cast %63 : vector<8x160xf32> to vector<2x4x160xf32>
    %c1_74 = arith.constant 1 : index
    %c0_75 = arith.constant 0 : index
    %c0_76 = arith.constant 0 : index
    %c0_77 = arith.constant 0 : index
    %70 = vector.load %arg17[%c1_74, %c0_75, %c0_76, %c0_77] : memref<2x2x5x160xf32, #tpu.memory_space<vmem>>, vector<1x2x4x160xf32>
    %71 = vector.shape_cast %70 : vector<1x2x4x160xf32> to vector<2x4x160xf32>
    %72 = vector.shape_cast %69 : vector<2x4x160xf32> to vector<1x2x4x160xf32>
    tpu.vector_store %arg17[%c1_74, %c0_75, %c0_76, %c0_77], %72 {strides = array<i32>} : memref<2x2x5x160xf32, #tpu.memory_space<vmem>>, vector<1x2x4x160xf32>,
    %73 = vector.shape_cast %68 : vector<8x160xf32> to vector<2x4x160xf32>
    %c0_78 = arith.constant 0 : index
    %c0_79 = arith.constant 0 : index
    %c1_80 = arith.constant 1 : index
    %c0_81 = arith.constant 0 : index
    %74 = vector.load %arg17[%c0_78, %c0_79, %c1_80, %c0_81] : memref<2x2x5x160xf32, #tpu.memory_space<vmem>>, vector<1x2x4x160xf32>
    %75 = vector.shape_cast %74 : vector<1x2x4x160xf32> to vector<2x4x160xf32>
    %76 = vector.shape_cast %73 : vector<2x4x160xf32> to vector<1x2x4x160xf32>
    tpu.vector_store %arg17[%c0_78, %c0_79, %c1_80, %c0_81], %76 {strides = array<i32>} : memref<2x2x5x160xf32, #tpu.memory_space<vmem>>, vector<1x2x4x160xf32>,
    %c0_82 = arith.constant 0 : index
    %c0_83 = arith.constant 0 : index
    %77 = vector.load %arg6[%c0_82, %c0_83] : memref<1x160xf32, #tpu.memory_space<vmem>>, vector<1x160xf32>
    %c0_84 = arith.constant 0 : index
    %c0_85 = arith.constant 0 : index
    %c0_86 = arith.constant 0 : index
    %c0_87 = arith.constant 0 : index
    %78 = vector.load %arg17[%c0_84, %c0_85, %c0_86, %c0_87] : memref<2x2x5x160xf32, #tpu.memory_space<vmem>>, vector<1x2x4x160xf32>
    %79 = vector.shape_cast %78 : vector<1x2x4x160xf32> to vector<2x4x160xf32>
    %80 = vector.shape_cast %79 : vector<2x4x160xf32> to vector<8x160xf32>
    %c0_88 = arith.constant 0 : index
    %c0_89 = arith.constant 0 : index
    %c0_90 = arith.constant 0 : index
    %81 = vector.load %arg5[%c0_88, %c0_89, %c0_90] : memref<3x160x160xf32, #tpu.memory_space<vmem>>, vector<1x160x160xf32>
    %82 = vector.shape_cast %81 : vector<1x160x160xf32> to vector<160x160xf32>
    %cst_91 = arith.constant dense<0.000000e+00> : vector<8x160xf32>
    %83 = tpu.matmul %80, %82, %cst_91 {dimension_numbers = #tpu.dot_dimension_numbers<[1], [0], [0], [1], [0, 0, 1, 1], [], []>} : vector<8x160xf32>, vector<160x160xf32>, vector<8x160xf32> -> vector<8x160xf32>
    %c1_92 = arith.constant 1 : index
    %c0_93 = arith.constant 0 : index
    %c0_94 = arith.constant 0 : index
    %c0_95 = arith.constant 0 : index
    %84 = vector.load %arg17[%c1_92, %c0_93, %c0_94, %c0_95] : memref<2x2x5x160xf32, #tpu.memory_space<vmem>>, vector<1x2x4x160xf32>
    %85 = vector.shape_cast %84 : vector<1x2x4x160xf32> to vector<2x4x160xf32>
    %86 = vector.shape_cast %85 : vector<2x4x160xf32> to vector<8x160xf32>
    %c1_96 = arith.constant 1 : index
    %c0_97 = arith.constant 0 : index
    %c0_98 = arith.constant 0 : index
    %87 = vector.load %arg5[%c1_96, %c0_97, %c0_98] : memref<3x160x160xf32, #tpu.memory_space<vmem>>, vector<1x160x160xf32>
    %88 = vector.shape_cast %87 : vector<1x160x160xf32> to vector<160x160xf32>
    %cst_99 = arith.constant dense<0.000000e+00> : vector<8x160xf32>
    %89 = tpu.matmul %86, %88, %cst_99 {dimension_numbers = #tpu.dot_dimension_numbers<[1], [0], [0], [1], [0, 0, 1, 1], [], []>} : vector<8x160xf32>, vector<160x160xf32>, vector<8x160xf32> -> vector<8x160xf32>
    %90 = arith.addf %83, %89 : vector<8x160xf32>
    %c0_100 = arith.constant 0 : index
    %c0_101 = arith.constant 0 : index
    %c1_102 = arith.constant 1 : index
    %c0_103 = arith.constant 0 : index
    %91 = vector.load %arg17[%c0_100, %c0_101, %c1_102, %c0_103] : memref<2x2x5x160xf32, #tpu.memory_space<vmem>>, vector<1x2x4x160xf32>
    %92 = vector.shape_cast %91 : vector<1x2x4x160xf32> to vector<2x4x160xf32>
    %93 = vector.shape_cast %92 : vector<2x4x160xf32> to vector<8x160xf32>
    %c2_104 = arith.constant 2 : index
    %c0_105 = arith.constant 0 : index
    %c0_106 = arith.constant 0 : index
    %94 = vector.load %arg5[%c2_104, %c0_105, %c0_106] : memref<3x160x160xf32, #tpu.memory_space<vmem>>, vector<1x160x160xf32>
    %95 = vector.shape_cast %94 : vector<1x160x160xf32> to vector<160x160xf32>
    %cst_107 = arith.constant dense<0.000000e+00> : vector<8x160xf32>
    %96 = tpu.matmul %93, %95, %cst_107 {dimension_numbers = #tpu.dot_dimension_numbers<[1], [0], [0], [1], [0, 0, 1, 1], [], []>} : vector<8x160xf32>, vector<160x160xf32>, vector<8x160xf32> -> vector<8x160xf32>
    %97 = arith.addf %90, %96 : vector<8x160xf32>
    %98 = vector.broadcast %77 : vector<1x160xf32> to vector<8x160xf32>
    %99 = arith.addf %97, %98 : vector<8x160xf32>
    %c1_108 = arith.constant 1 : index
    %c0_109 = arith.constant 0 : index
    %c0_110 = arith.constant 0 : index
    %c0_111 = arith.constant 0 : index
    %100 = vector.load %arg17[%c1_108, %c0_109, %c0_110, %c0_111] : memref<2x2x5x160xf32, #tpu.memory_space<vmem>>, vector<1x2x4x160xf32>
    %101 = vector.shape_cast %100 : vector<1x2x4x160xf32> to vector<2x4x160xf32>
    %102 = vector.shape_cast %101 : vector<2x4x160xf32> to vector<8x160xf32>
    %c0_112 = arith.constant 0 : index
    %c0_113 = arith.constant 0 : index
    %c0_114 = arith.constant 0 : index
    %103 = vector.load %arg5[%c0_112, %c0_113, %c0_114] : memref<3x160x160xf32, #tpu.memory_space<vmem>>, vector<1x160x160xf32>
    %104 = vector.shape_cast %103 : vector<1x160x160xf32> to vector<160x160xf32>
    %cst_115 = arith.constant dense<0.000000e+00> : vector<8x160xf32>
    %105 = tpu.matmul %102, %104, %cst_115 {dimension_numbers = #tpu.dot_dimension_numbers<[1], [0], [0], [1], [0, 0, 1, 1], [], []>} : vector<8x160xf32>, vector<160x160xf32>, vector<8x160xf32> -> vector<8x160xf32>
    %c0_116 = arith.constant 0 : index
    %c0_117 = arith.constant 0 : index
    %c1_118 = arith.constant 1 : index
    %c0_119 = arith.constant 0 : index
    %106 = vector.load %arg17[%c0_116, %c0_117, %c1_118, %c0_119] : memref<2x2x5x160xf32, #tpu.memory_space<vmem>>, vector<1x2x4x160xf32>
    %107 = vector.shape_cast %106 : vector<1x2x4x160xf32> to vector<2x4x160xf32>
    %108 = vector.shape_cast %107 : vector<2x4x160xf32> to vector<8x160xf32>
    %c1_120 = arith.constant 1 : index
    %c0_121 = arith.constant 0 : index
    %c0_122 = arith.constant 0 : index
    %109 = vector.load %arg5[%c1_120, %c0_121, %c0_122] : memref<3x160x160xf32, #tpu.memory_space<vmem>>, vector<1x160x160xf32>
    %110 = vector.shape_cast %109 : vector<1x160x160xf32> to vector<160x160xf32>
    %cst_123 = arith.constant dense<0.000000e+00> : vector<8x160xf32>
    %111 = tpu.matmul %108, %110, %cst_123 {dimension_numbers = #tpu.dot_dimension_numbers<[1], [0], [0], [1], [0, 0, 1, 1], [], []>} : vector<8x160xf32>, vector<160x160xf32>, vector<8x160xf32> -> vector<8x160xf32>
    %112 = arith.addf %105, %111 : vector<8x160xf32>
    %c1_124 = arith.constant 1 : index
    %c0_125 = arith.constant 0 : index
    %c1_126 = arith.constant 1 : index
    %c0_127 = arith.constant 0 : index
    %113 = vector.load %arg17[%c1_124, %c0_125, %c1_126, %c0_127] : memref<2x2x5x160xf32, #tpu.memory_space<vmem>>, vector<1x2x4x160xf32>
    %114 = vector.shape_cast %113 : vector<1x2x4x160xf32> to vector<2x4x160xf32>
    %115 = vector.shape_cast %114 : vector<2x4x160xf32> to vector<8x160xf32>
    %c2_128 = arith.constant 2 : index
    %c0_129 = arith.constant 0 : index
    %c0_130 = arith.constant 0 : index
    %116 = vector.load %arg5[%c2_128, %c0_129, %c0_130] : memref<3x160x160xf32, #tpu.memory_space<vmem>>, vector<1x160x160xf32>
    %117 = vector.shape_cast %116 : vector<1x160x160xf32> to vector<160x160xf32>
    %cst_131 = arith.constant dense<0.000000e+00> : vector<8x160xf32>
    %118 = tpu.matmul %115, %117, %cst_131 {dimension_numbers = #tpu.dot_dimension_numbers<[1], [0], [0], [1], [0, 0, 1, 1], [], []>} : vector<8x160xf32>, vector<160x160xf32>, vector<8x160xf32> -> vector<8x160xf32>
    %119 = arith.addf %112, %118 : vector<8x160xf32>
    %120 = vector.broadcast %77 : vector<1x160xf32> to vector<8x160xf32>
    %121 = arith.addf %119, %120 : vector<8x160xf32>
    %cst_132 = arith.constant 0.000000e+00 : f32
    %122 = vector.broadcast %cst_132 : f32 to vector<8x160xf32>
    %123 = arith.cmpf ogt, %99, %122 : vector<8x160xf32>
    %124 = vector.broadcast %3 : f32 to vector<8x160xf32>
    %125 = arith.mulf %124, %99 : vector<8x160xf32>
    %126 = arith.select %123, %99, %125 : vector<8x160xi1>, vector<8x160xf32>
    %cst_133 = arith.constant 0.000000e+00 : f32
    %127 = vector.broadcast %cst_133 : f32 to vector<8x160xf32>
    %128 = arith.cmpf ogt, %121, %127 : vector<8x160xf32>
    %129 = vector.broadcast %3 : f32 to vector<8x160xf32>
    %130 = arith.mulf %129, %121 : vector<8x160xf32>
    %131 = arith.select %128, %121, %130 : vector<8x160xi1>, vector<8x160xf32>
    %132 = vector.shape_cast %126 : vector<8x160xf32> to vector<2x4x160xf32>
    %c1_134 = arith.constant 1 : index
    %c0_135 = arith.constant 0 : index
    %c0_136 = arith.constant 0 : index
    %c0_137 = arith.constant 0 : index
    %133 = vector.load %arg18[%c1_134, %c0_135, %c0_136, %c0_137] : memref<2x2x5x160xf32, #tpu.memory_space<vmem>>, vector<1x2x4x160xf32>
    %134 = vector.shape_cast %133 : vector<1x2x4x160xf32> to vector<2x4x160xf32>
    %135 = vector.shape_cast %132 : vector<2x4x160xf32> to vector<1x2x4x160xf32>
    tpu.vector_store %arg18[%c1_134, %c0_135, %c0_136, %c0_137], %135 {strides = array<i32>} : memref<2x2x5x160xf32, #tpu.memory_space<vmem>>, vector<1x2x4x160xf32>,
    %136 = vector.shape_cast %131 : vector<8x160xf32> to vector<2x4x160xf32>
    %c0_138 = arith.constant 0 : index
    %c0_139 = arith.constant 0 : index
    %c1_140 = arith.constant 1 : index
    %c0_141 = arith.constant 0 : index
    %137 = vector.load %arg18[%c0_138, %c0_139, %c1_140, %c0_141] : memref<2x2x5x160xf32, #tpu.memory_space<vmem>>, vector<1x2x4x160xf32>
    %138 = vector.shape_cast %137 : vector<1x2x4x160xf32> to vector<2x4x160xf32>
    %139 = vector.shape_cast %136 : vector<2x4x160xf32> to vector<1x2x4x160xf32>
    tpu.vector_store %arg18[%c0_138, %c0_139, %c1_140, %c0_141], %139 {strides = array<i32>} : memref<2x2x5x160xf32, #tpu.memory_space<vmem>>, vector<1x2x4x160xf32>,
    %c0_142 = arith.constant 0 : index
    %c0_143 = arith.constant 0 : index
    %c0_144 = arith.constant 0 : index
    %c0_145 = arith.constant 0 : index
    %140 = vector.load %arg18[%c0_142, %c0_143, %c0_144, %c0_145] : memref<2x2x5x160xf32, #tpu.memory_space<vmem>>, vector<1x2x4x160xf32>
    %141 = vector.shape_cast %140 : vector<1x2x4x160xf32> to vector<2x4x160xf32>
    %142 = vector.shape_cast %141 : vector<2x4x160xf32> to vector<8x160xf32>
    %c0_146 = arith.constant 0 : index
    %c0_147 = arith.constant 0 : index
    %c0_148 = arith.constant 0 : index
    %143 = vector.load %arg7[%c0_146, %c0_147, %c0_148] : memref<3x160x96xf32, #tpu.memory_space<vmem>>, vector<1x160x96xf32>
    %144 = vector.shape_cast %143 : vector<1x160x96xf32> to vector<160x96xf32>
    %cst_149 = arith.constant dense<0.000000e+00> : vector<8x96xf32>
    %145 = tpu.matmul %142, %144, %cst_149 {dimension_numbers = #tpu.dot_dimension_numbers<[1], [0], [0], [1], [0, 0, 1, 1], [], []>} : vector<8x160xf32>, vector<160x96xf32>, vector<8x96xf32> -> vector<8x96xf32>
    %c1_150 = arith.constant 1 : index
    %c0_151 = arith.constant 0 : index
    %c0_152 = arith.constant 0 : index
    %c0_153 = arith.constant 0 : index
    %146 = vector.load %arg18[%c1_150, %c0_151, %c0_152, %c0_153] : memref<2x2x5x160xf32, #tpu.memory_space<vmem>>, vector<1x2x4x160xf32>
    %147 = vector.shape_cast %146 : vector<1x2x4x160xf32> to vector<2x4x160xf32>
    %148 = vector.shape_cast %147 : vector<2x4x160xf32> to vector<8x160xf32>
    %c1_154 = arith.constant 1 : index
    %c0_155 = arith.constant 0 : index
    %c0_156 = arith.constant 0 : index
    %149 = vector.load %arg7[%c1_154, %c0_155, %c0_156] : memref<3x160x96xf32, #tpu.memory_space<vmem>>, vector<1x160x96xf32>
    %150 = vector.shape_cast %149 : vector<1x160x96xf32> to vector<160x96xf32>
    %cst_157 = arith.constant dense<0.000000e+00> : vector<8x96xf32>
    %151 = tpu.matmul %148, %150, %cst_157 {dimension_numbers = #tpu.dot_dimension_numbers<[1], [0], [0], [1], [0, 0, 1, 1], [], []>} : vector<8x160xf32>, vector<160x96xf32>, vector<8x96xf32> -> vector<8x96xf32>
    %152 = arith.addf %145, %151 : vector<8x96xf32>
    %c0_158 = arith.constant 0 : index
    %c0_159 = arith.constant 0 : index
    %c1_160 = arith.constant 1 : index
    %c0_161 = arith.constant 0 : index
    %153 = vector.load %arg18[%c0_158, %c0_159, %c1_160, %c0_161] : memref<2x2x5x160xf32, #tpu.memory_space<vmem>>, vector<1x2x4x160xf32>
    %154 = vector.shape_cast %153 : vector<1x2x4x160xf32> to vector<2x4x160xf32>
    %155 = vector.shape_cast %154 : vector<2x4x160xf32> to vector<8x160xf32>
    %c2_162 = arith.constant 2 : index
    %c0_163 = arith.constant 0 : index
    %c0_164 = arith.constant 0 : index
    %156 = vector.load %arg7[%c2_162, %c0_163, %c0_164] : memref<3x160x96xf32, #tpu.memory_space<vmem>>, vector<1x160x96xf32>
    %157 = vector.shape_cast %156 : vector<1x160x96xf32> to vector<160x96xf32>
    %cst_165 = arith.constant dense<0.000000e+00> : vector<8x96xf32>
    %158 = tpu.matmul %155, %157, %cst_165 {dimension_numbers = #tpu.dot_dimension_numbers<[1], [0], [0], [1], [0, 0, 1, 1], [], []>} : vector<8x160xf32>, vector<160x96xf32>, vector<8x96xf32> -> vector<8x96xf32>
    %159 = arith.addf %152, %158 : vector<8x96xf32>
    %c0_166 = arith.constant 0 : index
    %c0_167 = arith.constant 0 : index
    %160 = vector.load %arg8[%c0_166, %c0_167] : memref<1x96xf32, #tpu.memory_space<vmem>>, vector<1x96xf32>
    %161 = vector.broadcast %160 : vector<1x96xf32> to vector<8x96xf32>
    %162 = arith.addf %159, %161 : vector<8x96xf32>
    %cst_168 = arith.constant 0.000000e+00 : f32
    %163 = vector.broadcast %cst_168 : f32 to vector<8x96xf32>
    %164 = arith.cmpf ogt, %162, %163 : vector<8x96xf32>
    %165 = vector.broadcast %1 : f32 to vector<8x96xf32>
    %166 = arith.mulf %165, %162 : vector<8x96xf32>
    %167 = arith.select %164, %162, %166 : vector<8x96xi1>, vector<8x96xf32>
    %168 = vector.shape_cast %167 : vector<8x96xf32> to vector<2x4x96xf32>
    %c0_169 = arith.constant 0 : index
    %c1_170 = arith.constant 1 : index
    %c0_171 = arith.constant 0 : index
    %169 = vector.load %arg19[%c0_169, %c1_170, %c0_171] : memref<2x6x96xf32, #tpu.memory_space<vmem>>, vector<2x4x96xf32>
    tpu.vector_store %arg19[%c0_169, %c1_170, %c0_171], %168 {strides = array<i32>} : memref<2x6x96xf32, #tpu.memory_space<vmem>>, vector<2x4x96xf32>,
    %c0_172 = arith.constant 0 : index
    %c0_173 = arith.constant 0 : index
    %c0_174 = arith.constant 0 : index
    %170 = vector.load %arg19[%c0_172, %c0_173, %c0_174] : memref<2x6x96xf32, #tpu.memory_space<vmem>>, vector<2x4x96xf32>
    %171 = vector.shape_cast %170 : vector<2x4x96xf32> to vector<8x96xf32>
    %c0_175 = arith.constant 0 : index
    %c0_176 = arith.constant 0 : index
    %c0_177 = arith.constant 0 : index
    %172 = vector.load %arg9[%c0_175, %c0_176, %c0_177] : memref<3x96x96xf32, #tpu.memory_space<vmem>>, vector<1x96x96xf32>
    %173 = vector.shape_cast %172 : vector<1x96x96xf32> to vector<96x96xf32>
    %cst_178 = arith.constant dense<0.000000e+00> : vector<8x96xf32>
    %174 = tpu.matmul %171, %173, %cst_178 {dimension_numbers = #tpu.dot_dimension_numbers<[1], [0], [0], [1], [0, 0, 1, 1], [], []>} : vector<8x96xf32>, vector<96x96xf32>, vector<8x96xf32> -> vector<8x96xf32>
    %c0_179 = arith.constant 0 : index
    %c1_180 = arith.constant 1 : index
    %c0_181 = arith.constant 0 : index
    %175 = vector.load %arg19[%c0_179, %c1_180, %c0_181] : memref<2x6x96xf32, #tpu.memory_space<vmem>>, vector<2x4x96xf32>
    %176 = vector.shape_cast %175 : vector<2x4x96xf32> to vector<8x96xf32>
    %c1_182 = arith.constant 1 : index
    %c0_183 = arith.constant 0 : index
    %c0_184 = arith.constant 0 : index
    %177 = vector.load %arg9[%c1_182, %c0_183, %c0_184] : memref<3x96x96xf32, #tpu.memory_space<vmem>>, vector<1x96x96xf32>
    %178 = vector.shape_cast %177 : vector<1x96x96xf32> to vector<96x96xf32>
    %cst_185 = arith.constant dense<0.000000e+00> : vector<8x96xf32>
    %179 = tpu.matmul %176, %178, %cst_185 {dimension_numbers = #tpu.dot_dimension_numbers<[1], [0], [0], [1], [0, 0, 1, 1], [], []>} : vector<8x96xf32>, vector<96x96xf32>, vector<8x96xf32> -> vector<8x96xf32>
    %180 = arith.addf %174, %179 : vector<8x96xf32>
    %c0_186 = arith.constant 0 : index
    %c2_187 = arith.constant 2 : index
    %c0_188 = arith.constant 0 : index
    %181 = vector.load %arg19[%c0_186, %c2_187, %c0_188] : memref<2x6x96xf32, #tpu.memory_space<vmem>>, vector<2x4x96xf32>
    %182 = vector.shape_cast %181 : vector<2x4x96xf32> to vector<8x96xf32>
    %c2_189 = arith.constant 2 : index
    %c0_190 = arith.constant 0 : index
    %c0_191 = arith.constant 0 : index
    %183 = vector.load %arg9[%c2_189, %c0_190, %c0_191] : memref<3x96x96xf32, #tpu.memory_space<vmem>>, vector<1x96x96xf32>
    %184 = vector.shape_cast %183 : vector<1x96x96xf32> to vector<96x96xf32>
    %cst_192 = arith.constant dense<0.000000e+00> : vector<8x96xf32>
    %185 = tpu.matmul %182, %184, %cst_192 {dimension_numbers = #tpu.dot_dimension_numbers<[1], [0], [0], [1], [0, 0, 1, 1], [], []>} : vector<8x96xf32>, vector<96x96xf32>, vector<8x96xf32> -> vector<8x96xf32>
    %186 = arith.addf %180, %185 : vector<8x96xf32>
    %c0_193 = arith.constant 0 : index
    %c0_194 = arith.constant 0 : index
    %187 = vector.load %arg10[%c0_193, %c0_194] : memref<1x96xf32, #tpu.memory_space<vmem>>, vector<1x96xf32>
    %188 = vector.broadcast %187 : vector<1x96xf32> to vector<8x96xf32>
    %189 = arith.addf %186, %188 : vector<8x96xf32>
    %cst_195 = arith.constant 0.000000e+00 : f32
    %190 = vector.broadcast %cst_195 : f32 to vector<8x96xf32>
    %191 = arith.cmpf ogt, %189, %190 : vector<8x96xf32>
    %192 = vector.broadcast %2 : f32 to vector<8x96xf32>
    %193 = arith.mulf %192, %189 : vector<8x96xf32>
    %194 = arith.select %191, %189, %193 : vector<8x96xi1>, vector<8x96xf32>
    %195 = vector.shape_cast %194 : vector<8x96xf32> to vector<2x4x96xf32>
    %c0_196 = arith.constant 0 : index
    %c0_197 = arith.constant 0 : index
    %c0_198 = arith.constant 0 : index
    %196 = vector.load %arg20[%c0_196, %c0_197, %c0_198] : memref<2x5x96xf32, #tpu.memory_space<vmem>>, vector<2x4x96xf32>
    tpu.vector_store %arg20[%c0_196, %c0_197, %c0_198], %195 {strides = array<i32>} : memref<2x5x96xf32, #tpu.memory_space<vmem>>, vector<2x4x96xf32>,
    %c0_199 = arith.constant 0 : index
    %c0_200 = arith.constant 0 : index
    %197 = vector.load %arg12[%c0_199, %c0_200] : memref<1x160xf32, #tpu.memory_space<vmem>>, vector<1x160xf32>
    %c0_201 = arith.constant 0 : index
    %c0_202 = arith.constant 0 : index
    %c0_203 = arith.constant 0 : index
    %198 = vector.load %arg20[%c0_201, %c0_202, %c0_203] : memref<2x5x96xf32, #tpu.memory_space<vmem>>, vector<2x4x96xf32>
    %199 = vector.shape_cast %198 : vector<2x4x96xf32> to vector<8x96xf32>
    %c0_204 = arith.constant 0 : index
    %c1_205 = arith.constant 1 : index
    %c0_206 = arith.constant 0 : index
    %200 = vector.load %arg20[%c0_204, %c1_205, %c0_206] : memref<2x5x96xf32, #tpu.memory_space<vmem>>, vector<2x4x96xf32>
    %201 = vector.shape_cast %200 : vector<2x4x96xf32> to vector<8x96xf32>
    %c0_207 = arith.constant 0 : index
    %c0_208 = arith.constant 0 : index
    %c0_209 = arith.constant 0 : index
    %202 = vector.load %arg11[%c0_207, %c0_208, %c0_209] : memref<3x96x160xf32, #tpu.memory_space<vmem>>, vector<1x96x160xf32>
    %203 = vector.shape_cast %202 : vector<1x96x160xf32> to vector<96x160xf32>
    %cst_210 = arith.constant dense<0.000000e+00> : vector<8x160xf32>
    %204 = tpu.matmul %199, %203, %cst_210 {dimension_numbers = #tpu.dot_dimension_numbers<[1], [0], [0], [1], [0, 0, 1, 1], [], []>} : vector<8x96xf32>, vector<96x160xf32>, vector<8x160xf32> -> vector<8x160xf32>
    %205 = vector.broadcast %197 : vector<1x160xf32> to vector<8x160xf32>
    %206 = arith.addf %204, %205 : vector<8x160xf32>
    %c1_211 = arith.constant 1 : index
    %c0_212 = arith.constant 0 : index
    %c0_213 = arith.constant 0 : index
    %207 = vector.load %arg11[%c1_211, %c0_212, %c0_213] : memref<3x96x160xf32, #tpu.memory_space<vmem>>, vector<1x96x160xf32>
    %208 = vector.shape_cast %207 : vector<1x96x160xf32> to vector<96x160xf32>
    %cst_214 = arith.constant dense<0.000000e+00> : vector<8x160xf32>
    %209 = tpu.matmul %199, %208, %cst_214 {dimension_numbers = #tpu.dot_dimension_numbers<[1], [0], [0], [1], [0, 0, 1, 1], [], []>} : vector<8x96xf32>, vector<96x160xf32>, vector<8x160xf32> -> vector<8x160xf32>
    %c2_215 = arith.constant 2 : index
    %c0_216 = arith.constant 0 : index
    %c0_217 = arith.constant 0 : index
    %210 = vector.load %arg11[%c2_215, %c0_216, %c0_217] : memref<3x96x160xf32, #tpu.memory_space<vmem>>, vector<1x96x160xf32>
    %211 = vector.shape_cast %210 : vector<1x96x160xf32> to vector<96x160xf32>
    %cst_218 = arith.constant dense<0.000000e+00> : vector<8x160xf32>
    %212 = tpu.matmul %201, %211, %cst_218 {dimension_numbers = #tpu.dot_dimension_numbers<[1], [0], [0], [1], [0, 0, 1, 1], [], []>} : vector<8x96xf32>, vector<96x160xf32>, vector<8x160xf32> -> vector<8x160xf32>
    %213 = arith.addf %209, %212 : vector<8x160xf32>
    %214 = vector.broadcast %197 : vector<1x160xf32> to vector<8x160xf32>
    %215 = arith.addf %213, %214 : vector<8x160xf32>
    %c1_219 = arith.constant 1 : index
    %c0_220 = arith.constant 0 : index
    %c0_221 = arith.constant 0 : index
    %c0_222 = arith.constant 0 : index
    %216 = vector.load %arg18[%c1_219, %c0_220, %c0_221, %c0_222] : memref<2x2x5x160xf32, #tpu.memory_space<vmem>>, vector<1x2x4x160xf32>
    %217 = vector.shape_cast %216 : vector<1x2x4x160xf32> to vector<2x4x160xf32>
    %218 = vector.shape_cast %217 : vector<2x4x160xf32> to vector<8x160xf32>
    %c0_223 = arith.constant 0 : index
    %c0_224 = arith.constant 0 : index
    %c1_225 = arith.constant 1 : index
    %c0_226 = arith.constant 0 : index
    %219 = vector.load %arg18[%c0_223, %c0_224, %c1_225, %c0_226] : memref<2x2x5x160xf32, #tpu.memory_space<vmem>>, vector<1x2x4x160xf32>
    %220 = vector.shape_cast %219 : vector<1x2x4x160xf32> to vector<2x4x160xf32>
    %221 = vector.shape_cast %220 : vector<2x4x160xf32> to vector<8x160xf32>
    %222 = arith.addf %206, %218 : vector<8x160xf32>
    %cst_227 = arith.constant 0.000000e+00 : f32
    %223 = vector.broadcast %cst_227 : f32 to vector<8x160xf32>
    %224 = arith.cmpf ogt, %222, %223 : vector<8x160xf32>
    %225 = vector.broadcast %3 : f32 to vector<8x160xf32>
    %226 = arith.mulf %225, %222 : vector<8x160xf32>
    %227 = arith.select %224, %222, %226 : vector<8x160xi1>, vector<8x160xf32>
    %228 = arith.addf %215, %221 : vector<8x160xf32>
    %cst_228 = arith.constant 0.000000e+00 : f32
    %229 = vector.broadcast %cst_228 : f32 to vector<8x160xf32>
    %230 = arith.cmpf ogt, %228, %229 : vector<8x160xf32>
    %231 = vector.broadcast %3 : f32 to vector<8x160xf32>
    %232 = arith.mulf %231, %228 : vector<8x160xf32>
    %233 = arith.select %230, %228, %232 : vector<8x160xi1>, vector<8x160xf32>
    %234 = vector.shape_cast %227 : vector<8x160xf32> to vector<2x4x160xf32>
    %c0_229 = arith.constant 0 : index
    %c0_230 = arith.constant 0 : index
    %c0_231 = arith.constant 0 : index
    %c0_232 = arith.constant 0 : index
    %235 = vector.load %arg21[%c0_229, %c0_230, %c0_231, %c0_232] : memref<2x2x5x160xf32, #tpu.memory_space<vmem>>, vector<1x2x4x160xf32>
    %236 = vector.shape_cast %235 : vector<1x2x4x160xf32> to vector<2x4x160xf32>
    %237 = vector.shape_cast %234 : vector<2x4x160xf32> to vector<1x2x4x160xf32>
    tpu.vector_store %arg21[%c0_229, %c0_230, %c0_231, %c0_232], %237 {strides = array<i32>} : memref<2x2x5x160xf32, #tpu.memory_space<vmem>>, vector<1x2x4x160xf32>,
    %238 = vector.shape_cast %233 : vector<8x160xf32> to vector<2x4x160xf32>
    %c1_233 = arith.constant 1 : index
    %c0_234 = arith.constant 0 : index
    %c0_235 = arith.constant 0 : index
    %c0_236 = arith.constant 0 : index
    %239 = vector.load %arg21[%c1_233, %c0_234, %c0_235, %c0_236] : memref<2x2x5x160xf32, #tpu.memory_space<vmem>>, vector<1x2x4x160xf32>
    %240 = vector.shape_cast %239 : vector<1x2x4x160xf32> to vector<2x4x160xf32>
    %241 = vector.shape_cast %238 : vector<2x4x160xf32> to vector<1x2x4x160xf32>
    tpu.vector_store %arg21[%c1_233, %c0_234, %c0_235, %c0_236], %241 {strides = array<i32>} : memref<2x2x5x160xf32, #tpu.memory_space<vmem>>, vector<1x2x4x160xf32>,
    %c0_237 = arith.constant 0 : index
    %c0_238 = arith.constant 0 : index
    %242 = vector.load %arg14[%c0_237, %c0_238] : memref<1x256xf32, #tpu.memory_space<vmem>>, vector<1x256xf32>
    %c0_239 = arith.constant 0 : index
    %c0_240 = arith.constant 0 : index
    %c0_241 = arith.constant 0 : index
    %c0_242 = arith.constant 0 : index
    %243 = vector.load %arg21[%c0_239, %c0_240, %c0_241, %c0_242] : memref<2x2x5x160xf32, #tpu.memory_space<vmem>>, vector<1x2x4x160xf32>
    %244 = vector.shape_cast %243 : vector<1x2x4x160xf32> to vector<2x4x160xf32>
    %245 = vector.shape_cast %244 : vector<2x4x160xf32> to vector<8x160xf32>
    %c1_243 = arith.constant 1 : index
    %c0_244 = arith.constant 0 : index
    %c0_245 = arith.constant 0 : index
    %c0_246 = arith.constant 0 : index
    %246 = vector.load %arg21[%c1_243, %c0_244, %c0_245, %c0_246] : memref<2x2x5x160xf32, #tpu.memory_space<vmem>>, vector<1x2x4x160xf32>
    %247 = vector.shape_cast %246 : vector<1x2x4x160xf32> to vector<2x4x160xf32>
    %248 = vector.shape_cast %247 : vector<2x4x160xf32> to vector<8x160xf32>
    %c0_247 = arith.constant 0 : index
    %c0_248 = arith.constant 0 : index
    %c1_249 = arith.constant 1 : index
    %c0_250 = arith.constant 0 : index
    %249 = vector.load %arg21[%c0_247, %c0_248, %c1_249, %c0_250] : memref<2x2x5x160xf32, #tpu.memory_space<vmem>>, vector<1x2x4x160xf32>
    %250 = vector.shape_cast %249 : vector<1x2x4x160xf32> to vector<2x4x160xf32>
    %251 = vector.shape_cast %250 : vector<2x4x160xf32> to vector<8x160xf32>
    %c0_251 = arith.constant 0 : index
    %c0_252 = arith.constant 0 : index
    %c0_253 = arith.constant 0 : index
    %252 = vector.load %arg13[%c0_251, %c0_252, %c0_253] : memref<3x160x256xf32, #tpu.memory_space<vmem>>, vector<1x160x256xf32>
    %253 = vector.shape_cast %252 : vector<1x160x256xf32> to vector<160x256xf32>
    %cst_254 = arith.constant dense<0.000000e+00> : vector<8x256xf32>
    %254 = tpu.matmul %245, %253, %cst_254 {dimension_numbers = #tpu.dot_dimension_numbers<[1], [0], [0], [1], [0, 0, 1, 1], [], []>} : vector<8x160xf32>, vector<160x256xf32>, vector<8x256xf32> -> vector<8x256xf32>
    %255 = vector.broadcast %242 : vector<1x256xf32> to vector<8x256xf32>
    %256 = arith.addf %254, %255 : vector<8x256xf32>
    %257 = vector.shape_cast %256 : vector<8x256xf32> to vector<2x4x256xf32>
    %c0_255 = arith.constant 0 : index
    %c0_256 = arith.constant 0 : index
    %c0_257 = arith.constant 0 : index
    %c0_258 = arith.constant 0 : index
    %258 = vector.load %arg16[%c0_255, %c0_256, %c0_257, %c0_258] : memref<4x2x4x256xf32, #tpu.memory_space<vmem>>, vector<1x2x4x256xf32>
    %259 = vector.shape_cast %258 : vector<1x2x4x256xf32> to vector<2x4x256xf32>
    %260 = vector.shape_cast %257 : vector<2x4x256xf32> to vector<1x2x4x256xf32>
    tpu.vector_store %arg16[%c0_255, %c0_256, %c0_257, %c0_258], %260 {strides = array<i32>} : memref<4x2x4x256xf32, #tpu.memory_space<vmem>>, vector<1x2x4x256xf32>,
    %c1_259 = arith.constant 1 : index
    %c0_260 = arith.constant 0 : index
    %c0_261 = arith.constant 0 : index
    %261 = vector.load %arg13[%c1_259, %c0_260, %c0_261] : memref<3x160x256xf32, #tpu.memory_space<vmem>>, vector<1x160x256xf32>
    %262 = vector.shape_cast %261 : vector<1x160x256xf32> to vector<160x256xf32>
    %cst_262 = arith.constant dense<0.000000e+00> : vector<8x256xf32>
    %263 = tpu.matmul %245, %262, %cst_262 {dimension_numbers = #tpu.dot_dimension_numbers<[1], [0], [0], [1], [0, 0, 1, 1], [], []>} : vector<8x160xf32>, vector<160x256xf32>, vector<8x256xf32> -> vector<8x256xf32>
    %c2_263 = arith.constant 2 : index
    %c0_264 = arith.constant 0 : index
    %c0_265 = arith.constant 0 : index
    %264 = vector.load %arg13[%c2_263, %c0_264, %c0_265] : memref<3x160x256xf32, #tpu.memory_space<vmem>>, vector<1x160x256xf32>
    %265 = vector.shape_cast %264 : vector<1x160x256xf32> to vector<160x256xf32>
    %cst_266 = arith.constant dense<0.000000e+00> : vector<8x256xf32>
    %266 = tpu.matmul %248, %265, %cst_266 {dimension_numbers = #tpu.dot_dimension_numbers<[1], [0], [0], [1], [0, 0, 1, 1], [], []>} : vector<8x160xf32>, vector<160x256xf32>, vector<8x256xf32> -> vector<8x256xf32>
    %267 = arith.addf %263, %266 : vector<8x256xf32>
    %268 = vector.broadcast %242 : vector<1x256xf32> to vector<8x256xf32>
    %269 = arith.addf %267, %268 : vector<8x256xf32>
    %270 = vector.shape_cast %269 : vector<8x256xf32> to vector<2x4x256xf32>
    %c1_267 = arith.constant 1 : index
    %c0_268 = arith.constant 0 : index
    %c0_269 = arith.constant 0 : index
    %c0_270 = arith.constant 0 : index
    %271 = vector.load %arg16[%c1_267, %c0_268, %c0_269, %c0_270] : memref<4x2x4x256xf32, #tpu.memory_space<vmem>>, vector<1x2x4x256xf32>
    %272 = vector.shape_cast %271 : vector<1x2x4x256xf32> to vector<2x4x256xf32>
    %273 = vector.shape_cast %270 : vector<2x4x256xf32> to vector<1x2x4x256xf32>
    tpu.vector_store %arg16[%c1_267, %c0_268, %c0_269, %c0_270], %273 {strides = array<i32>} : memref<4x2x4x256xf32, #tpu.memory_space<vmem>>, vector<1x2x4x256xf32>,
    %c0_271 = arith.constant 0 : index
    %c0_272 = arith.constant 0 : index
    %c0_273 = arith.constant 0 : index
    %274 = vector.load %arg13[%c0_271, %c0_272, %c0_273] : memref<3x160x256xf32, #tpu.memory_space<vmem>>, vector<1x160x256xf32>
    %275 = vector.shape_cast %274 : vector<1x160x256xf32> to vector<160x256xf32>
    %cst_274 = arith.constant dense<0.000000e+00> : vector<8x256xf32>
    %276 = tpu.matmul %248, %275, %cst_274 {dimension_numbers = #tpu.dot_dimension_numbers<[1], [0], [0], [1], [0, 0, 1, 1], [], []>} : vector<8x160xf32>, vector<160x256xf32>, vector<8x256xf32> -> vector<8x256xf32>
    %277 = vector.broadcast %242 : vector<1x256xf32> to vector<8x256xf32>
    %278 = arith.addf %276, %277 : vector<8x256xf32>
    %279 = vector.shape_cast %278 : vector<8x256xf32> to vector<2x4x256xf32>
    %c2_275 = arith.constant 2 : index
    %c0_276 = arith.constant 0 : index
    %c0_277 = arith.constant 0 : index
    %c0_278 = arith.constant 0 : index
    %280 = vector.load %arg16[%c2_275, %c0_276, %c0_277, %c0_278] : memref<4x2x4x256xf32, #tpu.memory_space<vmem>>, vector<1x2x4x256xf32>
    %281 = vector.shape_cast %280 : vector<1x2x4x256xf32> to vector<2x4x256xf32>
    %282 = vector.shape_cast %279 : vector<2x4x256xf32> to vector<1x2x4x256xf32>
    tpu.vector_store %arg16[%c2_275, %c0_276, %c0_277, %c0_278], %282 {strides = array<i32>} : memref<4x2x4x256xf32, #tpu.memory_space<vmem>>, vector<1x2x4x256xf32>,
    %c1_279 = arith.constant 1 : index
    %c0_280 = arith.constant 0 : index
    %c0_281 = arith.constant 0 : index
    %283 = vector.load %arg13[%c1_279, %c0_280, %c0_281] : memref<3x160x256xf32, #tpu.memory_space<vmem>>, vector<1x160x256xf32>
    %284 = vector.shape_cast %283 : vector<1x160x256xf32> to vector<160x256xf32>
    %cst_282 = arith.constant dense<0.000000e+00> : vector<8x256xf32>
    %285 = tpu.matmul %248, %284, %cst_282 {dimension_numbers = #tpu.dot_dimension_numbers<[1], [0], [0], [1], [0, 0, 1, 1], [], []>} : vector<8x160xf32>, vector<160x256xf32>, vector<8x256xf32> -> vector<8x256xf32>
    %c2_283 = arith.constant 2 : index
    %c0_284 = arith.constant 0 : index
    %c0_285 = arith.constant 0 : index
    %286 = vector.load %arg13[%c2_283, %c0_284, %c0_285] : memref<3x160x256xf32, #tpu.memory_space<vmem>>, vector<1x160x256xf32>
    %287 = vector.shape_cast %286 : vector<1x160x256xf32> to vector<160x256xf32>
    %cst_286 = arith.constant dense<0.000000e+00> : vector<8x256xf32>
    %288 = tpu.matmul %251, %287, %cst_286 {dimension_numbers = #tpu.dot_dimension_numbers<[1], [0], [0], [1], [0, 0, 1, 1], [], []>} : vector<8x160xf32>, vector<160x256xf32>, vector<8x256xf32> -> vector<8x256xf32>
    %289 = arith.addf %285, %288 : vector<8x256xf32>
    %290 = vector.broadcast %242 : vector<1x256xf32> to vector<8x256xf32>
    %291 = arith.addf %289, %290 : vector<8x256xf32>
    %292 = vector.shape_cast %291 : vector<8x256xf32> to vector<2x4x256xf32>
    %c3_287 = arith.constant 3 : index
    %c0_288 = arith.constant 0 : index
    %c0_289 = arith.constant 0 : index
    %c0_290 = arith.constant 0 : index
    %293 = vector.load %arg16[%c3_287, %c0_288, %c0_289, %c0_290] : memref<4x2x4x256xf32, #tpu.memory_space<vmem>>, vector<1x2x4x256xf32>
    %294 = vector.shape_cast %293 : vector<1x2x4x256xf32> to vector<2x4x256xf32>
    %295 = vector.shape_cast %292 : vector<2x4x256xf32> to vector<1x2x4x256xf32>
    tpu.vector_store %arg16[%c3_287, %c0_288, %c0_289, %c0_290], %295 {strides = array<i32>} : memref<4x2x4x256xf32, #tpu.memory_space<vmem>>, vector<1x2x4x256xf32>,
    return
  }
}

</mosaic_0001>

<bundles_post_ra>
// kernel: tpu_custom_call.1
= control target key start
LH: loop header
LB: loop body
LE: loop exit
PB: predicated region body
PF: predicated region fallthrough
CT: control target
= control target key end

     0   :  { %s8396_s0 = inlined_call_operand.vmem [shape: f32[4,2,5,288], index: 0, kind: input, shape index: {}]   ;;  %s8397_s1 = inlined_call_operand.vmem [shape: f32[2,2,4,160], index: 1, kind: input, shape index: {}]   ;;  %s8398_s2 = inlined_call_operand.vmem [shape: f32[2,2,4,160], index: 2, kind: input, shape index: {}]   ;;  %s8399_s3 = inlined_call_operand.vmem [shape: f32[3,288,160], index: 3, kind: input, shape index: {}]   ;;  %s8400_s4 = inlined_call_operand.vmem [shape: f32[1,160], index: 4, kind: input, shape index: {}]   ;;  %s8401_s5 = inlined_call_operand.vmem [shape: f32[3,160,160], index: 5, kind: input, shape index: {}]   ;;  %s8402_s6 = inlined_call_operand.vmem [shape: f32[1,160], index: 6, kind: input, shape index: {}]   ;;  %s8403_s7 = inlined_call_operand.vmem [shape: f32[3,160,96], index: 7, kind: input, shape index: {}]   ;;  %s8404_s8 = inlined_call_operand.vmem [shape: f32[1,96], index: 8, kind: input, shape index: {}]   ;;  %s8405_s9 = inlined_call_operand.vmem [shape: f32[3,96,96], index: 9, kind: input, shape index: {}]   ;;  %s8406_s10 = inlined_call_operand.vmem [shape: f32[1,96], index: 10, kind: input, shape index: {}]   ;;  %s8407_s11 = inlined_call_operand.vmem [shape: f32[3,96,160], index: 11, kind: input, shape index: {}]   ;;  %s8408_s12 = inlined_call_operand.vmem [shape: f32[1,160], index: 12, kind: input, shape index: {}]   ;;  %s8409_s13 = inlined_call_operand.vmem [shape: f32[3,160,256], index: 13, kind: input, shape index: {}]   ;;  %s8410_s14 = inlined_call_operand.vmem [shape: f32[1,256], index: 14, kind: input, shape index: {}]   ;;  %s8411_s15 = inlined_call_operand.vmem [shape: f32[4], index: 15, kind: input, shape index: {}]   ;;  %s8412_s16 = inlined_call_operand.hbm [shape: f32[4,2,4,256], index: 16, kind: output, shape index: {}]  }
   0x1   :  { %8414 = sst [smem:[#allocation13_spill]] %s8396_s0 }
   0x2   :  { %21 = vsyncpa [#allocation9], 0 }
   0x3   :  { %22 = vsyncpa [#allocation8], 0  ;;  %s59_s2 = sshll.u32 %s8411_s15, 4  ;;  %s60_s2 = int_to_ptr.vmem [resolvable:$true] %s59_s2 }
   0x4   :  { %s5841_s20 = scalar_lea.vmem %s60_s2, 16  ;;  %p5846_p1 = scmp.lt.s32.totalorder %s60_s2, %s60_s2 }
   0x5   :  { %p5842_p0 = scmp.ne.s32.totalorder %s60_s2, %s5841_s20  ;;  %p5847_p2 = scmp.lt.s32.totalorder %s5841_s20, %s5841_s20 }
   0x7   :  { %p5848_p3 = por %p5847_p2, %p5846_p1 }
   0x9   :  { %p5849_p4 = pnand %p5848_p3, %p5842_p0 }
   0xb   :  { %5852 = shalt.err (!%p5849_p4)
}
   0xc   :  { %s5879_s21 = smov [#allocation7]  }
   0xd   :  { %62 = dma.vmem_to_smem %s60_s2, 16, %s5879_s21, [#allocation9]  }
   0xe   :  { %5875 = dma.done.wait [#allocation9], 16  }
   0xf   :  { %5876 = vsyncadd [#allocation9], 4294967280 }
  0x10   :  { %66 = sfence }
  0x11   :  { %v3899_v0 = vld [vmem:[%s8399_s3 + $0x248] sm:$0xff]  ;;  %v3901_v1 = vld [vmem:[%s8399_s3 + $0x258] sm:$0xff]  ;;  %v3898_v2 = vld [vmem:[%s8399_s3 + $0x240] sm:$0xff]  ;;  %v5880_v7 = vmov 0.0   ;;  %s8415_s0 = sld [smem:[#allocation13_spill]]  ;;  %vm282_vm0 = vcmask 261120  }
  0x12   :  { %v4603_v3 = vpack.c.bf16 %v3901_v1, %v3899_v0  ;;  %v3900_v4 = vld [vmem:[%s8399_s3 + $0x250] sm:$0xff]  ;;  %v3903_v5 = vld [vmem:[%s8399_s3 + $0x268] sm:$0xff]  ;;  %v3905_v6 = vld [vmem:[%s8399_s3 + $0x278] sm:$0xff]  ;;  %71 = vst [vmem:[#allocation2] sm:$0x1f] %v5880_v7  ;;  %vm1152_vm1 = vcmask 1042432  }
  0x13   :  { %74 = vst [vmem:[#allocation2 + $0x10] sm:$0x1f] %v5880_v7  ;;  %76 = vst [vmem:[#allocation2 + $0x20] sm:$0x1f] %v5880_v7  ;;  %v4605_v8 = vpack.c.bf16 %v3900_v4, %v3898_v2  ;;  %v4607_v9 = vpack.c.bf16 %v3905_v6, %v3903_v5  ;;  %v3902_v10 = vld [vmem:[%s8399_s3 + $0x260] sm:$0xff]  ;;  %v3904_v11 = vld [vmem:[%s8399_s3 + $0x270] sm:$0xff] }
  0x14   :  { %78 = vst [vmem:[#allocation2 + $0x30] sm:$0x1f] %v5880_v7  ;;  %80 = vst [vmem:[#allocation3] sm:$0x1f] %v5880_v7  ;;  %v3907_v12 = vld [vmem:[%s8399_s3 + $0x288] sm:$0xff]  ;;  %4604 = vmatprep.subr.bf16.mxu0 %v4603_v3  ;;  %4820 = vmatprep.subr.bf16.mxu1 %v4603_v3  ;;  %v3909_v13 = vld [vmem:[%s8399_s3 + $0x298] sm:$0xff]  ;;  %v4609_v14 = vpack.c.bf16 %v3904_v11, %v3902_v10 }
  0x15   :  { %82 = vst [vmem:[#allocation3 + $0x10] sm:$0x1f] %v5880_v7  ;;  %84 = vst [vmem:[#allocation3 + $0x20] sm:$0x1f] %v5880_v7  ;;  %4606 = vmatpush1.bf16.msra.mxu0 %v4605_v8  ;;  %4822 = vmatpush1.bf16.msra.mxu1 %v4605_v8  ;;  %v4611_v15 = vpack.c.bf16 %v3909_v13, %v3907_v12  ;;  %v3906_v16 = vld [vmem:[%s8399_s3 + $0x280] sm:$0xff]  ;;  %v3908_v17 = vld [vmem:[%s8399_s3 + $0x290] sm:$0xff] }
  0x16   :  { %86 = vst [vmem:[#allocation3 + $0x30] sm:$0x1f] %v5880_v7  ;;  %94 = vst [vmem:[#allocation6] sm:$0x1f] %v5880_v7  ;;  %4608 = vmatprep.subr.bf16.mxu0 %v4607_v9  ;;  %4824 = vmatprep.subr.bf16.mxu1 %v4607_v9  ;;  %v3911_v18 = vld [vmem:[%s8399_s3 + $0x2a8] sm:$0xff]  ;;  %v3913_v19 = vld [vmem:[%s8399_s3 + $0x2b8] sm:$0xff]  ;;  %v4613_v20 = vpack.c.bf16 %v3908_v17, %v3906_v16 }
  0x17   :  { %96 = vst [vmem:[#allocation6 + $0x10] sm:$0x1f] %v5880_v7  ;;  %98 = vst [vmem:[#allocation6 + $0x20] sm:$0x1f] %v5880_v7  ;;  %v4615_v21 = vpack.c.bf16 %v3913_v19, %v3911_v18  ;;  %v3910_v22 = vld [vmem:[%s8399_s3 + $0x2a0] sm:$0xff]  ;;  %v3912_v23 = vld [vmem:[%s8399_s3 + $0x2b0] sm:$0xff] }
  0x18   :  { %100 = vst [vmem:[#allocation6 + $0x30] sm:$0x1f] %v5880_v7  ;;  %v3915_v24 = vld [vmem:[%s8399_s3 + $0x2c8] sm:$0xff]  ;;  %v3917_v25 = vld [vmem:[%s8399_s3 + $0x2d8] sm:$0xff]  ;;  %v4617_v26 = vpack.c.bf16 %v3912_v23, %v3910_v22  ;;  %v3914_v28 = vld [vmem:[%s8399_s3 + $0x2c0] sm:$0xff]  ;;  %vm1153_vm2 = vcmask 1046532  }
  0x19   :  { %4610 = vmatpush1.bf16.msra.mxu0 %v4609_v14  ;;  %4826 = vmatpush1.bf16.msra.mxu1 %v4609_v14  ;;  %v4619_v27 = vpack.c.bf16 %v3917_v25, %v3915_v24  ;;  %v3916_v29 = vld [vmem:[%s8399_s3 + $0x2d0] sm:$0xff]  ;;  %v3919_v30 = vld [vmem:[%s8399_s3 + $0x2e8] sm:$0xff]  ;;  %v3921_v31 = vld [vmem:[%s8399_s3 + $0x2f8] sm:$0xff]  ;;  %vm72_vm4 = vcmask 258048   ;;  %s67_s1 = sld [smem:[#allocation7]]  ;;  %vm1349_vm9 = vcmask 257024  }
  0x1a   :  { %4612 = vmatprep.subr.bf16.mxu0 %v4611_v15  ;;  %4828 = vmatprep.subr.bf16.mxu1 %v4611_v15  ;;  %v4621_v32 = vpack.c.bf16 %v3916_v29, %v3914_v28  ;;  %v4623_v33 = vpack.c.bf16 %v3921_v31, %v3919_v30  ;;  %v3918_v34 = vld [vmem:[%s8399_s3 + $0x2e0] sm:$0xff]  ;;  %v3920_v35 = vld [vmem:[%s8399_s3 + $0x2f0] sm:$0xff]  ;;  %v3923_v36 = vld [vmem:[%s8399_s3 + $0x308] sm:$0xff]  ;;  %77 = vst.msk [vmem:[#allocation2 + $0x28] sm:$0x1f] %vm72_vm4, %v5880_v7  ;;  %vm1368_vm10 = vcmask 258049  }
  0x1b   :  { %v3925_v37 = vld [vmem:[%s8399_s3 + $0x318] sm:$0xff]  ;;  %v4625_v38 = vpack.c.bf16 %v3920_v35, %v3918_v34  ;;  %v3922_v39 = vld [vmem:[%s8399_s3 + $0x300] sm:$0xff]  ;;  %v3924_v41 = vld [vmem:[%s8399_s3 + $0x310] sm:$0xff]  ;;  %79 = vst.msk [vmem:[#allocation2 + $0x38] sm:$0x1f] %vm72_vm4, %v5880_v7  ;;  %s3891_s29 = sld [smem:[#allocation7 + $0x3]] }
  0x1c   :  { %v4627_v40 = vpack.c.bf16 %v3925_v37, %v3923_v36  ;;  %v3927_v42 = vld [vmem:[%s8399_s3 + $0x328] sm:$0xff]  ;;  %v3929_v43 = vld [vmem:[%s8399_s3 + $0x338] sm:$0xff]  ;;  %v4629_v46 = vpack.c.bf16 %v3924_v41, %v3922_v39  ;;  %v3926_v48 = vld [vmem:[%s8399_s3 + $0x320] sm:$0xff]  ;;  %73 = vst.msk [vmem:[#allocation2 + $0x8] sm:$0x1f] %vm72_vm4, %v5880_v7  ;;  %vm88_vm15 = vcmask 783360  }
  0x1d   :  { %4614 = vmatpush1.bf16.msra.mxu0 %v4613_v20  ;;  %4830 = vmatpush1.bf16.msra.mxu1 %v4613_v20  ;;  %v5772_v44 = vld [vmem:[%s8415_s0 + $0x38] ss:$24 sps:$4 sm:$0xff]   ;;  %v4631_v47 = vpack.c.bf16 %v3929_v43, %v3927_v42  ;;  %v3931_v50 = vld [vmem:[%s8399_s3 + $0x348] sm:$0xff]  ;;  %v3930_v53 = vld [vmem:[%s8399_s3 + $0x340] sm:$0xff]  ;;  %75 = vst.msk [vmem:[#allocation2 + $0x18] sm:$0x1f] %vm72_vm4, %v5880_v7 }
  0x1e   :  { %4616 = vmatprep.subr.bf16.mxu0 %v4615_v21  ;;  %4832 = vmatprep.subr.bf16.mxu1 %v4615_v21  ;;  %v5773_v45 = vld [vmem:[%s8415_s0 + $0x98] ss:$24 sps:$4 sm:$0xff]   ;;  %v3935_v56 = vld [vmem:[%s8399_s3 + $0x368] sm:$0xff]  ;;  %v3934_v60 = vld [vmem:[%s8399_s3 + $0x360] sm:$0xff]  ;;  %81 = vst.msk [vmem:[#allocation3 + $0x8] sm:$0x1f] %vm72_vm4, %v5880_v7 }
  0x1f   :  { %v3928_v49 = vld [vmem:[%s8399_s3 + $0x330] sm:$0xff]  ;;  %v3933_v51 = vld [vmem:[%s8399_s3 + $0x358] sm:$0xff]  ;;  %349 = vmatprep.mubr.f32.mxu0 %v5772_v44  ;;  %914 = vmatprep.mubr.f32.mxu1 %v5773_v45  ;;  %v3939_v62 = vld [vmem:[%s8399_s3 + $0x388] sm:$0xff]  ;;  %83 = vst.msk [vmem:[#allocation3 + $0x18] sm:$0x1f] %vm72_vm4, %v5880_v7 }
  0x20   :  { %v4633_v52 = vpack.c.bf16 %v3928_v49, %v3926_v48  ;;  %v4635_v54 = vpack.c.bf16 %v3933_v51, %v3931_v50  ;;  %v3932_v55 = vld [vmem:[%s8399_s3 + $0x350] sm:$0xff]  ;;  %v3937_v57 = vld [vmem:[%s8399_s3 + $0x378] sm:$0xff]  ;;  %v3938_v2 = vld [vmem:[%s8399_s3 + $0x380] sm:$0xff]  ;;  %85 = vst.msk [vmem:[#allocation3 + $0x28] sm:$0x1f] %vm72_vm4, %v5880_v7 }
  0x21   :  { %4618 = vmatpush1.bf16.msra.mxu0 %v4617_v26  ;;  %4834 = vmatpush1.bf16.msra.mxu1 %v4617_v26  ;;  %v4637_v58 = vpack.c.bf16 %v3932_v55, %v3930_v53  ;;  %v4639_v59 = vpack.c.bf16 %v3937_v57, %v3935_v56  ;;  %v3936_v61 = vld [vmem:[%s8399_s3 + $0x370] sm:$0xff]  ;;  %v3941_v63 = vld [vmem:[%s8399_s3 + $0x398] sm:$0xff]  ;;  %v3943_v4 = vld [vmem:[%s8399_s3 + $0x3a8] sm:$0xff]  ;;  %87 = vst.msk [vmem:[#allocation3 + $0x38] sm:$0x1f] %vm72_vm4, %v5880_v7 }
  0x22   :  { %4620 = vmatprep.subr.bf16.mxu0 %v4619_v27  ;;  %4836 = vmatprep.subr.bf16.mxu1 %v4619_v27  ;;  %v4641_v0 = vpack.c.bf16 %v3936_v61, %v3934_v60  ;;  %v4643_v1 = vpack.c.bf16 %v3941_v63, %v3939_v62  ;;  %v3940_v3 = vld [vmem:[%s8399_s3 + $0x390] sm:$0xff]  ;;  %v3945_v5 = vld [vmem:[%s8399_s3 + $0x3b8] sm:$0xff]  ;;  %v3942_v9 = vld [vmem:[%s8399_s3 + $0x3a0] sm:$0xff]  ;;  %95 = vst.msk [vmem:[#allocation6 + $0x8] sm:$0x1f] %vm72_vm4, %v5880_v7 }
  0x23   :  { %v4645_v6 = vpack.c.bf16 %v3940_v3, %v3938_v2  ;;  %v4647_v8 = vpack.c.bf16 %v3945_v5, %v3943_v4  ;;  %v3944_v10 = vld [vmem:[%s8399_s3 + $0x3b0] sm:$0xff]  ;;  %v3947_v11 = vld [vmem:[%s8399_s3 + $0x3c8] sm:$0xff]  ;;  %v3949_v12 = vld [vmem:[%s8399_s3 + $0x3d8] sm:$0xff]  ;;  %97 = vst.msk [vmem:[#allocation6 + $0x18] sm:$0x1f] %vm72_vm4, %v5880_v7 }
  0x24   :  { %v4649_v13 = vpack.c.bf16 %v3944_v10, %v3942_v9  ;;  %v4651_v14 = vpack.c.bf16 %v3949_v12, %v3947_v11  ;;  %v3946_v15 = vld [vmem:[%s8399_s3 + $0x3c0] sm:$0xff]  ;;  %v3948_v16 = vld [vmem:[%s8399_s3 + $0x3d0] sm:$0xff]  ;;  %v3951_v17 = vld [vmem:[%s8399_s3 + $0x3e8] sm:$0xff]  ;;  %99 = vst.msk [vmem:[#allocation6 + $0x28] sm:$0x1f] %vm72_vm4, %v5880_v7 }
  0x25   :  { %4622 = vmatpush1.bf16.msra.mxu0 %v4621_v32  ;;  %4838 = vmatpush1.bf16.msra.mxu1 %v4621_v32  ;;  %v3953_v18 = vld [vmem:[%s8399_s3 + $0x3f8] sm:$0xff]  ;;  %v4653_v19 = vpack.c.bf16 %v3948_v16, %v3946_v15  ;;  %v3950_v21 = vld [vmem:[%s8399_s3 + $0x3e0] sm:$0xff]  ;;  %v3952_v22 = vld [vmem:[%s8399_s3 + $0x3f0] sm:$0xff]  ;;  %101 = vst.msk [vmem:[#allocation6 + $0x38] sm:$0x1f] %vm72_vm4, %v5880_v7  ;;  %vm2409_vm4 = vcmask 781312  }
  0x26   :  { %4624 = vmatprep.subr.bf16.mxu0 %v4623_v33  ;;  %4840 = vmatprep.subr.bf16.mxu1 %v4623_v33  ;;  %v4655_v20 = vpack.c.bf16 %v3953_v18, %v3951_v17  ;;  %v3955_v23 = vld [vmem:[%s8399_s3 + $0x408] sm:$0xff]  ;;  %v3957_v24 = vld [vmem:[%s8399_s3 + $0x418] sm:$0xff]  ;;  %v4657_v25 = vpack.c.bf16 %v3952_v22, %v3950_v21  ;;  %v3954_v26 = vld [vmem:[%s8399_s3 + $0x400] sm:$0xff]  ;;  %89 = vst.msk [vmem:[#allocation4] sm:$0x3f] %vm88_vm15, %v5880_v7 }
  0x27   :  { %v3956_v27 = vld [vmem:[%s8399_s3 + $0x410] sm:$0xff]  ;;  %v4659_v28 = vpack.c.bf16 %v3957_v24, %v3955_v23  ;;  %v3959_v29 = vld [vmem:[%s8399_s3 + $0x428] sm:$0xff]  ;;  %v3961_v30 = vld [vmem:[%s8399_s3 + $0x438] sm:$0xff]  ;;  %90 = vst.msk [vmem:[#allocation4 + $0x8] sm:$0x3f] %vm88_vm15, %v5880_v7 }
  0x28   :  { %v4661_v31 = vpack.c.bf16 %v3956_v27, %v3954_v26  ;;  %v4663_v32 = vpack.c.bf16 %v3961_v30, %v3959_v29  ;;  %v3958_v33 = vld [vmem:[%s8399_s3 + $0x420] sm:$0xff]  ;;  %v3960_v34 = vld [vmem:[%s8399_s3 + $0x430] sm:$0xff]  ;;  %v3963_v35 = vld [vmem:[%s8399_s3 + $0x448] sm:$0xff] }
  0x29   :  { %4626 = vmatpush1.bf16.msra.mxu0 %v4625_v38  ;;  %4842 = vmatpush1.bf16.msra.mxu1 %v4625_v38  ;;  %v3965_v36 = vld [vmem:[%s8399_s3 + $0x458] sm:$0xff]  ;;  %v4665_v37 = vpack.c.bf16 %v3960_v34, %v3958_v33  ;;  %v3962_v39 = vld [vmem:[%s8399_s3 + $0x440] sm:$0xff]  ;;  %v3967_v41 = vld [vmem:[%s8399_s3 + $0x468] sm:$0xff] }
  0x2a   :  { %4628 = vmatprep.subr.bf16.mxu0 %v4627_v40  ;;  %4844 = vmatprep.subr.bf16.mxu1 %v4627_v40  ;;  %v4667_v38 = vpack.c.bf16 %v3965_v36, %v3963_v35  ;;  %v3964_v40 = vld [vmem:[%s8399_s3 + $0x450] sm:$0xff]  ;;  %v3969_v42 = vld [vmem:[%s8399_s3 + $0x478] sm:$0xff]  ;;  %v118_v49 = vld [vmem:[%s8399_s3 + $0x8] sm:$0xff] }
  0x2b   :  { %v5774_v43 = vld [vmem:[%s8415_s0 + $0x30] ss:$24 sps:$4 sm:$0xff]   ;;  %v4669_v45 = vpack.c.bf16 %v3964_v40, %v3962_v39  ;;  %v120_v50 = vld [vmem:[%s8399_s3 + $0x18] sm:$0xff]  ;;  %v117_v53 = vld [vmem:[%s8399_s3] sm:$0xff] }
  0x2c   :  { %v5775_v44 = vld [vmem:[%s8415_s0 + $0x90] ss:$24 sps:$4 sm:$0xff]   ;;  %v124_v56 = vld [vmem:[%s8399_s3 + $0x38] sm:$0xff]  ;;  %v121_v61 = vld [vmem:[%s8399_s3 + $0x20] sm:$0xff] }
  0x2d   :  { %4630 = vmatpush1.bf16.msra.mxu0 %v4629_v46  ;;  %4846 = vmatpush1.bf16.msra.mxu1 %v4629_v46  ;;  %v4671_v46 = vpack.c.bf16 %v3969_v42, %v3967_v41  ;;  %v3968_v48 = vld [vmem:[%s8399_s3 + $0x470] sm:$0xff]  ;;  %v122_v55 = vld [vmem:[%s8399_s3 + $0x28] sm:$0xff]  ;;  %v5776_v57 = vld [vmem:[%s8415_s0 + $0x40] ss:$24 sps:$4 sm:$0xff]  }
  0x2e   :  { %4632 = vmatprep.subr.bf16.mxu0 %v4631_v47  ;;  %4848 = vmatprep.subr.bf16.mxu1 %v4631_v47  ;;  %v3966_v47 = vld [vmem:[%s8399_s3 + $0x460] sm:$0xff]  ;;  %v4679_v60 = vpack.c.bf16 %v124_v56, %v122_v55  ;;  %v123_v62 = vld [vmem:[%s8399_s3 + $0x30] sm:$0xff]  ;;  %v126_v63 = vld [vmem:[%s8399_s3 + $0x48] sm:$0xff] }
  0x2f   :  { %v4673_v51 = vpack.c.bf16 %v3968_v48, %v3966_v47  ;;  %v6258_v2 = vld [vmem:[%s8415_s0 + $0x68] ss:$24 sps:$4 sm:$0xff]   ;;  %v4681_v3 = vpack.c.bf16 %v123_v62, %v121_v61  ;;  %v132_v9 = vld [vmem:[%s8399_s3 + $0x78] sm:$0xff]  ;;  %v131_v12 = vld [vmem:[%s8399_s3 + $0x70] sm:$0xff] }
  0x30   :  { %v125_v5 = vld [vmem:[%s8399_s3 + $0x40] sm:$0xff]  ;;  %v136_v15 = vld [vmem:[%s8399_s3 + $0x98] sm:$0xff]  ;;  %v142_v26 = vld [vmem:[%s8399_s3 + $0xc8] sm:$0xff] }
  0x31   :  { %4634 = vmatpush1.bf16.msra.mxu0 %v4633_v52  ;;  %4850 = vmatpush1.bf16.msra.mxu1 %v4633_v52  ;;  %v4675_v52 = vpack.c.bf16 %v120_v50, %v118_v49  ;;  %v129_v11 = vld [vmem:[%s8399_s3 + $0x60] sm:$0xff]  ;;  %v140_v21 = vld [vmem:[%s8399_s3 + $0xb8] sm:$0xff]  ;;  %v155_v49 = vld [vmem:[%s8399_s3 + $0x130] sm:$0xff] }
  0x32   :  { %4636 = vmatprep.subr.bf16.mxu0 %v4635_v54  ;;  %4852 = vmatprep.subr.bf16.mxu1 %v4635_v54  ;;  %v119_v54 = vld [vmem:[%s8399_s3 + $0x10] sm:$0xff]  ;;  %v4689_v16 = vpack.c.bf16 %v131_v12, %v129_v11  ;;  %v133_v18 = vld [vmem:[%s8399_s3 + $0x80] sm:$0xff]  ;;  %v144_v27 = vld [vmem:[%s8399_s3 + $0xd8] sm:$0xff] }
  0x33   :  { %v137_v24 = vld [vmem:[%s8399_s3 + $0xa0] sm:$0xff]  ;;  %v4699_v29 = vpack.c.bf16 %v144_v27, %v142_v26  ;;  %v148_v33 = vld [vmem:[%s8399_s3 + $0xf8] sm:$0xff]  ;;  %v158_v50 = vld [vmem:[%s8399_s3 + $0x148] sm:$0xff] }
  0x34   :  { %v141_v30 = vld [vmem:[%s8399_s3 + $0xc0] sm:$0xff]  ;;  %v152_v39 = vld [vmem:[%s8399_s3 + $0x118] sm:$0xff]  ;;  %v159_v55 = vld [vmem:[%s8399_s3 + $0x150] sm:$0xff] }
  0x35   :  { %4638 = vmatpush1.bf16.msra.mxu0 %v4637_v58  ;;  %4854 = vmatpush1.bf16.msra.mxu1 %v4637_v58  ;;  %v5777_v58 = vld [vmem:[%s8415_s0 + $0xa0] ss:$24 sps:$4 sm:$0xff]   ;;  %v162_v56 = vld [vmem:[%s8399_s3 + $0x168] sm:$0xff]  ;;  %v163_v61 = vld [vmem:[%s8399_s3 + $0x170] sm:$0xff] }
  0x36   :  { %4640 = vmatprep.subr.bf16.mxu0 %v4639_v59  ;;  %4856 = vmatprep.subr.bf16.mxu1 %v4639_v59  ;;  %v4677_v59 = vpack.c.bf16 %v119_v54, %v117_v53  ;;  %v145_v36 = vld [vmem:[%s8399_s3 + $0xe0] sm:$0xff]  ;;  %v166_v62 = vld [vmem:[%s8399_s3 + $0x188] sm:$0xff]  ;;  %v171_v11 = vld [vmem:[%s8399_s3 + $0x1b0] sm:$0xff] }
  0x37   :  { %v149_v42 = vld [vmem:[%s8399_s3 + $0x100] sm:$0xff]  ;;  %v174_v12 = vld [vmem:[%s8399_s3 + $0x1c8] sm:$0xff]  ;;  %vm6476_vm3 = vmor %vm1152_vm1, %vm1153_vm2  ;;  %vm5882_vm1 = vmmov 0  }
  0x38   :  { %v153_v48 = vld [vmem:[%s8399_s3 + $0x120] sm:$0xff] }
  0x39   :  { %4642 = vmatpush1.bf16.msra.mxu0 %v4641_v0  ;;  %4858 = vmatpush1.bf16.msra.mxu1 %v4641_v0  ;;  %v128_v0 = vld [vmem:[%s8399_s3 + $0x58] sm:$0xff]  ;;  %v157_v54 = vld [vmem:[%s8399_s3 + $0x140] sm:$0xff] }
  0x3a   :  { %4644 = vmatprep.subr.bf16.mxu0 %v4643_v1  ;;  %4860 = vmatprep.subr.bf16.mxu1 %v4643_v1  ;;  %v5778_v1 = vld [vmem:[%s8415_s0 + $0x8] ss:$24 sps:$4 sm:$0xff]   ;;  %v4683_v4 = vpack.c.bf16 %v128_v0, %v126_v63  ;;  %v168_v63 = vld [vmem:[%s8399_s3 + $0x198] sm:$0xff] }
  0x3b   :  { %v181_v27 = vld [vmem:[%s8399_s3 + $0x200] sm:$0xff] }
  0x3d   :  { %4646 = vmatpush1.bf16.msra.mxu0 %v4645_v6  ;;  %4862 = vmatpush1.bf16.msra.mxu1 %v4645_v6  ;;  %v127_v6 = vld [vmem:[%s8399_s3 + $0x50] sm:$0xff] }
  0x3e   :  { %4648 = vmatprep.subr.bf16.mxu0 %v4647_v8  ;;  %4864 = vmatprep.subr.bf16.mxu1 %v4647_v8  ;;  %v130_v8 = vld [vmem:[%s8399_s3 + $0x68] sm:$0xff]  ;;  %v4685_v10 = vpack.c.bf16 %v127_v6, %v125_v5  ;;  %v172_v6 = vld [vmem:[%s8399_s3 + $0x1b8] sm:$0xff] }
  0x3f   :  { %v170_v5 = vld [vmem:[%s8399_s3 + $0x1a8] sm:$0xff] }
  0x41   :  { %4650 = vmatpush1.bf16.msra.mxu0 %v4649_v13  ;;  %4866 = vmatpush1.bf16.msra.mxu1 %v4649_v13  ;;  %v4687_v13 = vpack.c.bf16 %v132_v9, %v130_v8  ;;  %v4727_v9 = vpack.c.bf16 %v172_v6, %v170_v5  ;;  %v3990_v5 = vld [vmem:[%s8399_s3 + $0x4c0] sm:$0xff]  ;;  %v3992_v6 = vld [vmem:[%s8399_s3 + $0x4d0] sm:$0xff] }
  0x42   :  { %4652 = vmatprep.subr.bf16.mxu0 %v4651_v14  ;;  %4868 = vmatprep.subr.bf16.mxu1 %v4651_v14  ;;  %v134_v14 = vld [vmem:[%s8399_s3 + $0x88] sm:$0xff] }
  0x43   :  { %v4691_v17 = vpack.c.bf16 %v136_v15, %v134_v14 }
  0x45   :  { %4654 = vmatpush1.bf16.msra.mxu0 %v4653_v19  ;;  %4870 = vmatpush1.bf16.msra.mxu1 %v4653_v19  ;;  %v135_v19 = vld [vmem:[%s8399_s3 + $0x90] sm:$0xff] }
  0x46   :  { %4656 = vmatprep.subr.bf16.mxu0 %v4655_v20  ;;  %4872 = vmatprep.subr.bf16.mxu1 %v4655_v20  ;;  %v138_v20 = vld [vmem:[%s8399_s3 + $0xa8] sm:$0xff]  ;;  %v4693_v22 = vpack.c.bf16 %v135_v19, %v133_v18  ;;  %v180_v19 = vld [vmem:[%s8399_s3 + $0x1f8] sm:$0xff] }
  0x47   :  { %v4695_v23 = vpack.c.bf16 %v140_v21, %v138_v20  ;;  %v178_v18 = vld [vmem:[%s8399_s3 + $0x1e8] sm:$0xff] }
  0x48   :  { %v4735_v21 = vpack.c.bf16 %v180_v19, %v178_v18  ;;  %v4000_v18 = vld [vmem:[%s8399_s3 + $0x510] sm:$0xff]  ;;  %v4003_v19 = vld [vmem:[%s8399_s3 + $0x528] sm:$0xff] }
  0x49   :  { %4658 = vmatpush1.bf16.msra.mxu0 %v4657_v25  ;;  %4874 = vmatpush1.bf16.msra.mxu1 %v4657_v25  ;;  %v139_v25 = vld [vmem:[%s8399_s3 + $0xb0] sm:$0xff] }
  0x4a   :  { %4660 = vmatprep.subr.bf16.mxu0 %v4659_v28  ;;  %4876 = vmatprep.subr.bf16.mxu1 %v4659_v28  ;;  %v4697_v28 = vpack.c.bf16 %v139_v25, %v137_v24  ;;  %v182_v24 = vld [vmem:[%s8399_s3 + $0x208] sm:$0xff]  ;;  %v184_v25 = vld [vmem:[%s8399_s3 + $0x218] sm:$0xff] }
  0x4d   :  { %4662 = vmatpush1.bf16.msra.mxu0 %v4661_v31  ;;  %4878 = vmatpush1.bf16.msra.mxu1 %v4661_v31  ;;  %v143_v31 = vld [vmem:[%s8399_s3 + $0xd0] sm:$0xff] }
  0x4e   :  { %4664 = vmatprep.subr.bf16.mxu0 %v4663_v32  ;;  %4880 = vmatprep.subr.bf16.mxu1 %v4663_v32  ;;  %v146_v32 = vld [vmem:[%s8399_s3 + $0xe8] sm:$0xff]  ;;  %v4701_v34 = vpack.c.bf16 %v143_v31, %v141_v30  ;;  %v5780_v30 = vld [vmem:[%s8415_s0] ss:$24 sps:$4 sm:$0xff]  }
  0x4f   :  { %v4703_v35 = vpack.c.bf16 %v148_v33, %v146_v32  ;;  %v6443_v31 = vld [vmem:[%s8415_s0 + $0x60] ss:$24 sps:$4 sm:$0xff]   ;;  %v186_v32 = vld [vmem:[%s8399_s3 + $0x228] sm:$0xff] }
  0x50   :  { %v188_v33 = vld [vmem:[%s8399_s3 + $0x238] sm:$0xff] }
  0x51   :  { %4666 = vmatpush1.bf16.msra.mxu0 %v4665_v37  ;;  %4882 = vmatpush1.bf16.msra.mxu1 %v4665_v37  ;;  %v147_v37 = vld [vmem:[%s8399_s3 + $0xf0] sm:$0xff] }
  0x52   :  { %4668 = vmatprep.subr.bf16.mxu0 %v4667_v38  ;;  %4884 = vmatprep.subr.bf16.mxu1 %v4667_v38  ;;  %v150_v38 = vld [vmem:[%s8399_s3 + $0x108] sm:$0xff]  ;;  %v4705_v40 = vpack.c.bf16 %v147_v37, %v145_v36  ;;  %v5787_v36 = vld [vmem:[%s8415_s0 + $0x18] ss:$8 sps:$4 sm:$0xee]  }
  0x53   :  { %v4707_v41 = vpack.c.bf16 %v152_v39, %v150_v38  ;;  %v5789_v37 = vld [vmem:[%s8415_s0 + $0x1c] ss:$8 sps:$4 sm:$0x11]   ;;  %v4743_v39 = vpack.c.bf16 %v188_v33, %v186_v32  ;;  %v4011_v32 = vld [vmem:[%s8399_s3 + $0x568] sm:$0xff] }
  0x54   :  { %350 = vmatmul.mubr.f32.vlgmr.msra.gmra.mrb[0].mxu0 %v5774_v43  ;;  %915 = vmatmul.mubr.f32.vlgmr.msra.gmra.mrb[0].mxu1 %v5775_v44  ;;  %v151_v43 = vld [vmem:[%s8399_s3 + $0x110] sm:$0xff]  ;;  %v154_v44 = vld [vmem:[%s8399_s3 + $0x128] sm:$0xff]  ;;  %v4013_v33 = vld [vmem:[%s8399_s3 + $0x578] sm:$0xff] }
  0x55   :  { %4670 = vmatpush1.bf16.msra.mxu0 %v4669_v45  ;;  %4886 = vmatpush1.bf16.msra.mxu1 %v4669_v45  ;;  %v156_v45 = vld [vmem:[%s8399_s3 + $0x138] sm:$0xff] }
  0x56   :  { %4672 = vmatprep.subr.bf16.mxu0 %v4671_v46  ;;  %4888 = vmatprep.subr.bf16.mxu1 %v4671_v46  ;;  %v4709_v46 = vpack.c.bf16 %v151_v43, %v149_v42  ;;  %v4711_v47 = vpack.c.bf16 %v156_v45, %v154_v44  ;;  %v3983_v42 = vld [vmem:[%s8399_s3 + $0x488] sm:$0xff]  ;;  %v3985_v43 = vld [vmem:[%s8399_s3 + $0x498] sm:$0xff] }
  0x57   :  { %420 = vmatprep.mubr.f32.mxu0 %v5880_v7  ;;  %985 = vmatprep.mubr.f32.mxu1 %v5880_v7 }
  0x59   :  { %4674 = vmatpush1.bf16.msra.mxu0 %v4673_v51  ;;  %4890 = vmatpush1.bf16.msra.mxu1 %v4673_v51  ;;  %v160_v51 = vld [vmem:[%s8399_s3 + $0x158] sm:$0xff] }
  0x5a   :  { %4676 = vmatprep.subr.bf16.mxu0 %v4675_v52  ;;  %4892 = vmatprep.subr.bf16.mxu1 %v4675_v52  ;;  %v4713_v52 = vpack.c.bf16 %v155_v49, %v153_v48  ;;  %v4715_v53 = vpack.c.bf16 %v160_v51, %v158_v50  ;;  %v4747_v50 = vpack.c.bf16 %v3985_v43, %v3983_v42  ;;  %v3982_v51 = vld [vmem:[%s8399_s3 + $0x480] sm:$0xff]  ;;  %v4016_v43 = vld [vmem:[%s8399_s3 + $0x590] sm:$0xff] }
  0x5b   :  { %v4014_v42 = vld [vmem:[%s8399_s3 + $0x580] sm:$0xff] }
  0x5c   :  { %3972 = vmatmul.mubr.msk.f32.vlgmr.msra.gmra.mrb[0].mxu0 %vm282_vm0, %v5776_v57  ;;  %4065 = vmatmul.mubr.msk.f32.vlgmr.msra.gmra.mrb[0].mxu1 %vm282_vm0, %v5777_v58  ;;  %v164_v57 = vld [vmem:[%s8399_s3 + $0x178] sm:$0xff]  ;;  %v4717_v58 = vpack.c.bf16 %v159_v55, %v157_v54  ;;  %v5782_v55 = vld [vmem:[%s8415_s0 + $0x10] ss:$24 sps:$4 sm:$0xff]  }
  0x5d   :  { %4678 = vmatpush1.bf16.msra.mxu0 %v4677_v59  ;;  %4894 = vmatpush1.bf16.msra.mxu1 %v4677_v59  ;;  %v4719_v59 = vpack.c.bf16 %v164_v57, %v162_v56  ;;  %v3989_v54 = vld [vmem:[%s8399_s3 + $0x4b8] sm:$0xff]  ;;  %v6500_v56 = vld [vmem:[%s8415_s0 + $0x70] ss:$24 sps:$4 sm:$0xff]  }
  0x5e   :  { %4680 = vmatprep.subr.bf16.mxu0 %v4679_v60  ;;  %4896 = vmatprep.subr.bf16.mxu1 %v4679_v60  ;;  %v161_v60 = vld [vmem:[%s8399_s3 + $0x160] sm:$0xff] }
  0x5f   :  { %498 = vmatprep.mubr.f32.mxu0 %v5778_v1  ;;  %1056 = vmatprep.mubr.f32.mxu1 %v6258_v2  ;;  %v4721_v0 = vpack.c.bf16 %v163_v61, %v161_v60  ;;  %v4723_v1 = vpack.c.bf16 %v168_v63, %v166_v62  ;;  %v3986_v61 = vld [vmem:[%s8399_s3 + $0x4a0] sm:$0xff]  ;;  %v3988_v62 = vld [vmem:[%s8399_s3 + $0x4b0] sm:$0xff]  ;;  %v3991_v63 = vld [vmem:[%s8399_s3 + $0x4c8] sm:$0xff] }
  0x61   :  { %4682 = vmatpush1.bf16.msra.mxu0 %v4681_v3  ;;  %4898 = vmatpush1.bf16.msra.mxu1 %v4681_v3  ;;  %v165_v3 = vld [vmem:[%s8399_s3 + $0x180] sm:$0xff] }
  0x62   :  { %4684 = vmatprep.subr.bf16.mxu0 %v4683_v4  ;;  %4900 = vmatprep.subr.bf16.mxu1 %v4683_v4  ;;  %v167_v4 = vld [vmem:[%s8399_s3 + $0x190] sm:$0xff] }
  0x63   :  { %v4725_v8 = vpack.c.bf16 %v167_v4, %v165_v3  ;;  %v4753_v3 = vpack.c.bf16 %v3988_v62, %v3986_v61  ;;  %v4029_v61 = vld [vmem:[%s8399_s3 + $0x5f8] sm:$0xff] }
  0x65   :  { %4686 = vmatpush1.bf16.msra.mxu0 %v4685_v10  ;;  %4902 = vmatpush1.bf16.msra.mxu1 %v4685_v10  ;;  %v169_v10 = vld [vmem:[%s8399_s3 + $0x1a0] sm:$0xff] }
  0x66   :  { %4688 = vmatprep.subr.bf16.mxu0 %v4687_v13  ;;  %4904 = vmatprep.subr.bf16.mxu1 %v4687_v13  ;;  %v176_v13 = vld [vmem:[%s8399_s3 + $0x1d8] sm:$0xff]  ;;  %v4729_v14 = vpack.c.bf16 %v171_v11, %v169_v10  ;;  %v4757_v10 = vpack.c.bf16 %v3992_v6, %v3990_v5 }
  0x67   :  { %v4731_v15 = vpack.c.bf16 %v176_v13, %v174_v12  ;;  %v3994_v12 = vld [vmem:[%s8399_s3 + $0x4e0] sm:$0xff]  ;;  %v3996_v13 = vld [vmem:[%s8399_s3 + $0x4f0] sm:$0xff] }
  0x69   :  { %4690 = vmatpush1.bf16.msra.mxu0 %v4689_v16  ;;  %4906 = vmatpush1.bf16.msra.mxu1 %v4689_v16  ;;  %v173_v16 = vld [vmem:[%s8399_s3 + $0x1c0] sm:$0xff] }
  0x6a   :  { %4692 = vmatprep.subr.bf16.mxu0 %v4691_v17  ;;  %4908 = vmatprep.subr.bf16.mxu1 %v4691_v17  ;;  %v175_v17 = vld [vmem:[%s8399_s3 + $0x1d0] sm:$0xff] }
  0x6b   :  { %v4733_v20 = vpack.c.bf16 %v175_v17, %v173_v16  ;;  %v3998_v17 = vld [vmem:[%s8399_s3 + $0x500] sm:$0xff] }
  0x6d   :  { %4694 = vmatpush1.bf16.msra.mxu0 %v4693_v22  ;;  %4910 = vmatpush1.bf16.msra.mxu1 %v4693_v22  ;;  %v177_v22 = vld [vmem:[%s8399_s3 + $0x1e0] sm:$0xff] }
  0x6e   :  { %4696 = vmatprep.subr.bf16.mxu0 %v4695_v23  ;;  %4912 = vmatprep.subr.bf16.mxu1 %v4695_v23  ;;  %v179_v23 = vld [vmem:[%s8399_s3 + $0x1f0] sm:$0xff] }
  0x6f   :  { %v4737_v26 = vpack.c.bf16 %v179_v23, %v177_v22  ;;  %v4002_v23 = vld [vmem:[%s8399_s3 + $0x520] sm:$0xff] }
  0x71   :  { %4698 = vmatpush1.bf16.msra.mxu0 %v4697_v28  ;;  %4914 = vmatpush1.bf16.msra.mxu1 %v4697_v28  ;;  %v183_v28 = vld [vmem:[%s8399_s3 + $0x210] sm:$0xff] }
  0x72   :  { %4700 = vmatprep.subr.bf16.mxu0 %v4699_v29  ;;  %4916 = vmatprep.subr.bf16.mxu1 %v4699_v29  ;;  %v4739_v29 = vpack.c.bf16 %v184_v25, %v182_v24  ;;  %v4741_v38 = vpack.c.bf16 %v183_v28, %v181_v27  ;;  %v4004_v24 = vld [vmem:[%s8399_s3 + $0x530] sm:$0xff]  ;;  %v4007_v25 = vld [vmem:[%s8399_s3 + $0x548] sm:$0xff] }
  0x73   :  { %v4769_v27 = vpack.c.bf16 %v4004_v24, %v4002_v23  ;;  %v4042_v24 = vld [vmem:[%s8399_s3 + $0x660] sm:$0xff] }
  0x75   :  { %4702 = vmatpush1.bf16.msra.mxu0 %v4701_v34  ;;  %4918 = vmatpush1.bf16.msra.mxu1 %v4701_v34  ;;  %v5784_v34 = vld [vmem:[%s8415_s0] ss:$8 sps:$4 sm:$0xee]  }
  0x76   :  { %4704 = vmatprep.subr.bf16.mxu0 %v4703_v35  ;;  %4920 = vmatprep.subr.bf16.mxu1 %v4703_v35  ;;  %v5786_v35 = vld [vmem:[%s8415_s0 + $0x4] ss:$8 sps:$4 sm:$0x11]   ;;  %v4067_v44 = vrot.slane %v5784_v34, 9 }
  0x77   :  { %v1157_v45 = vrot.slane %v5786_v35, 5  ;;  %v4775_v35 = vpack.c.bf16 %v4013_v33, %v4011_v32  ;;  %v4046_v33 = vld [vmem:[%s8399_s3 + $0x680] sm:$0xff] }
  0x79   :  { %4706 = vmatpush1.bf16.msra.mxu0 %v4705_v40  ;;  %4922 = vmatpush1.bf16.msra.mxu1 %v4705_v40  ;;  %v185_v40 = vld [vmem:[%s8399_s3 + $0x220] sm:$0xff]  ;;  %v6504_v57 = vsel %vm6476_vm3, %v4067_v44, %v1157_v45  ;;  %v4019_v44 = vld [vmem:[%s8399_s3 + $0x5a8] sm:$0xff]  ;;  %v4021_v45 = vld [vmem:[%s8399_s3 + $0x5b8] sm:$0xff] }
  0x7a   :  { %4708 = vmatprep.subr.bf16.mxu0 %v4707_v41  ;;  %4924 = vmatprep.subr.bf16.mxu1 %v4707_v41  ;;  %v187_v41 = vld [vmem:[%s8399_s3 + $0x230] sm:$0xff] }
  0x7b   :  { %v4745_v48 = vpack.c.bf16 %v187_v41, %v185_v40 }
  0x7d   :  { %4710 = vmatpush1.bf16.msra.mxu0 %v4709_v46  ;;  %4926 = vmatpush1.bf16.msra.mxu1 %v4709_v46  ;;  %v4069_v46 = vrot.slane %v5787_v36, 9  ;;  %v4010_v36 = vld [vmem:[%s8399_s3 + $0x560] sm:$0xff] }
  0x7e   :  { %4712 = vmatprep.subr.bf16.mxu0 %v4711_v47  ;;  %4928 = vmatprep.subr.bf16.mxu1 %v4711_v47  ;;  %v1165_v47 = vrot.slane %v5789_v37, 5  ;;  %v4012_v37 = vld [vmem:[%s8399_s3 + $0x570] sm:$0xff] }
  0x7f   :  { %v4777_v40 = vpack.c.bf16 %v4012_v37, %v4010_v36 }
  0x81   :  { %4714 = vmatpush1.bf16.msra.mxu0 %v4713_v52  ;;  %4930 = vmatpush1.bf16.msra.mxu1 %v4713_v52  ;;  %v3984_v52 = vld [vmem:[%s8399_s3 + $0x490] sm:$0xff] }
  0x82   :  { %4716 = vmatprep.subr.bf16.mxu0 %v4715_v53  ;;  %4932 = vmatprep.subr.bf16.mxu1 %v4715_v53  ;;  %v3987_v53 = vld [vmem:[%s8399_s3 + $0x4a8] sm:$0xff] }
  0x83   :  { %v4751_v60 = vpack.c.bf16 %v3989_v54, %v3987_v53 }
  0x85   :  { %4718 = vmatpush1.bf16.msra.mxu0 %v4717_v58  ;;  %4934 = vmatpush1.bf16.msra.mxu1 %v4717_v58  ;;  %v6508_v58 = vsel %vm6476_vm3, %v4069_v46, %v1165_v47  ;;  %v4781_v46 = vpack.c.bf16 %v4016_v43, %v4014_v42  ;;  %v4783_v47 = vpack.c.bf16 %v4021_v45, %v4019_v44 }
  0x86   :  { %4720 = vmatprep.subr.bf16.mxu0 %v4719_v59  ;;  %4936 = vmatprep.subr.bf16.mxu1 %v4719_v59  ;;  %v4749_v59 = vpack.c.bf16 %v3984_v52, %v3982_v51  ;;  %v4023_v51 = vld [vmem:[%s8399_s3 + $0x5c8] sm:$0xff]  ;;  %v4025_v52 = vld [vmem:[%s8399_s3 + $0x5d8] sm:$0xff] }
  0x87   :  { %v4787_v54 = vpack.c.bf16 %v4025_v52, %v4023_v51 }
  0x89   :  { %4722 = vmatpush1.bf16.msra.mxu0 %v4721_v0  ;;  %4938 = vmatpush1.bf16.msra.mxu1 %v4721_v0  ;;  %v3993_v0 = vld [vmem:[%s8399_s3 + $0x4d8] sm:$0xff] }
  0x8a   :  { %4724 = vmatprep.subr.bf16.mxu0 %v4723_v1  ;;  %4940 = vmatprep.subr.bf16.mxu1 %v4723_v1  ;;  %v1172_v1 = vcombine.high %v6504_v57, %v6508_v58  ;;  %v4755_v4 = vpack.c.bf16 %v3993_v0, %v3991_v63  ;;  %v4026_v0 = vld [vmem:[%s8399_s3 + $0x5e0] sm:$0xff] }
  0x8d   :  { %4726 = vmatpush1.bf16.msra.mxu0 %v4725_v8  ;;  %4942 = vmatpush1.bf16.msra.mxu1 %v4725_v8  ;;  %v3995_v8 = vld [vmem:[%s8399_s3 + $0x4e8] sm:$0xff] }
  0x8e   :  { %4728 = vmatprep.subr.bf16.mxu0 %v4727_v9  ;;  %4944 = vmatprep.subr.bf16.mxu1 %v4727_v9  ;;  %v3997_v9 = vld [vmem:[%s8399_s3 + $0x4f8] sm:$0xff] }
  0x8f   :  { %v4759_v11 = vpack.c.bf16 %v3997_v9, %v3995_v8  ;;  %v4030_v8 = vld [vmem:[%s8399_s3 + $0x600] sm:$0xff]  ;;  %v4032_v9 = vld [vmem:[%s8399_s3 + $0x610] sm:$0xff] }
  0x91   :  { %4730 = vmatpush1.bf16.msra.mxu0 %v4729_v14  ;;  %4946 = vmatpush1.bf16.msra.mxu1 %v4729_v14  ;;  %v3999_v14 = vld [vmem:[%s8399_s3 + $0x508] sm:$0xff] }
  0x92   :  { %4732 = vmatprep.subr.bf16.mxu0 %v4731_v15  ;;  %4948 = vmatprep.subr.bf16.mxu1 %v4731_v15  ;;  %v4761_v15 = vpack.c.bf16 %v3996_v13, %v3994_v12  ;;  %v4797_v12 = vpack.c.bf16 %v4032_v9, %v4030_v8  ;;  %v4086_v8 = vld [vmem:[%s8401_s5 + $0x190] sm:$0xff]  ;;  %v4091_v9 = vld [vmem:[%s8401_s5 + $0x1b8] sm:$0xff] }
  0x95   :  { %4734 = vmatpush1.bf16.msra.mxu0 %v4733_v20  ;;  %4950 = vmatpush1.bf16.msra.mxu1 %v4733_v20  ;;  %v4005_v20 = vld [vmem:[%s8399_s3 + $0x538] sm:$0xff] }
  0x96   :  { %4736 = vmatprep.subr.bf16.mxu0 %v4735_v21  ;;  %4952 = vmatprep.subr.bf16.mxu1 %v4735_v21  ;;  %v4765_v21 = vpack.c.bf16 %v4000_v18, %v3998_v17  ;;  %v4767_v22 = vpack.c.bf16 %v4005_v20, %v4003_v19  ;;  %v4038_v19 = vld [vmem:[%s8399_s3 + $0x640] sm:$0xff]  ;;  %v4040_v20 = vld [vmem:[%s8399_s3 + $0x650] sm:$0xff] }
  0x97   :  { %v4805_v23 = vpack.c.bf16 %v4040_v20, %v4038_v19  ;;  %v4097_v19 = vld [vmem:[%s8401_s5 + $0x1e8] sm:$0xff]  ;;  %v4099_v20 = vld [vmem:[%s8401_s5 + $0x1f8] sm:$0xff] }
  0x99   :  { %4738 = vmatpush1.bf16.msra.mxu0 %v4737_v26  ;;  %4954 = vmatpush1.bf16.msra.mxu1 %v4737_v26  ;;  %v4009_v26 = vld [vmem:[%s8399_s3 + $0x558] sm:$0xff] }
  0x9a   :  { %4740 = vmatprep.subr.bf16.mxu0 %v4739_v29  ;;  %4956 = vmatprep.subr.bf16.mxu1 %v4739_v29  ;;  %v4771_v28 = vpack.c.bf16 %v4009_v26, %v4007_v25  ;;  %v4006_v29 = vld [vmem:[%s8399_s3 + $0x540] sm:$0xff]  ;;  %v4044_v26 = vld [vmem:[%s8399_s3 + $0x670] sm:$0xff] }
  0x9b   :  { %v4809_v32 = vpack.c.bf16 %v4044_v26, %v4042_v24  ;;  %v4098_v24 = vld [vmem:[%s8401_s5 + $0x1f0] sm:$0xff]  ;;  %v4101_v26 = vld [vmem:[%s8401_s5 + $0x208] sm:$0xff] }
  0x9c   :  { %499 = vmatmul.mubr.f32.vlgmr.msra.gmra.mrb[0].mxu0 %v5780_v30  ;;  %1057 = vmatmul.mubr.f32.vlgmr.msra.gmra.mrb[0].mxu1 %v6443_v31  ;;  %v4008_v30 = vld [vmem:[%s8399_s3 + $0x550] sm:$0xff] }
  0x9d   :  { %4742 = vmatpush1.bf16.msra.mxu0 %v4741_v38  ;;  %4958 = vmatpush1.bf16.msra.mxu1 %v4741_v38  ;;  %v4773_v34 = vpack.c.bf16 %v4008_v30, %v4006_v29  ;;  %v4015_v38 = vld [vmem:[%s8399_s3 + $0x588] sm:$0xff]  ;;  %v4049_v30 = vld [vmem:[%s8399_s3 + $0x698] sm:$0xff] }
  0x9e   :  { %4744 = vmatprep.subr.bf16.mxu0 %v4743_v39  ;;  %4960 = vmatprep.subr.bf16.mxu1 %v4743_v39  ;;  %v4017_v39 = vld [vmem:[%s8399_s3 + $0x598] sm:$0xff]  ;;  %v4047_v29 = vld [vmem:[%s8399_s3 + $0x688] sm:$0xff] }
  0x9f   :  { %569 = vmatprep.mubr.f32.mxu0 %v5880_v7  ;;  %1127 = vmatprep.mubr.f32.mxu1 %v5880_v7  ;;  %v4779_v41 = vpack.c.bf16 %v4017_v39, %v4015_v38  ;;  %v4811_v37 = vpack.c.bf16 %v4049_v30, %v4047_v29  ;;  %v4051_v38 = vld [vmem:[%s8399_s3 + $0x6a8] sm:$0xff]  ;;  %v4053_v39 = vld [vmem:[%s8399_s3 + $0x6b8] sm:$0xff]  ;;  %v4100_v29 = vld [vmem:[%s8401_s5 + $0x200] sm:$0xff] }
  0xa0   :  { %v4102_v30 = vld [vmem:[%s8401_s5 + $0x210] sm:$0xff] }
  0xa1   :  { %4746 = vmatpush1.bf16.msra.mxu0 %v4745_v48  ;;  %4962 = vmatpush1.bf16.msra.mxu1 %v4745_v48  ;;  %v4018_v48 = vld [vmem:[%s8399_s3 + $0x5a0] sm:$0xff] }
  0xa2   :  { %4748 = vmatprep.subr.bf16.mxu0 %v4747_v50  ;;  %4964 = vmatprep.subr.bf16.mxu1 %v4747_v50  ;;  %v4020_v50 = vld [vmem:[%s8399_s3 + $0x5b0] sm:$0xff] }
  0xa3   :  { %v4785_v53 = vpack.c.bf16 %v4020_v50, %v4018_v48  ;;  %v4052_v48 = vld [vmem:[%s8399_s3 + $0x6b0] sm:$0xff] }
  0xa4   :  { %3975 = vmatmul.mubr.msk.f32.vlgmr.msra.gmra.mrb[0].mxu0 %vm282_vm0, %v5782_v55  ;;  %4066 = vmatmul.mubr.msk.f32.vlgmr.msra.gmra.mrb[0].mxu1 %vm282_vm0, %v6500_v56  ;;  %v4022_v55 = vld [vmem:[%s8399_s3 + $0x5c0] sm:$0xff] }
  0xa5   :  { %4750 = vmatpush1.bf16.msra.mxu0 %v4749_v59  ;;  %4966 = vmatpush1.bf16.msra.mxu1 %v4749_v59  ;;  %v4024_v59 = vld [vmem:[%s8399_s3 + $0x5d0] sm:$0xff] }
  0xa6   :  { %4752 = vmatprep.subr.bf16.mxu0 %v4751_v60  ;;  %4968 = vmatprep.subr.bf16.mxu1 %v4751_v60  ;;  %v4027_v60 = vld [vmem:[%s8399_s3 + $0x5e8] sm:$0xff]  ;;  %v4789_v62 = vpack.c.bf16 %v4024_v59, %v4022_v55  ;;  %v4083_v59 = vld [vmem:[%s8401_s5 + $0x178] sm:$0xff] }
  0xa7   :  { %735 = vmatprep.mubr.f32.mxu0 %v6258_v2  ;;  %1242 = vmatprep.mubr.f32.mxu1 %v1172_v1  ;;  %v4001_v2 = vld [vmem:[%s8399_s3 + $0x518] sm:$0xff]  ;;  %v4791_v63 = vpack.c.bf16 %v4029_v61, %v4027_v60  ;;  %v4028_v1 = vld [vmem:[%s8399_s3 + $0x5f0] sm:$0xff]  ;;  %v4081_v55 = vld [vmem:[%s8401_s5 + $0x168] sm:$0xff] }
  0xa8   :  { %v4763_v16 = vpack.c.bf16 %v4001_v2, %v3999_v14  ;;  %v4793_v5 = vpack.c.bf16 %v4028_v1, %v4026_v0  ;;  %v4034_v14 = vld [vmem:[%s8399_s3 + $0x620] sm:$0xff]  ;;  %v4036_v2 = vld [vmem:[%s8399_s3 + $0x630] sm:$0xff]  ;;  %v4085_v1 = vld [vmem:[%s8401_s5 + $0x188] sm:$0xff] }
  0xa9   :  { %4754 = vmatpush1.bf16.msra.mxu0 %v4753_v3  ;;  %4970 = vmatpush1.bf16.msra.mxu1 %v4753_v3  ;;  %v4031_v3 = vld [vmem:[%s8399_s3 + $0x608] sm:$0xff]  ;;  %v4801_v17 = vpack.c.bf16 %v4036_v2, %v4034_v14  ;;  %v4082_v0 = vld [vmem:[%s8401_s5 + $0x170] sm:$0xff]  ;;  %v4095_v2 = vld [vmem:[%s8401_s5 + $0x1d8] sm:$0xff] }
  0xaa   :  { %4756 = vmatprep.subr.bf16.mxu0 %v4755_v4  ;;  %4972 = vmatprep.subr.bf16.mxu1 %v4755_v4  ;;  %v4033_v4 = vld [vmem:[%s8399_s3 + $0x618] sm:$0xff]  ;;  %v4093_v14 = vld [vmem:[%s8401_s5 + $0x1c8] sm:$0xff] }
  0xab   :  { %v4795_v6 = vpack.c.bf16 %v4033_v4, %v4031_v3  ;;  %v4087_v3 = vld [vmem:[%s8401_s5 + $0x198] sm:$0xff] }
  0xad   :  { %4758 = vmatpush1.bf16.msra.mxu0 %v4757_v10  ;;  %4974 = vmatpush1.bf16.msra.mxu1 %v4757_v10  ;;  %v4035_v10 = vld [vmem:[%s8399_s3 + $0x628] sm:$0xff] }
  0xae   :  { %4760 = vmatprep.subr.bf16.mxu0 %v4759_v11  ;;  %4976 = vmatprep.subr.bf16.mxu1 %v4759_v11  ;;  %v4037_v11 = vld [vmem:[%s8399_s3 + $0x638] sm:$0xff] }
  0xaf   :  { %v4799_v13 = vpack.c.bf16 %v4037_v11, %v4035_v10 }
  0xb1   :  { %4762 = vmatpush1.bf16.msra.mxu0 %v4761_v15  ;;  %4978 = vmatpush1.bf16.msra.mxu1 %v4761_v15  ;;  %v4039_v15 = vld [vmem:[%s8399_s3 + $0x648] sm:$0xff] }
  0xb2   :  { %4764 = vmatprep.subr.bf16.mxu0 %v4763_v16  ;;  %4980 = vmatprep.subr.bf16.mxu1 %v4763_v16  ;;  %v4041_v16 = vld [vmem:[%s8399_s3 + $0x658] sm:$0xff] }
  0xb3   :  { %v4803_v18 = vpack.c.bf16 %v4041_v16, %v4039_v15  ;;  %v5051_v16 = vpack.c.bf16 %v4095_v2, %v4093_v14 }
  0xb5   :  { %4766 = vmatpush1.bf16.msra.mxu0 %v4765_v21  ;;  %4982 = vmatpush1.bf16.msra.mxu1 %v4765_v21  ;;  %v4043_v21 = vld [vmem:[%s8399_s3 + $0x668] sm:$0xff] }
  0xb6   :  { %4768 = vmatprep.subr.bf16.mxu0 %v4767_v22  ;;  %4984 = vmatprep.subr.bf16.mxu1 %v4767_v22  ;;  %v4045_v22 = vld [vmem:[%s8399_s3 + $0x678] sm:$0xff] }
  0xb7   :  { %v4807_v25 = vpack.c.bf16 %v4045_v22, %v4043_v21  ;;  %v5055_v22 = vpack.c.bf16 %v4099_v20, %v4097_v19 }
  0xb9   :  { %4770 = vmatpush1.bf16.msra.mxu0 %v4769_v27  ;;  %4986 = vmatpush1.bf16.msra.mxu1 %v4769_v27  ;;  %v1136_v27 = vld [vmem:[%s8415_s0 + $0x10] sm:$0x1e] }
  0xba   :  { %4772 = vmatprep.subr.bf16.mxu0 %v4771_v28  ;;  %4988 = vmatprep.subr.bf16.mxu1 %v4771_v28  ;;  %v1139_v28 = vld [vmem:[%s8415_s0 + $0x28] sm:$0x1e]  ;;  %v4068_v42 = vrot.slane %v1136_v27, 9 }
  0xbb   :  { %v1151_v36 = vcombine.high %v1139_v28, %v1139_v28  ;;  %v4070_v44 = vrot.slane %v1139_v28, 9 }
  0xbd   :  { %4774 = vmatpush1.bf16.msra.mxu0 %v4773_v34  ;;  %4990 = vmatpush1.bf16.msra.mxu1 %v4773_v34  ;;  %v4048_v34 = vld [vmem:[%s8399_s3 + $0x690] sm:$0xff]  ;;  %v1169_v45 = vrot.slane %v1151_v36, 5  ;;  %v4104_v36 = vld [vmem:[%s8401_s5 + $0x220] sm:$0xff] }
  0xbe   :  { %4776 = vmatprep.subr.bf16.mxu0 %v4775_v35  ;;  %4992 = vmatprep.subr.bf16.mxu1 %v4775_v35  ;;  %v1148_v35 = vcombine.high %v1136_v27, %v1136_v27  ;;  %v4103_v27 = vld [vmem:[%s8401_s5 + $0x218] sm:$0xff] }
  0xbf   :  { %v1170_v52 = vsel %vm6476_vm3, %v4070_v44, %v1169_v45  ;;  %v5059_v28 = vpack.c.bf16 %v4103_v27, %v4101_v26  ;;  %v4113_v45 = vld [vmem:[%s8401_s5 + $0x268] sm:$0xff]  ;;  %v1383_v27 = vld [vmem:[%s8401_s5] sm:$0xff] }
  0xc0   :  { %v1161_v43 = vrot.slane %v1148_v35, 5 }
  0xc1   :  { %4778 = vmatpush1.bf16.msra.mxu0 %v4777_v40  ;;  %4994 = vmatpush1.bf16.msra.mxu1 %v4777_v40  ;;  %v1171_v40 = vcombine.low %v6504_v57, %v6508_v58  ;;  %v4077_v57 = vld [vmem:[%s8401_s5 + $0x148] sm:$0xff]  ;;  %v4079_v58 = vld [vmem:[%s8401_s5 + $0x158] sm:$0xff] }
  0xc2   :  { %4780 = vmatprep.subr.bf16.mxu0 %v4779_v41  ;;  %4996 = vmatprep.subr.bf16.mxu1 %v4779_v41  ;;  %v4813_v41 = vpack.c.bf16 %v4048_v34, %v4046_v33  ;;  %v1162_v51 = vsel %vm6476_vm3, %v4068_v42, %v1161_v43  ;;  %v4105_v33 = vld [vmem:[%s8401_s5 + $0x228] sm:$0xff]  ;;  %v4107_v34 = vld [vmem:[%s8401_s5 + $0x238] sm:$0xff]  ;;  %v4108_v42 = vld [vmem:[%s8401_s5 + $0x240] sm:$0xff] }
  0xc3   :  { %v1173_v60 = vcombine.low %v1162_v51, %v1170_v52  ;;  %v5063_v35 = vpack.c.bf16 %v4107_v34, %v4105_v33  ;;  %v4110_v43 = vld [vmem:[%s8401_s5 + $0x250] sm:$0xff]  ;;  %v1386_v51 = vld [vmem:[%s8401_s5 + $0x18] sm:$0xff] }
  0xc4   :  { %v5069_v44 = vpack.c.bf16 %v4110_v43, %v4108_v42  ;;  %v1389_v33 = vld [vmem:[%s8401_s5 + $0x30] sm:$0xff] }
  0xc5   :  { %4782 = vmatpush1.bf16.msra.mxu0 %v4781_v46  ;;  %4998 = vmatpush1.bf16.msra.mxu1 %v4781_v46  ;;  %v4815_v46 = vpack.c.bf16 %v4053_v39, %v4051_v38  ;;  %v4109_v39 = vld [vmem:[%s8401_s5 + $0x248] sm:$0xff]  ;;  %v1393_v42 = vld [vmem:[%s8401_s5 + $0x50] sm:$0xff] }
  0xc6   :  { %4784 = vmatprep.subr.bf16.mxu0 %v4783_v47  ;;  %5000 = vmatprep.subr.bf16.mxu1 %v4783_v47  ;;  %v4050_v47 = vld [vmem:[%s8399_s3 + $0x6a0] sm:$0xff]  ;;  %s3889_s3 = sld [smem:[#allocation7 + $0x1]] }
  0xc7   :  { %v4817_v50 = vpack.c.bf16 %v4052_v48, %v4050_v47  ;;  %v4112_v47 = vld [vmem:[%s8401_s5 + $0x260] sm:$0xff] }
  0xc9   :  { %4786 = vmatpush1.bf16.msra.mxu0 %v4785_v53  ;;  %5002 = vmatpush1.bf16.msra.mxu1 %v4785_v53  ;;  %v5035_v53 = vpack.c.bf16 %v4079_v58, %v4077_v57  ;;  %v4114_v57 = vld [vmem:[%s8401_s5 + $0x270] sm:$0xff] }
  0xca   :  { %4788 = vmatprep.subr.bf16.mxu0 %v4787_v54  ;;  %5004 = vmatprep.subr.bf16.mxu1 %v4787_v54  ;;  %v4076_v54 = vld [vmem:[%s8401_s5 + $0x140] sm:$0xff]  ;;  %v5073_v58 = vpack.c.bf16 %v4114_v57, %v4112_v47  ;;  %v1398_v47 = vld [vmem:[%s8401_s5 + $0x78] sm:$0xff] }
  0xcd   :  { %4790 = vmatpush1.bf16.msra.mxu0 %v4789_v62  ;;  %5006 = vmatpush1.bf16.msra.mxu1 %v4789_v62  ;;  %v5039_v62 = vpack.c.bf16 %v4083_v59, %v4081_v55  ;;  %v102_v55 = vld [vmem:[%s8400_s4] sm:$0x3] }
  0xce   :  { %4792 = vmatprep.subr.bf16.mxu0 %v4791_v63  ;;  %5008 = vmatprep.subr.bf16.mxu1 %v4791_v63  ;;  %v4080_v63 = vld [vmem:[%s8401_s5 + $0x160] sm:$0xff] }
  0xcf   :  { %v5041_v4 = vpack.c.bf16 %v4082_v0, %v4080_v63  ;;  %v1326_v63 = vstv %s67_s1 }
  0xd1   :  { %4794 = vmatpush1.bf16.msra.mxu0 %v4793_v5  ;;  %5010 = vmatpush1.bf16.msra.mxu1 %v4793_v5  ;;  %v5043_v5 = vpack.c.bf16 %v4087_v3, %v4085_v1 }
  0xd2   :  { %4796 = vmatprep.subr.bf16.mxu0 %v4795_v6  ;;  %5012 = vmatprep.subr.bf16.mxu1 %v4795_v6  ;;  %v4084_v6 = vld [vmem:[%s8401_s5 + $0x180] sm:$0xff] }
  0xd3   :  { %v5045_v10 = vpack.c.bf16 %v4086_v8, %v4084_v6 }
  0xd5   :  { %4798 = vmatpush1.bf16.msra.mxu0 %v4797_v12  ;;  %5014 = vmatpush1.bf16.msra.mxu1 %v4797_v12  ;;  %v4088_v12 = vld [vmem:[%s8401_s5 + $0x1a0] sm:$0xff] }
  0xd6   :  { %4800 = vmatprep.subr.bf16.mxu0 %v4799_v13  ;;  %5016 = vmatprep.subr.bf16.mxu1 %v4799_v13  ;;  %v4090_v13 = vld [vmem:[%s8401_s5 + $0x1b0] sm:$0xff] }
  0xd7   :  { %v5049_v15 = vpack.c.bf16 %v4090_v13, %v4088_v12 }
  0xd9   :  { %4802 = vmatpush1.bf16.msra.mxu0 %v4801_v17  ;;  %5018 = vmatpush1.bf16.msra.mxu1 %v4801_v17  ;;  %v4092_v17 = vld [vmem:[%s8401_s5 + $0x1c0] sm:$0xff] }
  0xda   :  { %4804 = vmatprep.subr.bf16.mxu0 %v4803_v18  ;;  %5020 = vmatprep.subr.bf16.mxu1 %v4803_v18  ;;  %v4094_v18 = vld [vmem:[%s8401_s5 + $0x1d0] sm:$0xff] }
  0xdb   :  { %v5053_v21 = vpack.c.bf16 %v4094_v18, %v4092_v17 }
  0xdd   :  { %4806 = vmatpush1.bf16.msra.mxu0 %v4805_v23  ;;  %5022 = vmatpush1.bf16.msra.mxu1 %v4805_v23  ;;  %v4096_v23 = vld [vmem:[%s8401_s5 + $0x1e0] sm:$0xff] }
  0xde   :  { %4808 = vmatprep.subr.bf16.mxu0 %v4807_v25  ;;  %5024 = vmatprep.subr.bf16.mxu1 %v4807_v25  ;;  %v5057_v25 = vpack.c.bf16 %v4098_v24, %v4096_v23 }
  0xe1   :  { %4810 = vmatpush1.bf16.msra.mxu0 %v4809_v32  ;;  %5026 = vmatpush1.bf16.msra.mxu1 %v4809_v32  ;;  %v5061_v32 = vpack.c.bf16 %v4102_v30, %v4100_v29  ;;  %v1388_v29 = vld [vmem:[%s8401_s5 + $0x28] sm:$0xff]  ;;  %v1390_v30 = vld [vmem:[%s8401_s5 + $0x38] sm:$0xff] }
  0xe2   :  { %4812 = vmatprep.subr.bf16.mxu0 %v4811_v37  ;;  %5028 = vmatprep.subr.bf16.mxu1 %v4811_v37  ;;  %v4106_v37 = vld [vmem:[%s8401_s5 + $0x230] sm:$0xff] }
  0xe3   :  { %v5065_v38 = vpack.c.bf16 %v4106_v37, %v4104_v36  ;;  %v1392_v36 = vld [vmem:[%s8401_s5 + $0x48] sm:$0xff]  ;;  %v1394_v37 = vld [vmem:[%s8401_s5 + $0x58] sm:$0xff] }
  0xe4   :  { %736 = vmatmul.mubr.f32.vlgmr.msra.gmra.mrb[0].mxu0 %v6443_v31  ;;  %1243 = vmatmul.mubr.f32.vlgmr.msra.gmra.mrb[0].mxu1 %v1171_v40  ;;  %v4078_v31 = vld [vmem:[%s8401_s5 + $0x150] sm:$0xff]  ;;  %v4111_v40 = vld [vmem:[%s8401_s5 + $0x258] sm:$0xff] }
  0xe5   :  { %4814 = vmatpush1.bf16.msra.mxu0 %v4813_v41  ;;  %5030 = vmatpush1.bf16.msra.mxu1 %v4813_v41  ;;  %v5037_v61 = vpack.c.bf16 %v4078_v31, %v4076_v54  ;;  %v5067_v41 = vpack.c.bf16 %v4111_v40, %v4109_v39  ;;  %v5079_v39 = vpack.c.bf16 %v1390_v30, %v1388_v29  ;;  %v1415_v30 = vld [vmem:[%s8401_s5 + $0x100] sm:$0xff] }
  0xe6   :  { %4816 = vmatprep.subr.bf16.mxu0 %v4815_v46  ;;  %5032 = vmatprep.subr.bf16.mxu1 %v4815_v46  ;;  %v4115_v46 = vld [vmem:[%s8401_s5 + $0x278] sm:$0xff] }
  0xe7   :  { %806 = vmatprep.mubr.f32.mxu0 %v5880_v7  ;;  %1313 = vmatprep.mubr.f32.mxu1 %v5880_v7  ;;  %v5071_v48 = vpack.c.bf16 %v4115_v46, %v4113_v45  ;;  %v5083_v46 = vpack.c.bf16 %v1394_v37, %v1392_v36  ;;  %v1419_v37 = vld [vmem:[%s8401_s5 + $0x120] sm:$0xff] }
  0xe9   :  { %4818 = vmatpush1.bf16.msra.mxu0 %v4817_v50  ;;  %5034 = vmatpush1.bf16.msra.mxu1 %v4817_v50  ;;  %v1384_v50 = vld [vmem:[%s8401_s5 + $0x8] sm:$0xff] }
  0xea   :  { %5036 = vmatprep.subr.bf16.mxu0 %v5035_v53  ;;  %5156 = vmatprep.subr.bf16.mxu1 %v5035_v53  ;;  %v5075_v52 = vpack.c.bf16 %v1386_v51, %v1384_v50  ;;  %v816_v53 = vlaneseq }
  0xec   :  { %4056 = vmatmul.mubr.msk.f32.vlgmr.msra.gmra.mrb[0].mxu0 %vm282_vm0, %v6500_v56  ;;  %4071 = vmatmul.mubr.msk.f32.vlgmr.msra.gmra.mrb[0].mxu1 %vm282_vm0, %v1173_v60  ;;  %v4089_v56 = vld [vmem:[%s8401_s5 + $0x1a8] sm:$0xff]  ;;  %v817_v54 = vshrl.u32 %v816_v53, 7 }
  0xed   :  { %5038 = vmatpush1.bf16.msra.mxu0 %v5037_v61  ;;  %5158 = vmatpush1.bf16.msra.mxu1 %v5037_v61  ;;  %v5047_v11 = vpack.c.bf16 %v4091_v9, %v4089_v56 }
  0xee   :  { %5040 = vmatprep.subr.bf16.mxu0 %v5039_v62  ;;  %5160 = vmatprep.subr.bf16.mxu1 %v5039_v62  ;;  %v6870_v31 = vsub.s32 0, %v817_v54  ;;  %v6875_v59 = vsub.s32 1, %v817_v54 }
  0xf0   :  { %v819_v60 = vrot.slane %v102_v55, %v6870_v31  ;;  %v823_v61 = vrot.slane %v102_v55, %v6875_v59 }
  0xf1   :  { %5042 = vmatpush1.bf16.msra.mxu0 %v5041_v4  ;;  %5162 = vmatpush1.bf16.msra.mxu1 %v5041_v4 }
  0xf2   :  { %5044 = vmatprep.subr.bf16.mxu0 %v5043_v5  ;;  %5164 = vmatprep.subr.bf16.mxu1 %v5043_v5 }
  0xf5   :  { %5046 = vmatpush1.bf16.msra.mxu0 %v5045_v10  ;;  %5166 = vmatpush1.bf16.msra.mxu1 %v5045_v10 }
  0xf6   :  { %5048 = vmatprep.subr.bf16.mxu0 %v5047_v11  ;;  %5168 = vmatprep.subr.bf16.mxu1 %v5047_v11 }
  0xf9   :  { %5050 = vmatpush1.bf16.msra.mxu0 %v5049_v15  ;;  %5170 = vmatpush1.bf16.msra.mxu1 %v5049_v15 }
  0xfa   :  { %5052 = vmatprep.subr.bf16.mxu0 %v5051_v16  ;;  %5172 = vmatprep.subr.bf16.mxu1 %v5051_v16 }
  0xfd   :  { %5054 = vmatpush1.bf16.msra.mxu0 %v5053_v21  ;;  %5174 = vmatpush1.bf16.msra.mxu1 %v5053_v21 }
  0xfe   :  { %5056 = vmatprep.subr.bf16.mxu0 %v5055_v22  ;;  %5176 = vmatprep.subr.bf16.mxu1 %v5055_v22 }
 0x101   :  { %5058 = vmatpush1.bf16.msra.mxu0 %v5057_v25  ;;  %5178 = vmatpush1.bf16.msra.mxu1 %v5057_v25 }
 0x102   :  { %5060 = vmatprep.subr.bf16.mxu0 %v5059_v28  ;;  %5180 = vmatprep.subr.bf16.mxu1 %v5059_v28  ;;  %v1385_v28 = vld [vmem:[%s8401_s5 + $0x10] sm:$0xff] }
 0x105   :  { %5062 = vmatpush1.bf16.msra.mxu0 %v5061_v32  ;;  %5182 = vmatpush1.bf16.msra.mxu1 %v5061_v32  ;;  %v1387_v32 = vld [vmem:[%s8401_s5 + $0x20] sm:$0xff] }
 0x106   :  { %5064 = vmatprep.subr.bf16.mxu0 %v5063_v35  ;;  %5184 = vmatprep.subr.bf16.mxu1 %v5063_v35  ;;  %v5077_v35 = vpack.c.bf16 %v1385_v28, %v1383_v27  ;;  %v5081_v43 = vpack.c.bf16 %v1389_v33, %v1387_v32  ;;  %v1418_v27 = vld [vmem:[%s8401_s5 + $0x118] sm:$0xff]  ;;  %v1417_v32 = vld [vmem:[%s8401_s5 + $0x110] sm:$0xff]  ;;  %v1420_v33 = vld [vmem:[%s8401_s5 + $0x128] sm:$0xff] }
 0x109   :  { %5066 = vmatpush1.bf16.msra.mxu0 %v5065_v38  ;;  %5186 = vmatpush1.bf16.msra.mxu1 %v5065_v38 }
 0x10a   :  { %5068 = vmatprep.subr.bf16.mxu0 %v5067_v41  ;;  %5188 = vmatprep.subr.bf16.mxu1 %v5067_v41  ;;  %v1391_v41 = vld [vmem:[%s8401_s5 + $0x40] sm:$0xff] }
 0x10b   :  { %v5085_v53 = vpack.c.bf16 %v1393_v42, %v1391_v41  ;;  %v4127_v41 = vld [vmem:[%s8401_s5 + $0x298] sm:$0xff] }
 0x10d   :  { %5070 = vmatpush1.bf16.msra.mxu0 %v5069_v44  ;;  %5190 = vmatpush1.bf16.msra.mxu1 %v5069_v44  ;;  %v1396_v44 = vld [vmem:[%s8401_s5 + $0x68] sm:$0xff] }
 0x10e   :  { %5072 = vmatprep.subr.bf16.mxu0 %v5071_v48  ;;  %5192 = vmatprep.subr.bf16.mxu1 %v5071_v48  ;;  %v5087_v55 = vpack.c.bf16 %v1398_v47, %v1396_v44  ;;  %v4124_v44 = vld [vmem:[%s8401_s5 + $0x280] sm:$0xff]  ;;  %v4131_v47 = vld [vmem:[%s8401_s5 + $0x2b8] sm:$0xff] }
 0x111   :  { %5074 = vmatpush1.bf16.msra.mxu0 %v5073_v58  ;;  %5194 = vmatpush1.bf16.msra.mxu1 %v5073_v58 }
 0x112   :  { %5076 = vmatprep.subr.bf16.mxu0 %v5075_v52  ;;  %5196 = vmatprep.subr.bf16.mxu1 %v5075_v52 }
 0x1bf   :  { %v808_v62 = vpop.f32.mrb[0].mxu0  ;;  %v1315_v0 = vpop.f32.mrb[0].mxu1 }
 0x1c0   :  { %v826_v1 = vadd.f32 %v819_v60, %v808_v62  ;;  %v1322_v3 = vadd.f32 %v1315_v0, %v819_v60  ;;  %v810_v4 = vpop.f32.mrb[1].mxu0  ;;  %v1317_v5 = vpop.f32.mrb[1].mxu1  ;;  %v1397_v62 = vld [vmem:[%s8401_s5 + $0x70] sm:$0xff]  ;;  %v1400_v0 = vld [vmem:[%s8401_s5 + $0x88] sm:$0xff] }
 0x1c1   :  { %v827_v6 = vadd.f32 %v823_v61, %v810_v4  ;;  %v1323_v8 = vadd.f32 %v1317_v5, %v823_v61  ;;  %v1395_v61 = vld [vmem:[%s8401_s5 + $0x60] sm:$0xff] }
 0x1c2   :  { %vm1324_vm5 = vcmp.gt.f32.partialorder %v826_v1, 0.0  ;;  %v1327_v56 = vmul.f32 %v1326_v63, %v826_v1  ;;  %vm1331_vm6 = vcmp.gt.f32.partialorder %v1322_v3, 0.0  ;;  %v1333_v9 = vmul.f32 %v1326_v63, %v1322_v3 }
 0x1c3   :  { %vm1325_vm7 = vcmp.gt.f32.partialorder %v827_v6, 0.0  ;;  %v1328_v10 = vmul.f32 %v1326_v63, %v827_v6  ;;  %vm1332_vm8 = vcmp.gt.f32.partialorder %v1323_v8, 0.0  ;;  %v1334_v11 = vmul.f32 %v1326_v63, %v1323_v8 }
 0x1c4   :  { %v1329_v12 = vsel %vm1324_vm5, %v826_v1, %v1327_v56  ;;  %v1335_v13 = vsel %vm1331_vm6, %v1322_v3, %v1333_v9  ;;  %v1402_v1 = vld [vmem:[%s8401_s5 + $0x98] sm:$0xff]  ;;  %v5089_v5 = vpack.c.bf16 %v1397_v62, %v1395_v61  ;;  %v1401_v56 = vld [vmem:[%s8401_s5 + $0x90] sm:$0xff]  ;;  %v1404_v9 = vld [vmem:[%s8401_s5 + $0xa8] sm:$0xff]  ;;  %vm2444_vm5 = vcmask 785408  }
 0x1c5   :  { %v1330_v14 = vsel %vm1325_vm7, %v827_v6, %v1328_v10  ;;  %v1336_v2 = vsel %vm1332_vm8, %v1323_v8, %v1334_v11  ;;  %v5091_v6 = vpack.c.bf16 %v1402_v1, %v1400_v0  ;;  %v1399_v8 = vld [vmem:[%s8401_s5 + $0x80] sm:$0xff]  ;;  %v1406_v10 = vld [vmem:[%s8401_s5 + $0xb8] sm:$0xff]  ;;  %v4134_v1 = vld [vmem:[%s8401_s5 + $0x2d0] sm:$0xff]  ;;  %vm91_vm6 = vcmask 782336  }
 0x1c6   :  { %v1339_v15 = vcombine.low %v1329_v12, %v1330_v14  ;;  %v1340_v16 = vcombine.high %v1329_v12, %v1330_v14  ;;  %v4072_v17 = vcombine.low %v1330_v14, %v1330_v14  ;;  %v4073_v18 = vcombine.high %v1330_v14, %v1330_v14  ;;  %v1405_v14 = vld [vmem:[%s8401_s5 + $0xb0] sm:$0xff]  ;;  %v4132_v0 = vld [vmem:[%s8401_s5 + $0x2c0] sm:$0xff]  ;;  %92 = vst.msk [vmem:[#allocation5] sm:$0x1f] %vm91_vm6, %v5880_v7 }
 0x1c7   :  { %v1355_v19 = vcombine.low %v1335_v13, %v1336_v2  ;;  %v1356_v20 = vcombine.high %v1335_v13, %v1336_v2  ;;  %v4074_v21 = vcombine.low %v1336_v2, %v1336_v2  ;;  %v4075_v22 = vcombine.high %v1336_v2, %v1336_v2  ;;  %v1403_v13 = vld [vmem:[%s8401_s5 + $0xa0] sm:$0xff]  ;;  %v1408_v2 = vld [vmem:[%s8401_s5 + $0xc8] sm:$0xff]  ;;  %v5807_v61 = vld [vmem:[#allocation2 + $0x34] ss:$8 sps:$4 sm:$0x11]  }
 0x1c8   :  { %1348 = vst [vmem:[#allocation2 + $0x20] sm:$0xf] %v1339_v15  ;;  %1350 = vst.msk [vmem:[#allocation2 + $0x28] sm:$0xf] %vm1349_vm9, %v4072_v17  ;;  %v5093_v11 = vpack.c.bf16 %v1401_v56, %v1399_v8  ;;  %v5095_v12 = vpack.c.bf16 %v1406_v10, %v1404_v9  ;;  %v1410_v15 = vld [vmem:[%s8401_s5 + $0xd8] sm:$0xff]  ;;  %v1938_v56 = vrot.slane %v5807_v61, 5  ;;  %v5125_v10 = vpack.c.bf16 %v4134_v1, %v4132_v0 }
 0x1c9   :  { %1351 = vst [vmem:[#allocation2 + $0x30] sm:$0xf] %v1340_v16  ;;  %1352 = vst.msk [vmem:[#allocation2 + $0x38] sm:$0xf] %vm1349_vm9, %v4073_v18  ;;  %v1359_v23 = vrot.slane %v1355_v19, 7  ;;  %v1360_v24 = vrot.slane %v4074_v21, 7  ;;  %v5097_v16 = vpack.c.bf16 %v1405_v14, %v1403_v13  ;;  %v5099_v17 = vpack.c.bf16 %v1410_v15, %v1408_v2 }
 0x1ca   :  { %v1361_v25 = vrot.slane %v1356_v20, 7  ;;  %v1362_v26 = vrot.slane %v4075_v22, 7  ;;  %v1407_v18 = vld [vmem:[%s8401_s5 + $0xc0] sm:$0xff]  ;;  %v1409_v19 = vld [vmem:[%s8401_s5 + $0xd0] sm:$0xff]  ;;  %v1412_v20 = vld [vmem:[%s8401_s5 + $0xe8] sm:$0xff] }
 0x1cb   :  { %1367 = vst [vmem:[#allocation2] sm:$0x1e] %v1359_v23  ;;  %1369 = vst.msk [vmem:[#allocation2 + $0x8] sm:$0x1e] %vm1368_vm10, %v1360_v24  ;;  %v1414_v21 = vld [vmem:[%s8401_s5 + $0xf8] sm:$0xff]  ;;  %v5101_v22 = vpack.c.bf16 %v1409_v19, %v1407_v18  ;;  %v1411_v24 = vld [vmem:[%s8401_s5 + $0xe0] sm:$0xff] }
 0x1cc   :  { %1370 = vst [vmem:[#allocation2 + $0x10] sm:$0x1e] %v1361_v25  ;;  %1371 = vst.msk [vmem:[#allocation2 + $0x18] sm:$0x1e] %vm1368_vm10, %v1362_v26  ;;  %v5103_v23 = vpack.c.bf16 %v1414_v21, %v1412_v20  ;;  %v1413_v25 = vld [vmem:[%s8401_s5 + $0xf0] sm:$0xff]  ;;  %v1416_v26 = vld [vmem:[%s8401_s5 + $0x108] sm:$0xff] }
 0x1cd   :  { %v5105_v28 = vpack.c.bf16 %v1413_v25, %v1411_v24  ;;  %v5107_v29 = vpack.c.bf16 %v1418_v27, %v1416_v26  ;;  %v4137_v9 = vld [vmem:[%s8401_s5 + $0x2e8] sm:$0xff]  ;;  %v4138_v13 = vld [vmem:[%s8401_s5 + $0x2f0] sm:$0xff]  ;;  %v4140_v20 = vld [vmem:[%s8401_s5 + $0x300] sm:$0xff]  ;;  %93 = vst.msk [vmem:[#allocation5 + $0x8] sm:$0x1f] %vm91_vm6, %v5880_v7 }
 0x1ce   :  { %v4141_v15 = vld [vmem:[%s8401_s5 + $0x308] sm:$0xff]  ;;  %v4142_v21 = vld [vmem:[%s8401_s5 + $0x310] sm:$0xff]  ;;  %v4178_v0 = vld [vmem:[%s8403_s7 + $0xc0] sm:$0xff] }
 0x1cf   :  { %v5133_v24 = vpack.c.bf16 %v4142_v21, %v4140_v20  ;;  %v4146_v26 = vld [vmem:[%s8401_s5 + $0x330] sm:$0xff]  ;;  %v4149_v27 = vld [vmem:[%s8401_s5 + $0x348] sm:$0xff]  ;;  %v4185_v20 = vld [vmem:[%s8403_s7 + $0xf8] sm:$0xff] }
 0x1d0   :  { %v5792_v34 = vld [vmem:[#allocation2 + $0x28] ss:$16 sps:$4 sm:$0xff]   ;;  %v6907_v38 = vld [vmem:[#allocation2 + $0x20] ss:$16 sps:$4 sm:$0xff]  }
 0x1d1   :  { %4118 = vmatprep.mubr.msk.f32.mxu0 %vm282_vm0, %v5792_v34  ;;  %v4176_v61 = vld [vmem:[%s8403_s7 + $0xb0] sm:$0xff]  ;;  %v4179_v1 = vld [vmem:[%s8403_s7 + $0xc8] sm:$0xff] }
 0x1d2   :  { %1544 = vmatmul.mubr.f32.vlgmr.msra.gmra.mrb[2].mxu0 %v6907_v38  ;;  %v5795_v45 = vld [vmem:[#allocation2] ss:$8 sps:$4 sm:$0xee]   ;;  %v5797_v48 = vld [vmem:[#allocation2 + $0x4] ss:$8 sps:$4 sm:$0x11]  }
 0x1d3   :  { %v5794_v40 = vld [vmem:[#allocation2 + $0x8] ss:$16 sps:$4 sm:$0xff]   ;;  %5078 = vmatpush1.bf16.msra.mxu0 %v5077_v35  ;;  %v5800_v58 = vld [vmem:[#allocation2 + $0x14] ss:$8 sps:$4 sm:$0x11]   ;;  %v4122_v50 = vrot.slane %v5795_v45, 9 }
 0x1d4   :  { %4121 = vmatprep.mubr.msk.f32.mxu0 %vm282_vm0, %v5794_v40  ;;  %5080 = vmatprep.subr.bf16.mxu0 %v5079_v39  ;;  %v5798_v57 = vld [vmem:[#allocation2 + $0x10] ss:$8 sps:$4 sm:$0xee]   ;;  %v1640_v51 = vrot.slane %v5797_v48, 5  ;;  %v1644_v54 = vrot.slane %v5800_v58, 5  ;;  %v4125_v40 = vld [vmem:[%s8401_s5 + $0x288] sm:$0xff] }
 0x1d5   :  { %v4123_v52 = vrot.slane %v5798_v57, 9  ;;  %v4126_v45 = vld [vmem:[%s8401_s5 + $0x290] sm:$0xff]  ;;  %v4128_v48 = vld [vmem:[%s8401_s5 + $0x2a0] sm:$0xff] }
 0x1d6   :  { %v1641_v60 = vsel %vm6476_vm3, %v4122_v50, %v1640_v51  ;;  %v4130_v57 = vld [vmem:[%s8401_s5 + $0x2b0] sm:$0xff]  ;;  %v5117_v50 = vpack.c.bf16 %v4126_v45, %v4124_v44  ;;  %v4133_v51 = vld [vmem:[%s8401_s5 + $0x2c8] sm:$0xff]  ;;  %v4156_v45 = vld [vmem:[%s8401_s5 + $0x380] sm:$0xff] }
 0x1d7   :  { %5082 = vmatpush1.bf16.msra.mxu0 %v5081_v43  ;;  %v1645_v63 = vsel %vm6476_vm3, %v4123_v52, %v1644_v54  ;;  %v5801_v58 = vld [vmem:[#allocation2] ss:$16 sps:$4 sm:$0xff]   ;;  %v4135_v52 = vld [vmem:[%s8401_s5 + $0x2d8] sm:$0xff]  ;;  %v5121_v62 = vpack.c.bf16 %v4130_v57, %v4128_v48 }
 0x1d8   :  { %5084 = vmatprep.subr.bf16.mxu0 %v5083_v46  ;;  %v6940_v3 = vcombine.high %v1641_v60, %v1645_v63  ;;  %v6942_v4 = vcombine.low %v1641_v60, %v1645_v63  ;;  %v5802_v54 = vld [vmem:[#allocation2 + $0x20] ss:$8 sps:$4 sm:$0xee]   ;;  %v5805_v60 = vld [vmem:[#allocation2 + $0x30] ss:$8 sps:$4 sm:$0xee]   ;;  %v5123_v63 = vpack.c.bf16 %v4135_v52, %v4133_v51 }
 0x1d9   :  { %v4168_v8 = vrot.slane %v5805_v60, 9  ;;  %v4163_v48 = vld [vmem:[%s8401_s5 + $0x3b8] sm:$0xff]  ;;  %v4162_v51 = vld [vmem:[%s8401_s5 + $0x3b0] sm:$0xff]  ;;  %v5881_v60 = vmov 0.0|0.0  }
 0x1da   :  { %4165 = vmatprep.mubr.msk.f32.mxu1 %vm282_vm0, %v6940_v3 }
 0x1db   :  { %5086 = vmatpush1.bf16.msra.mxu0 %v5085_v53  ;;  %1843 = vmatmul.mubr.f32.vlgmr.msra.gmra.mrb[2].mxu1 %v6942_v4  ;;  %v7070_v2 = vsel %vm6476_vm3, %v4168_v8, %v1938_v56  ;;  %v4180_v8 = vld [vmem:[%s8403_s7 + $0xd0] sm:$0xff]  ;;  %v4181_v56 = vld [vmem:[%s8403_s7 + $0xd8] sm:$0xff] }
 0x1dc   :  { %5088 = vmatprep.subr.bf16.mxu0 %v5087_v55  ;;  %5198 = vmatpush1.bf16.msra.mxu1 %v5077_v35  ;;  %v5109_v35 = vpack.c.bf16 %v1417_v32, %v1415_v30  ;;  %v4148_v32 = vld [vmem:[%s8401_s5 + $0x340] sm:$0xff] }
 0x1dd   :  { %4166 = vmatprep.mubr.msk.f32.mxu1 %vm282_vm0, %v5792_v34  ;;  %5200 = vmatprep.subr.bf16.mxu1 %v5079_v39  ;;  %v1422_v34 = vld [vmem:[%s8401_s5 + $0x138] sm:$0xff]  ;;  %v1421_v39 = vld [vmem:[%s8401_s5 + $0x130] sm:$0xff] }
 0x1de   :  { %v5111_v36 = vpack.c.bf16 %v1422_v34, %v1420_v33  ;;  %v5113_v42 = vpack.c.bf16 %v1421_v39, %v1419_v37  ;;  %v4150_v33 = vld [vmem:[%s8401_s5 + $0x350] sm:$0xff]  ;;  %v4153_v34 = vld [vmem:[%s8401_s5 + $0x368] sm:$0xff]  ;;  %v4152_v39 = vld [vmem:[%s8401_s5 + $0x360] sm:$0xff] }
 0x1df   :  { %5090 = vmatpush1.bf16.msra.mxu0 %v5089_v5 }
 0x1e0   :  { %5092 = vmatprep.subr.bf16.mxu0 %v5091_v6  ;;  %5202 = vmatpush1.bf16.msra.mxu1 %v5081_v43  ;;  %v5115_v43 = vpack.c.bf16 %v4127_v41, %v4125_v40  ;;  %v4154_v40 = vld [vmem:[%s8401_s5 + $0x370] sm:$0xff]  ;;  %v4157_v41 = vld [vmem:[%s8401_s5 + $0x388] sm:$0xff] }
 0x1e1   :  { %5204 = vmatprep.subr.bf16.mxu1 %v5083_v46  ;;  %v4129_v46 = vld [vmem:[%s8401_s5 + $0x2a8] sm:$0xff] }
 0x1e3   :  { %5094 = vmatpush1.bf16.msra.mxu0 %v5093_v11 }
 0x1e4   :  { %5096 = vmatprep.subr.bf16.mxu0 %v5095_v12  ;;  %5206 = vmatpush1.bf16.msra.mxu1 %v5085_v53  ;;  %v5119_v53 = vpack.c.bf16 %v4131_v47, %v4129_v46  ;;  %v4158_v46 = vld [vmem:[%s8401_s5 + $0x390] sm:$0xff]  ;;  %v4161_v47 = vld [vmem:[%s8401_s5 + $0x3a8] sm:$0xff] }
 0x1e5   :  { %5208 = vmatprep.subr.bf16.mxu1 %v5087_v55  ;;  %v5804_v55 = vld [vmem:[#allocation2 + $0x24] ss:$8 sps:$4 sm:$0x11]   ;;  %v5149_v57 = vpack.c.bf16 %v4158_v46, %v4156_v45  ;;  %v4193_v45 = vld [vmem:[%s8403_s7 + $0x138] sm:$0xff] }
 0x1e7   :  { %5098 = vmatpush1.bf16.msra.mxu0 %v5097_v16 }
 0x1e8   :  { %5100 = vmatprep.subr.bf16.mxu0 %v5099_v17  ;;  %5210 = vmatpush1.bf16.msra.mxu1 %v5089_v5  ;;  %v4167_v5 = vrot.slane %v5802_v54, 9  ;;  %v4175_v54 = vld [vmem:[%s8403_s7 + $0xa8] sm:$0xff] }
 0x1e9   :  { %5212 = vmatprep.subr.bf16.mxu1 %v5091_v6  ;;  %v1934_v6 = vrot.slane %v5804_v55, 5 }
 0x1eb   :  { %5102 = vmatpush1.bf16.msra.mxu0 %v5101_v22  ;;  %v7066_v14 = vsel %vm6476_vm3, %v4167_v5, %v1934_v6  ;;  %v5282_v5 = vpack.c.bf16 %v4179_v1, %v4178_v0  ;;  %v2077_v6 = vld [vmem:[%s8403_s7 + $0x8] sm:$0xff]  ;;  %v7298_v0 = vstv %s3891_s29 }
 0x1ec   :  { %5104 = vmatprep.subr.bf16.mxu0 %v5103_v23  ;;  %5214 = vmatpush1.bf16.msra.mxu1 %v5093_v11  ;;  %v1941_v18 = vcombine.high %v7066_v14, %v7070_v2 }
 0x1ed   :  { %5216 = vmatprep.subr.bf16.mxu1 %v5095_v12  ;;  %v4136_v12 = vld [vmem:[%s8401_s5 + $0x2e0] sm:$0xff] }
 0x1ef   :  { %5106 = vmatpush1.bf16.msra.mxu0 %v5105_v28 }
 0x1f0   :  { %5108 = vmatprep.subr.bf16.mxu0 %v5107_v29  ;;  %5218 = vmatpush1.bf16.msra.mxu1 %v5097_v16  ;;  %v4143_v16 = vld [vmem:[%s8401_s5 + $0x318] sm:$0xff] }
 0x1f1   :  { %5220 = vmatprep.subr.bf16.mxu1 %v5099_v17  ;;  %v5129_v17 = vpack.c.bf16 %v4138_v13, %v4136_v12  ;;  %v5131_v19 = vpack.c.bf16 %v4143_v16, %v4141_v15  ;;  %v2079_v12 = vld [vmem:[%s8403_s7 + $0x18] sm:$0xff]  ;;  %v4182_v13 = vld [vmem:[%s8403_s7 + $0xe0] sm:$0xff] }
 0x1f2   :  { %v2080_v16 = vld [vmem:[%s8403_s7 + $0x20] sm:$0xff] }
 0x1f3   :  { %5110 = vmatpush1.bf16.msra.mxu0 %v5109_v35 }
 0x1f4   :  { %5112 = vmatprep.subr.bf16.mxu0 %v5111_v36  ;;  %5222 = vmatpush1.bf16.msra.mxu1 %v5101_v22  ;;  %v4145_v22 = vld [vmem:[%s8401_s5 + $0x328] sm:$0xff] }
 0x1f5   :  { %5224 = vmatprep.subr.bf16.mxu1 %v5103_v23  ;;  %v4147_v23 = vld [vmem:[%s8401_s5 + $0x338] sm:$0xff] }
 0x1f6   :  { %v5135_v25 = vpack.c.bf16 %v4147_v23, %v4145_v22  ;;  %v2082_v22 = vld [vmem:[%s8403_s7 + $0x30] sm:$0xff]  ;;  %v2083_v23 = vld [vmem:[%s8403_s7 + $0x38] sm:$0xff] }
 0x1f7   :  { %5114 = vmatpush1.bf16.msra.mxu0 %v5113_v42 }
 0x1f8   :  { %5116 = vmatprep.subr.bf16.mxu0 %v5115_v43  ;;  %5226 = vmatpush1.bf16.msra.mxu1 %v5105_v28  ;;  %v4151_v28 = vld [vmem:[%s8401_s5 + $0x358] sm:$0xff] }
 0x1f9   :  { %5228 = vmatprep.subr.bf16.mxu1 %v5107_v29  ;;  %v5139_v30 = vpack.c.bf16 %v4151_v28, %v4149_v27  ;;  %v2085_v28 = vld [vmem:[%s8403_s7 + $0x48] sm:$0xff] }
 0x1fa   :  { %1620 = vmatmul.mubr.f32.vlgmr.msra.gmra.mrb[2].mxu0 %v5801_v58  ;;  %v5151_v58 = vpack.c.bf16 %v4163_v48, %v4161_v47  ;;  %v2090_v47 = vld [vmem:[%s8403_s7 + $0x70] sm:$0xff]  ;;  %v2091_v48 = vld [vmem:[%s8403_s7 + $0x78] sm:$0xff] }
 0x1fb   :  { %5118 = vmatpush1.bf16.msra.mxu0 %v5117_v50  ;;  %4164 = vmatprep.mubr.msk.f32.mxu0 %vm282_vm0, %v6940_v3  ;;  %v4139_v3 = vld [vmem:[%s8401_s5 + $0x2f8] sm:$0xff] }
 0x1fc   :  { %5120 = vmatprep.subr.bf16.mxu0 %v5119_v53  ;;  %5230 = vmatpush1.bf16.msra.mxu1 %v5109_v35  ;;  %v5127_v11 = vpack.c.bf16 %v4139_v3, %v4137_v9  ;;  %v4155_v35 = vld [vmem:[%s8401_s5 + $0x378] sm:$0xff]  ;;  %v1940_v3 = vcombine.low %v7066_v14, %v7070_v2  ;;  %v4183_v14 = vld [vmem:[%s8403_s7 + $0xe8] sm:$0xff] }
 0x1fd   :  { %5232 = vmatprep.subr.bf16.mxu1 %v5111_v36  ;;  %v5141_v36 = vpack.c.bf16 %v4150_v33, %v4148_v32  ;;  %v5143_v37 = vpack.c.bf16 %v4155_v35, %v4153_v34  ;;  %v5288_v15 = vpack.c.bf16 %v4183_v14, %v4182_v13  ;;  %v4189_v32 = vld [vmem:[%s8403_s7 + $0x118] sm:$0xff]  ;;  %v2086_v34 = vld [vmem:[%s8403_s7 + $0x50] sm:$0xff] }
 0x1fe   :  { %v2087_v35 = vld [vmem:[%s8403_s7 + $0x58] sm:$0xff] }
 0x1ff   :  { %5122 = vmatpush1.bf16.msra.mxu0 %v5121_v62 }
 0x200   :  { %5124 = vmatprep.subr.bf16.mxu0 %v5123_v63  ;;  %5234 = vmatpush1.bf16.msra.mxu1 %v5113_v42  ;;  %v4159_v42 = vld [vmem:[%s8401_s5 + $0x398] sm:$0xff] }
 0x201   :  { %5236 = vmatprep.subr.bf16.mxu1 %v5115_v43  ;;  %v5145_v43 = vpack.c.bf16 %v4154_v40, %v4152_v39  ;;  %v5147_v44 = vpack.c.bf16 %v4159_v42, %v4157_v41  ;;  %v4191_v39 = vld [vmem:[%s8403_s7 + $0x128] sm:$0xff]  ;;  %v2088_v41 = vld [vmem:[%s8403_s7 + $0x60] sm:$0xff] }
 0x202   :  { %v2089_v42 = vld [vmem:[%s8403_s7 + $0x68] sm:$0xff] }
 0x203   :  { %5126 = vmatpush1.bf16.msra.mxu0 %v5125_v10  ;;  %1914 = vmatmul.mubr.f32.vlgmr.msra.gmra.mrb[2].mxu1 %v6907_v38  ;;  %v4144_v38 = vld [vmem:[%s8401_s5 + $0x320] sm:$0xff] }
 0x204   :  { %5128 = vmatprep.subr.bf16.mxu0 %v5127_v11  ;;  %5238 = vmatpush1.bf16.msra.mxu1 %v5117_v50  ;;  %v5137_v29 = vpack.c.bf16 %v4146_v26, %v4144_v38  ;;  %v4160_v50 = vld [vmem:[%s8401_s5 + $0x3a0] sm:$0xff]  ;;  %v4187_v38 = vld [vmem:[%s8403_s7 + $0x108] sm:$0xff] }
 0x205   :  { %4169 = vmatprep.mubr.msk.f32.mxu1 %vm282_vm0, %v1941_v18  ;;  %5240 = vmatprep.subr.bf16.mxu1 %v5119_v53  ;;  %v5153_v52 = vpack.c.bf16 %v4162_v51, %v4160_v50  ;;  %v4174_v53 = vld [vmem:[%s8403_s7 + $0xa0] sm:$0xff]  ;;  %v2093_v50 = vld [vmem:[%s8403_s7 + $0x88] sm:$0xff] }
 0x206   :  { %v5276_v55 = vpack.c.bf16 %v4175_v54, %v4174_v53  ;;  %v2084_v26 = vld [vmem:[%s8403_s7 + $0x40] sm:$0xff]  ;;  %v2095_v53 = vld [vmem:[%s8403_s7 + $0x98] sm:$0xff] }
 0x207   :  { %5130 = vmatpush1.bf16.msra.mxu0 %v5129_v17 }
 0x208   :  { %5132 = vmatprep.subr.bf16.mxu0 %v5131_v19  ;;  %5242 = vmatpush1.bf16.msra.mxu1 %v5121_v62  ;;  %v4177_v62 = vld [vmem:[%s8403_s7 + $0xb8] sm:$0xff] }
 0x209   :  { %5244 = vmatprep.subr.bf16.mxu1 %v5123_v63  ;;  %v5279_v63 = vpack.c.bf16 %v4177_v62, %v4176_v61 }
 0x20b   :  { %5134 = vmatpush1.bf16.msra.mxu0 %v5133_v24 }
 0x20c   :  { %5136 = vmatprep.subr.bf16.mxu0 %v5135_v25  ;;  %5246 = vmatpush1.bf16.msra.mxu1 %v5125_v10  ;;  %v5285_v10 = vpack.c.bf16 %v4181_v56, %v4180_v8 }
 0x20d   :  { %5248 = vmatprep.subr.bf16.mxu1 %v5127_v11  ;;  %v2078_v11 = vld [vmem:[%s8403_s7 + $0x10] sm:$0xff] }
 0x20e   :  { %v5309_v2 = vpack.c.bf16 %v2079_v12, %v2078_v11 }
 0x20f   :  { %5138 = vmatpush1.bf16.msra.mxu0 %v5137_v29 }
 0x210   :  { %5140 = vmatprep.subr.bf16.mxu0 %v5139_v30  ;;  %5250 = vmatpush1.bf16.msra.mxu1 %v5129_v17  ;;  %v2081_v17 = vld [vmem:[%s8403_s7 + $0x28] sm:$0xff] }
 0x211   :  { %5252 = vmatprep.subr.bf16.mxu1 %v5131_v19  ;;  %v5312_v18 = vpack.c.bf16 %v2081_v17, %v2080_v16  ;;  %v4184_v19 = vld [vmem:[%s8403_s7 + $0xf0] sm:$0xff]  ;;  %v4202_v16 = vld [vmem:[%s8403_s7 + $0x140] sm:$0xff]  ;;  %v4203_v17 = vld [vmem:[%s8403_s7 + $0x148] sm:$0xff] }
 0x212   :  { %v5291_v21 = vpack.c.bf16 %v4185_v20, %v4184_v19  ;;  %v4204_v20 = vld [vmem:[%s8403_s7 + $0x150] sm:$0xff] }
 0x213   :  { %5142 = vmatpush1.bf16.msra.mxu0 %v5141_v36 }
 0x214   :  { %5144 = vmatprep.subr.bf16.mxu0 %v5143_v37  ;;  %5254 = vmatpush1.bf16.msra.mxu1 %v5133_v24  ;;  %v5315_v24 = vpack.c.bf16 %v2083_v23, %v2082_v22 }
 0x215   :  { %5256 = vmatprep.subr.bf16.mxu1 %v5135_v25  ;;  %v4186_v25 = vld [vmem:[%s8403_s7 + $0x100] sm:$0xff] }
 0x216   :  { %v5294_v27 = vpack.c.bf16 %v4187_v38, %v4186_v25 }
 0x217   :  { %5146 = vmatpush1.bf16.msra.mxu0 %v5145_v43 }
 0x218   :  { %5148 = vmatprep.subr.bf16.mxu0 %v5147_v44  ;;  %5258 = vmatpush1.bf16.msra.mxu1 %v5137_v29  ;;  %v5318_v29 = vpack.c.bf16 %v2085_v28, %v2084_v26 }
 0x219   :  { %5260 = vmatprep.subr.bf16.mxu1 %v5139_v30  ;;  %v4188_v30 = vld [vmem:[%s8403_s7 + $0x110] sm:$0xff] }
 0x21a   :  { %v5297_v33 = vpack.c.bf16 %v4189_v32, %v4188_v30 }
 0x21b   :  { %5150 = vmatpush1.bf16.msra.mxu0 %v5149_v57 }
 0x21c   :  { %5152 = vmatprep.subr.bf16.mxu0 %v5151_v58  ;;  %5262 = vmatpush1.bf16.msra.mxu1 %v5141_v36  ;;  %v5321_v36 = vpack.c.bf16 %v2087_v35, %v2086_v34 }
 0x21d   :  { %5264 = vmatprep.subr.bf16.mxu1 %v5143_v37  ;;  %v4190_v37 = vld [vmem:[%s8403_s7 + $0x120] sm:$0xff] }
 0x21e   :  { %v5300_v40 = vpack.c.bf16 %v4191_v39, %v4190_v37  ;;  %v4207_v37 = vld [vmem:[%s8403_s7 + $0x168] sm:$0xff] }
 0x21f   :  { %5154 = vmatpush1.bf16.msra.mxu0 %v5153_v52 }
 0x220   :  { %5275 = vmatprep.subr.bf16.mxu0 %v5881_v60  ;;  %5266 = vmatpush1.bf16.msra.mxu1 %v5145_v43  ;;  %v5324_v43 = vpack.c.bf16 %v2089_v42, %v2088_v41  ;;  %v4209_v41 = vld [vmem:[%s8403_s7 + $0x178] sm:$0xff] }
 0x221   :  { %5268 = vmatprep.subr.bf16.mxu1 %v5147_v44  ;;  %v4192_v44 = vld [vmem:[%s8403_s7 + $0x130] sm:$0xff] }
 0x222   :  { %1757 = vmatmul.mubr.f32.vlgmr.msra.gmra.mrb[2].mxu0 %v6942_v4  ;;  %v2076_v4 = vld [vmem:[%s8403_s7] sm:$0xff]  ;;  %v5303_v46 = vpack.c.bf16 %v4193_v45, %v4192_v44  ;;  %v4211_v44 = vld [vmem:[%s8403_s7 + $0x188] sm:$0xff] }
 0x223   :  { %5277 = vmatpush1.bf16.msra.mxu0 %v5276_v55  ;;  %v5306_v9 = vpack.c.bf16 %v2077_v6, %v2076_v4  ;;  %v1372_v55 = vld [vmem:[%s8402_s6] sm:$0x3] }
 0x224   :  { %5278 = vmatprep.subr.bf16.mxu0 %v5881_v60  ;;  %5270 = vmatpush1.bf16.msra.mxu1 %v5149_v57  ;;  %v5327_v57 = vpack.c.bf16 %v2091_v48, %v2090_v47  ;;  %v1769_v61 = vrot.slane %v1372_v55, %v6870_v31  ;;  %v1773_v62 = vrot.slane %v1372_v55, %v6875_v59  ;;  %v4212_v47 = vld [vmem:[%s8403_s7 + $0x190] sm:$0xff] }
 0x225   :  { %5272 = vmatprep.subr.bf16.mxu1 %v5151_v58  ;;  %v2092_v58 = vld [vmem:[%s8403_s7 + $0x80] sm:$0xff] }
 0x226   :  { %v5330_v51 = vpack.c.bf16 %v2093_v50, %v2092_v58  ;;  %v4213_v58 = vld [vmem:[%s8403_s7 + $0x198] sm:$0xff] }
 0x227   :  { %5280 = vmatpush1.bf16.msra.mxu0 %v5279_v63 }
 0x228   :  { %5281 = vmatprep.subr.bf16.mxu0 %v5881_v60  ;;  %5274 = vmatpush1.bf16.msra.mxu1 %v5153_v52  ;;  %v2094_v52 = vld [vmem:[%s8403_s7 + $0x90] sm:$0xff] }
 0x229   :  { %5305 = vmatprep.subr.bf16.mxu1 %v5881_v60  ;;  %v5333_v54 = vpack.c.bf16 %v2095_v53, %v2094_v52 }
 0x22b   :  { %5283 = vmatpush1.bf16.msra.mxu0 %v5282_v5  ;;  %2010 = vmatmul.mubr.f32.vlgmr.msra.gmra.mrb[2].mxu1 %v1940_v3 }
 0x22c   :  { %5284 = vmatprep.subr.bf16.mxu0 %v5881_v60  ;;  %5307 = vmatpush1.bf16.msra.mxu1 %v5306_v9 }
 0x22d   :  { %5308 = vmatprep.subr.bf16.mxu1 %v5881_v60 }
 0x22f   :  { %5286 = vmatpush1.bf16.msra.mxu0 %v5285_v10 }
 0x230   :  { %5287 = vmatprep.subr.bf16.mxu0 %v5881_v60  ;;  %5310 = vmatpush1.bf16.msra.mxu1 %v5309_v2 }
 0x231   :  { %5311 = vmatprep.subr.bf16.mxu1 %v5881_v60 }
 0x233   :  { %5289 = vmatpush1.bf16.msra.mxu0 %v5288_v15 }
 0x234   :  { %5290 = vmatprep.subr.bf16.mxu0 %v5881_v60  ;;  %5313 = vmatpush1.bf16.msra.mxu1 %v5312_v18 }
 0x235   :  { %5314 = vmatprep.subr.bf16.mxu1 %v5881_v60 }
 0x237   :  { %5292 = vmatpush1.bf16.msra.mxu0 %v5291_v21  ;;  %v4205_v21 = vld [vmem:[%s8403_s7 + $0x158] sm:$0xff] }
 0x238   :  { %5293 = vmatprep.subr.bf16.mxu0 %v5881_v60  ;;  %5316 = vmatpush1.bf16.msra.mxu1 %v5315_v24  ;;  %v5336_v24 = vpack.c.bf16 %v4203_v17, %v4202_v16  ;;  %v5339_v30 = vpack.c.bf16 %v4205_v21, %v4204_v20  ;;  %v4224_v16 = vld [vmem:[%s8405_s9 + $0x60] sm:$0xff]  ;;  %v4225_v17 = vld [vmem:[%s8405_s9 + $0x68] sm:$0xff] }
 0x239   :  { %5317 = vmatprep.subr.bf16.mxu1 %v5881_v60  ;;  %v2415_v20 = vld [vmem:[%s8405_s9 + $0x8] sm:$0xff] }
 0x23b   :  { %5295 = vmatpush1.bf16.msra.mxu0 %v5294_v27 }
 0x23c   :  { %5296 = vmatprep.subr.bf16.mxu0 %v5881_v60  ;;  %5319 = vmatpush1.bf16.msra.mxu1 %v5318_v29 }
 0x23d   :  { %5320 = vmatprep.subr.bf16.mxu1 %v5881_v60 }
 0x23f   :  { %5298 = vmatpush1.bf16.msra.mxu0 %v5297_v33 }
 0x240   :  { %5299 = vmatprep.subr.bf16.mxu0 %v5881_v60  ;;  %5322 = vmatpush1.bf16.msra.mxu1 %v5321_v36  ;;  %v4206_v36 = vld [vmem:[%s8403_s7 + $0x160] sm:$0xff] }
 0x241   :  { %5323 = vmatprep.subr.bf16.mxu1 %v5881_v60  ;;  %v5342_v39 = vpack.c.bf16 %v4207_v37, %v4206_v36  ;;  %v2420_v36 = vld [vmem:[%s8405_s9 + $0x30] sm:$0xff] }
 0x243   :  { %5301 = vmatpush1.bf16.msra.mxu0 %v5300_v40  ;;  %v4208_v40 = vld [vmem:[%s8403_s7 + $0x170] sm:$0xff] }
 0x244   :  { %5302 = vmatprep.subr.bf16.mxu0 %v5881_v60  ;;  %5325 = vmatpush1.bf16.msra.mxu1 %v5324_v43  ;;  %v5345_v42 = vpack.c.bf16 %v4209_v41, %v4208_v40  ;;  %v4210_v43 = vld [vmem:[%s8403_s7 + $0x180] sm:$0xff] }
 0x245   :  { %5326 = vmatprep.subr.bf16.mxu1 %v5881_v60  ;;  %v4232_v41 = vld [vmem:[%s8405_s9 + $0xa0] sm:$0xff] }
 0x247   :  { %5304 = vmatpush1.bf16.msra.mxu0 %v5303_v46 }
 0x248   :  { %5335 = vmatprep.subr.bf16.mxu0 %v5881_v60  ;;  %5328 = vmatpush1.bf16.msra.mxu1 %v5327_v57  ;;  %v5348_v57 = vpack.c.bf16 %v4211_v44, %v4210_v43  ;;  %v2422_v43 = vld [vmem:[%s8405_s9 + $0x40] sm:$0xff]  ;;  %v2423_v44 = vld [vmem:[%s8405_s9 + $0x48] sm:$0xff] }
 0x249   :  { %5329 = vmatprep.subr.bf16.mxu1 %v5881_v60 }
 0x24c   :  { %5331 = vmatpush1.bf16.msra.mxu1 %v5330_v51 }
 0x24d   :  { %5332 = vmatprep.subr.bf16.mxu1 %v5881_v60 }
 0x250   :  { %5334 = vmatpush1.bf16.msra.mxu1 %v5333_v54 }
 0x251   :  { %5383 = vmatprep.subr.bf16.mxu1 %v5881_v60 }
 0x2f5   :  { %v1758_v63 = vpop.f32.mrb[2].mxu0 }
 0x2f6   :  { %v1776_v1 = vadd.f32 %v1769_v61, %v1758_v63  ;;  %v1760_v5 = vpop.f32.mrb[3].mxu0 }
 0x2f7   :  { %v1777_v4 = vadd.f32 %v1773_v62, %v1760_v5  ;;  %v4215_v5 = vld [vmem:[%s8403_s7 + $0x1a8] sm:$0xff] }
 0x2f8   :  { %vm2020_vm11 = vcmp.gt.f32.partialorder %v1776_v1, 0.0  ;;  %v2023_v6 = vmul.f32 %v7298_v0, %v1776_v1 }
 0x2f9   :  { %vm2021_vm12 = vcmp.gt.f32.partialorder %v1777_v4, 0.0  ;;  %v2024_v8 = vmul.f32 %v7298_v0, %v1777_v4 }
 0x2fa   :  { %v2025_v56 = vsel %vm2020_vm11, %v1776_v1, %v2023_v6  ;;  %v4214_v1 = vld [vmem:[%s8403_s7 + $0x1a0] sm:$0xff] }
 0x2fb   :  { %v2026_v9 = vsel %vm2021_vm12, %v1777_v4, %v2024_v8  ;;  %v5354_v8 = vpack.c.bf16 %v4215_v5, %v4214_v1 }
 0x2fc   :  { %v2035_v3 = vcombine.low %v2025_v56, %v2026_v9  ;;  %v2036_v10 = vcombine.high %v2025_v56, %v2026_v9  ;;  %v4170_v11 = vcombine.low %v2026_v9, %v2026_v9  ;;  %v4171_v12 = vcombine.high %v2026_v9, %v2026_v9  ;;  %v4216_v56 = vld [vmem:[%s8403_s7 + $0x1b0] sm:$0xff]  ;;  %v4217_v9 = vld [vmem:[%s8403_s7 + $0x1b8] sm:$0xff] }
 0x2fe   :  { %2044 = vst [vmem:[#allocation3 + $0x20] sm:$0xf] %v2035_v3  ;;  %2045 = vst.msk [vmem:[#allocation3 + $0x28] sm:$0xf] %vm1349_vm9, %v4170_v11  ;;  %v2011_v13 = vpop.f32.mrb[2].mxu1  ;;  %v5357_v3 = vpack.c.bf16 %v4217_v9, %v4216_v56  ;;  %v4219_v11 = vld [vmem:[%s8403_s7 + $0x1c8] sm:$0xff] }
 0x2ff   :  { %2046 = vst [vmem:[#allocation3 + $0x30] sm:$0xf] %v2036_v10  ;;  %2047 = vst.msk [vmem:[#allocation3 + $0x38] sm:$0xf] %vm1349_vm9, %v4171_v12  ;;  %v2018_v14 = vadd.f32 %v2011_v13, %v1769_v61  ;;  %v2013_v2 = vpop.f32.mrb[3].mxu1  ;;  %v4218_v10 = vld [vmem:[%s8403_s7 + $0x1c0] sm:$0xff] }
 0x300   :  { %v2019_v15 = vadd.f32 %v2013_v2, %v1773_v62  ;;  %v5351_v62 = vpack.c.bf16 %v4213_v58, %v4212_v47  ;;  %v5360_v12 = vpack.c.bf16 %v4219_v11, %v4218_v10  ;;  %v4220_v13 = vld [vmem:[%s8403_s7 + $0x1d0] sm:$0xff]  ;;  %v2425_v58 = vld [vmem:[%s8405_s9 + $0x58] sm:$0xff]  ;;  %v4239_v10 = vld [vmem:[%s8405_s9 + $0xc8] sm:$0xff] }
 0x301   :  { %vm2027_vm13 = vcmp.gt.f32.partialorder %v2018_v14, 0.0  ;;  %v2029_v18 = vmul.f32 %v7298_v0, %v2018_v14  ;;  %v4234_v47 = vld [vmem:[%s8405_s9 + $0xb0] sm:$0xff] }
 0x302   :  { %vm2028_vm14 = vcmp.gt.f32.partialorder %v2019_v15, 0.0  ;;  %v2030_v19 = vmul.f32 %v7298_v0, %v2019_v15 }
 0x303   :  { %v2031_v22 = vsel %vm2027_vm13, %v2018_v14, %v2029_v18  ;;  %v4221_v14 = vld [vmem:[%s8403_s7 + $0x1d8] sm:$0xff]  ;;  %v2414_v18 = vld [vmem:[%s8405_s9] sm:$0xff] }
 0x304   :  { %v2032_v25 = vsel %vm2028_vm14, %v2019_v15, %v2030_v19  ;;  %v5363_v2 = vpack.c.bf16 %v4221_v14, %v4220_v13  ;;  %v5366_v19 = vpack.c.bf16 %v4225_v17, %v4224_v16  ;;  %v5384_v21 = vpack.c.bf16 %v2415_v20, %v2414_v18  ;;  %v4241_v13 = vld [vmem:[%s8405_s9 + $0xd8] sm:$0xff]  ;;  %v4242_v16 = vld [vmem:[%s8405_s9 + $0xe0] sm:$0xff]  ;;  %v4243_v17 = vld [vmem:[%s8405_s9 + $0xe8] sm:$0xff] }
 0x305   :  { %v2050_v26 = vcombine.low %v2031_v22, %v2032_v25  ;;  %v2051_v27 = vcombine.high %v2031_v22, %v2032_v25  ;;  %v4172_v28 = vcombine.low %v2032_v25, %v2032_v25  ;;  %v4173_v29 = vcombine.high %v2032_v25, %v2032_v25  ;;  %v4226_v22 = vld [vmem:[%s8405_s9 + $0x70] sm:$0xff]  ;;  %v4245_v20 = vld [vmem:[%s8405_s9 + $0xf8] sm:$0xff] }
 0x306   :  { %v5808_v23 = vld [vmem:[#allocation3 + $0x28] ss:$16 sps:$4 sm:$0xff]   ;;  %v5809_v38 = vld [vmem:[#allocation3 + $0x20] ss:$16 sps:$4 sm:$0xff]   ;;  %v5408_v18 = vpack.c.bf16 %v4243_v17, %v4242_v16 }
 0x307   :  { %4196 = vmatprep.mubr.msk.f32.mxu0 %vm282_vm0, %v5808_v23  ;;  %v2054_v32 = vrot.slane %v2050_v26, 7  ;;  %v2055_v33 = vrot.slane %v4172_v28, 7  ;;  %v2056_v34 = vrot.slane %v2051_v27, 7  ;;  %v2057_v35 = vrot.slane %v4173_v29, 7  ;;  %v4227_v23 = vld [vmem:[%s8405_s9 + $0x78] sm:$0xff]  ;;  %v2416_v25 = vld [vmem:[%s8405_s9 + $0x10] sm:$0xff] }
 0x308   :  { %2197 = vmatmul.mubr.f32.vlgmr.msra.gmra.mrb[4].mxu0 %v5809_v38  ;;  %v2417_v38 = vld [vmem:[%s8405_s9 + $0x18] sm:$0xff]  ;;  %v4228_v27 = vld [vmem:[%s8405_s9 + $0x80] sm:$0xff]  ;;  %v4229_v28 = vld [vmem:[%s8405_s9 + $0x88] sm:$0xff] }
 0x309   :  { %5337 = vmatpush1.bf16.msra.mxu0 %v5336_v24  ;;  %2062 = vst [vmem:[#allocation3] sm:$0x1e] %v2054_v32  ;;  %2063 = vst.msk [vmem:[#allocation3 + $0x8] sm:$0x1e] %vm1368_vm10, %v2055_v33  ;;  %v5369_v24 = vpack.c.bf16 %v4227_v23, %v4226_v22  ;;  %v5387_v26 = vpack.c.bf16 %v2417_v38, %v2416_v25  ;;  %v5372_v29 = vpack.c.bf16 %v4229_v28, %v4228_v27  ;;  %v2419_v32 = vld [vmem:[%s8405_s9 + $0x28] sm:$0xff]  ;;  %v4246_v22 = vld [vmem:[%s8405_s9 + $0x100] sm:$0xff] }
 0x30a   :  { %5338 = vmatprep.subr.bf16.mxu0 %v5881_v60  ;;  %2064 = vst [vmem:[#allocation3 + $0x10] sm:$0x1e] %v2056_v34  ;;  %2065 = vst.msk [vmem:[#allocation3 + $0x18] sm:$0x1e] %vm1368_vm10, %v2057_v35  ;;  %v4230_v34 = vld [vmem:[%s8405_s9 + $0x90] sm:$0xff]  ;;  %v4231_v35 = vld [vmem:[%s8405_s9 + $0x98] sm:$0xff] }
 0x30b   :  { %v5375_v37 = vpack.c.bf16 %v4231_v35, %v4230_v34  ;;  %v4247_v23 = vld [vmem:[%s8405_s9 + $0x108] sm:$0xff]  ;;  %v4248_v25 = vld [vmem:[%s8405_s9 + $0x110] sm:$0xff]  ;;  %v4249_v38 = vld [vmem:[%s8405_s9 + $0x118] sm:$0xff] }
 0x30c   :  { %v4278_v28 = vld [vmem:[%s8407_s11 + $0x188] sm:$0xff]  ;;  %v4279_v34 = vld [vmem:[%s8407_s11 + $0x190] sm:$0xff] }
 0x30d   :  { %5340 = vmatpush1.bf16.msra.mxu0 %v5339_v30  ;;  %v2418_v30 = vld [vmem:[%s8405_s9 + $0x20] sm:$0xff]  ;;  %v2719_v16 = vld [vmem:[%s8407_s11 + $0x70] sm:$0xff]  ;;  %v4294_v17 = vld [vmem:[%s8407_s11 + $0x208] sm:$0xff] }
 0x30e   :  { %5341 = vmatprep.subr.bf16.mxu0 %v5881_v60  ;;  %v5390_v33 = vpack.c.bf16 %v2419_v32, %v2418_v30  ;;  %v2706_v30 = vld [vmem:[%s8407_s11 + $0x8] sm:$0xff]  ;;  %v2708_v32 = vld [vmem:[%s8407_s11 + $0x18] sm:$0xff] }
 0x30f   :  { %v5419_v35 = vpack.c.bf16 %v2708_v32, %v2706_v30  ;;  %v2726_v32 = vld [vmem:[%s8407_s11 + $0xa8] sm:$0xff] }
 0x310   :  { %v5812_v48 = vld [vmem:[#allocation3] ss:$8 sps:$4 sm:$0xee]   ;;  %v5814_v50 = vld [vmem:[#allocation3 + $0x4] ss:$8 sps:$4 sm:$0x11]  }
 0x311   :  { %5343 = vmatpush1.bf16.msra.mxu0 %v5342_v39  ;;  %v5810_v45 = vld [vmem:[#allocation3 + $0x8] ss:$16 sps:$4 sm:$0xff]   ;;  %v5811_v46 = vld [vmem:[#allocation3] ss:$16 sps:$4 sm:$0xff]   ;;  %v4200_v53 = vrot.slane %v5812_v48, 9  ;;  %v2291_v54 = vrot.slane %v5814_v50, 5 }
 0x312   :  { %5344 = vmatprep.subr.bf16.mxu0 %v5881_v60  ;;  %4199 = vmatprep.mubr.msk.f32.mxu1 %vm282_vm0, %v5810_v45  ;;  %v5815_v51 = vld [vmem:[#allocation3 + $0x10] ss:$8 sps:$4 sm:$0xee]   ;;  %v5817_v52 = vld [vmem:[#allocation3 + $0x14] ss:$8 sps:$4 sm:$0x11]  }
 0x313   :  { %2272 = vmatmul.mubr.f32.vlgmr.msra.gmra.mrb[4].mxu1 %v5811_v46  ;;  %v4201_v55 = vrot.slane %v5815_v51, 9  ;;  %v2295_v61 = vrot.slane %v5817_v52, 5  ;;  %v2292_v63 = vsel %vm6476_vm3, %v4200_v53, %v2291_v54  ;;  %v2421_v39 = vld [vmem:[%s8405_s9 + $0x38] sm:$0xff]  ;;  %v5396_v46 = vpack.c.bf16 %v2423_v44, %v2422_v43  ;;  %v2710_v44 = vld [vmem:[%s8407_s11 + $0x28] sm:$0xff] }
 0x314   :  { %5385 = vmatpush3.bf16.msra.mxu1 %v5384_v21  ;;  %v5393_v40 = vpack.c.bf16 %v2421_v39, %v2420_v36  ;;  %4573 = vmatprep.mubr.msk.f32.mxu1 %vm5882_vm1, %v5880_v7  ;;  %v4235_v48 = vld [vmem:[%s8405_s9 + $0xb8] sm:$0xff]  ;;  %v2707_v39 = vld [vmem:[%s8407_s11 + $0x10] sm:$0xff] }
 0x315   :  { %5346 = vmatpush1.bf16.msra.mxu0 %v5345_v42  ;;  %v2296_v4 = vsel %vm6476_vm3, %v4201_v55, %v2295_v61  ;;  %5386 = vmatprep.subr.bf16.mxu1 %v5881_v60  ;;  %v4233_v42 = vld [vmem:[%s8405_s9 + $0xa8] sm:$0xff]  ;;  %v5381_v50 = vpack.c.bf16 %v4235_v48, %v4234_v47  ;;  %v4283_v48 = vld [vmem:[%s8407_s11 + $0x1b0] sm:$0xff] }
 0x316   :  { %5347 = vmatprep.subr.bf16.mxu0 %v5881_v60  ;;  %v2319_v6 = vcombine.high %v2292_v63, %v2296_v4  ;;  %v2318_v15 = vcombine.low %v2292_v63, %v2296_v4  ;;  %v5378_v45 = vpack.c.bf16 %v4233_v42, %v4232_v41  ;;  %v4223_v63 = vld [vmem:[%s8404_s8] ss:$0 sm:$0xff]  ;;  %v2403_v4 = vstv %s3889_s3  ;;  %v4284_v42 = vld [vmem:[%s8407_s11 + $0x1b8] sm:$0xff]  ;;  %s3890_s8 = sld [smem:[#allocation7 + $0x2]] }
 0x318   :  { %4222 = vmatprep.mubr.msk.f32.mxu0 %vm282_vm0, %v2319_v6  ;;  %5388 = vmatpush3.bf16.msra.mxu1 %v5387_v26  ;;  %v5417_v26 = vpack.c.bf16 %v4249_v38, %v4248_v25  ;;  %v4295_v25 = vld [vmem:[%s8407_s11 + $0x210] sm:$0xff]  ;;  %v2721_v38 = vld [vmem:[%s8407_s11 + $0x80] sm:$0xff] }
 0x319   :  { %5349 = vmatpush1.bf16.msra.mxu0 %v5348_v57  ;;  %5389 = vmatprep.subr.bf16.mxu1 %v5881_v60  ;;  %v2424_v57 = vld [vmem:[%s8405_s9 + $0x50] sm:$0xff] }
 0x31a   :  { %5350 = vmatprep.subr.bf16.mxu0 %v5881_v60  ;;  %v5399_v51 = vpack.c.bf16 %v2425_v58, %v2424_v57  ;;  %v2709_v57 = vld [vmem:[%s8407_s11 + $0x20] sm:$0xff]  ;;  %v2711_v58 = vld [vmem:[%s8407_s11 + $0x30] sm:$0xff] }
 0x31c   :  { %5391 = vmatpush3.bf16.msra.mxu1 %v5390_v33  ;;  %v4277_v33 = vld [vmem:[%s8407_s11 + $0x180] sm:$0xff] }
 0x31d   :  { %5352 = vmatpush1.bf16.msra.mxu0 %v5351_v62  ;;  %5392 = vmatprep.subr.bf16.mxu1 %v5881_v60  ;;  %v5445_v36 = vpack.c.bf16 %v4279_v34, %v4277_v33  ;;  %v2728_v33 = vld [vmem:[%s8407_s11 + $0xb8] sm:$0xff]  ;;  %v4297_v34 = vld [vmem:[%s8407_s11 + $0x220] sm:$0xff] }
 0x31e   :  { %5353 = vmatprep.subr.bf16.mxu0 %v5881_v60 }
 0x320   :  { %5394 = vmatpush3.bf16.msra.mxu1 %v5393_v40  ;;  %v4282_v40 = vld [vmem:[%s8407_s11 + $0x1a8] sm:$0xff] }
 0x321   :  { %5355 = vmatpush1.bf16.msra.mxu0 %v5354_v8  ;;  %5395 = vmatprep.subr.bf16.mxu1 %v5881_v60  ;;  %v5447_v43 = vpack.c.bf16 %v4284_v42, %v4282_v40  ;;  %v4254_v40 = vld [vmem:[%s8407_s11 + $0xc8] sm:$0xff] }
 0x322   :  { %5356 = vmatprep.subr.bf16.mxu0 %v5881_v60 }
 0x324   :  { %5397 = vmatpush3.bf16.msra.mxu1 %v5396_v46  ;;  %v4281_v46 = vld [vmem:[%s8407_s11 + $0x1a0] sm:$0xff] }
 0x325   :  { %5358 = vmatpush1.bf16.msra.mxu0 %v5357_v3  ;;  %5398 = vmatprep.subr.bf16.mxu1 %v5881_v60  ;;  %v4238_v3 = vld [vmem:[%s8405_s9 + $0xc0] sm:$0xff] }
 0x326   :  { %5359 = vmatprep.subr.bf16.mxu0 %v5881_v60  ;;  %v5402_v11 = vpack.c.bf16 %v4239_v10, %v4238_v3  ;;  %v2718_v3 = vld [vmem:[%s8407_s11 + $0x68] sm:$0xff] }
 0x328   :  { %5400 = vmatpush3.bf16.msra.mxu1 %v5399_v51  ;;  %v5425_v51 = vpack.c.bf16 %v2711_v58, %v2709_v57 }
 0x329   :  { %5361 = vmatpush1.bf16.msra.mxu0 %v5360_v12  ;;  %v4240_v12 = vld [vmem:[%s8405_s9 + $0xd0] sm:$0xff]  ;;  %5420 = vmatprep.subr.bf16.mxu1 %v5419_v35  ;;  %v5439_v35 = vpack.c.bf16 %v2728_v33, %v2726_v32  ;;  %v3154_v32 = vld [vmem:[%s8409_s13 + $0x78] sm:$0xff]  ;;  %v4266_v33 = vld [vmem:[%s8407_s11 + $0x128] sm:$0xff] }
 0x32a   :  { %5362 = vmatprep.subr.bf16.mxu0 %v5881_v60 }
 0x32d   :  { %5364 = vmatpush1.bf16.msra.mxu0 %v5363_v2 }
 0x32e   :  { %5365 = vmatprep.subr.bf16.mxu0 %v5881_v60 }
 0x330   :  { %2388 = vmatmul.mubr.f32.vlgmr.msra.gmra.mrb[6].mxu0 %v2318_v15  ;;  %v5405_v15 = vpack.c.bf16 %v4241_v13, %v4240_v12  ;;  %v4289_v12 = vld [vmem:[%s8407_s11 + $0x1e0] sm:$0xff]  ;;  %v4291_v13 = vld [vmem:[%s8407_s11 + $0x1f0] sm:$0xff] }
 0x331   :  { %5367 = vmatpush3.bf16.msra.mxu0 %v5366_v19  ;;  %4546 = vmatprep.mubr.msk.f32.mxu0 %vm5882_vm1, %v5880_v7  ;;  %v4244_v19 = vld [vmem:[%s8405_s9 + $0xf0] sm:$0xff] }
 0x332   :  { %5368 = vmatprep.subr.bf16.mxu0 %v5881_v60  ;;  %v5411_v21 = vpack.c.bf16 %v4245_v20, %v4244_v19  ;;  %v4296_v19 = vld [vmem:[%s8407_s11 + $0x218] sm:$0xff]  ;;  %v2722_v20 = vld [vmem:[%s8407_s11 + $0x88] sm:$0xff] }
 0x335   :  { %5370 = vmatpush3.bf16.msra.mxu0 %v5369_v24  ;;  %v5414_v24 = vpack.c.bf16 %v4247_v23, %v4246_v22  ;;  %v5459_v22 = vpack.c.bf16 %v4296_v19, %v4294_v17 }
 0x336   :  { %5371 = vmatprep.subr.bf16.mxu0 %v5881_v60 }
 0x339   :  { %5373 = vmatpush3.bf16.msra.mxu0 %v5372_v29  ;;  %v4280_v29 = vld [vmem:[%s8407_s11 + $0x198] sm:$0xff] }
 0x33a   :  { %5374 = vmatprep.subr.bf16.mxu0 %v5881_v60 }
 0x33d   :  { %5376 = vmatpush3.bf16.msra.mxu0 %v5375_v37  ;;  %v2705_v37 = vld [vmem:[%s8407_s11] sm:$0xff] }
 0x33e   :  { %5377 = vmatprep.subr.bf16.mxu0 %v5881_v60  ;;  %v5421_v41 = vpack.c.bf16 %v2707_v39, %v2705_v37  ;;  %v2725_v37 = vld [vmem:[%s8407_s11 + $0xa0] sm:$0xff]  ;;  %v2727_v39 = vld [vmem:[%s8407_s11 + $0xb0] sm:$0xff] }
 0x341   :  { %5379 = vmatpush3.bf16.msra.mxu0 %v5378_v45  ;;  %v2712_v45 = vld [vmem:[%s8407_s11 + $0x38] sm:$0xff] }
 0x342   :  { %5380 = vmatprep.subr.bf16.mxu0 %v5881_v60  ;;  %v5423_v47 = vpack.c.bf16 %v2712_v45, %v2710_v44  ;;  %v3140_v45 = vld [vmem:[%s8409_s13 + $0x8] sm:$0xff] }
 0x345   :  { %5382 = vmatpush3.bf16.msra.mxu0 %v5381_v50  ;;  %v5449_v50 = vpack.c.bf16 %v4283_v48, %v4281_v46  ;;  %v3142_v46 = vld [vmem:[%s8409_s13 + $0x18] sm:$0xff] }
 0x346   :  { %5401 = vmatprep.subr.bf16.mxu0 %v5881_v60 }
 0x3db   :  { %v2198_v52 = vpop.f32.mrb[4].mxu0 }
 0x3dc   :  { %v2200_v53 = vpop.f32.mrb[5].mxu0 }
 0x3dd   :  { %v4288_v53 = vld [vmem:[%s8407_s11 + $0x1d8] sm:$0xff] }
 0x3e6   :  { %v2273_v54 = vpop.f32.mrb[4].mxu1 }
 0x3e7   :  { %v2274_v55 = vadd.f32 %v2273_v54, %v2198_v52  ;;  %v2275_v61 = vpop.f32.mrb[5].mxu1  ;;  %v4286_v52 = vld [vmem:[%s8407_s11 + $0x1c8] sm:$0xff] }
 0x3e8   :  { %v5451_v54 = vpack.c.bf16 %v4288_v53, %v4286_v52  ;;  %v2716_v61 = vld [vmem:[%s8407_s11 + $0x58] sm:$0xff]  ;;  %v4251_v53 = vld [vmem:[%s8406_s10] ss:$0 sm:$0xff] }
 0x403   :  { %v2389_v62 = vpop.f32.mrb[6].mxu0 }
 0x404   :  { %v2393_v1 = vadd.f32 %v2389_v62, %v2274_v55  ;;  %v2391_v5 = vpop.f32.mrb[7].mxu0  ;;  %v2714_v55 = vld [vmem:[%s8407_s11 + $0x48] sm:$0xff]  ;;  %v4285_v62 = vld [vmem:[%s8407_s11 + $0x1c0] sm:$0xff] }
 0x405   :  { %v2713_v5 = vld [vmem:[%s8407_s11 + $0x40] sm:$0xff] }
 0x406   :  { %v2401_v6 = vadd.f32 %v4223_v63, %v2393_v1  ;;  %v5427_v63 = vpack.c.bf16 %v2716_v61, %v2714_v55  ;;  %v4287_v1 = vld [vmem:[%s8407_s11 + $0x1d0] sm:$0xff]  ;;  %v2692_v61 = vstv %s3890_s8 }
 0x408   :  { %vm2402_vm2 = vcmp.gt.f32.partialorder %v2401_v6, 0.0  ;;  %v2404_v8 = vmul.f32 %v2403_v4, %v2401_v6  ;;  %v2715_v4 = vld [vmem:[%s8407_s11 + $0x50] sm:$0xff] }
 0x40a   :  { %v2405_v56 = vsel %vm2402_vm2, %v2401_v6, %v2404_v8  ;;  %v5453_v6 = vpack.c.bf16 %v4287_v1, %v4285_v62  ;;  %v5429_v8 = vpack.c.bf16 %v2715_v4, %v2713_v5  ;;  %v4253_v4 = vld [vmem:[%s8407_s11 + $0xc0] sm:$0xff] }
 0x40b   :  { %v2407_v9 = vcombine.high %v2405_v56, %v2405_v56  ;;  %2410 = vst.msk [vmem:[#allocation4 + $0x1] sm:$0xf] %vm2409_vm4, %v2405_v56  ;;  %v4290_v56 = vld [vmem:[%s8407_s11 + $0x1e8] sm:$0xff] }
 0x40d   :  { %2411 = vst.msk [vmem:[#allocation4 + $0x9] sm:$0xf] %vm2409_vm4, %v2407_v9  ;;  %v4292_v9 = vld [vmem:[%s8407_s11 + $0x1f8] sm:$0xff] }
 0x40e   :  { %v5455_v10 = vpack.c.bf16 %v4292_v9, %v4290_v56  ;;  %v3141_v56 = vld [vmem:[%s8409_s13 + $0x10] sm:$0xff]  ;;  %v4258_v9 = vld [vmem:[%s8407_s11 + $0xe8] sm:$0xff] }
 0x414   :  { %v5818_v14 = vld [vmem:[#allocation4 + $0x1] ss:$8 sps:$4 sm:$0xff]  }
 0x415   :  { %v5819_v2 = vld [vmem:[#allocation4] ss:$8 sps:$4 sm:$0xff]   ;;  %4547 = vmatmul.mubr.msk.f32.vlgmr.msra.gmra.mrb[8].mxu0 %vm2444_vm5, %v5818_v14 }
 0x416   :  { %4574 = vmatmul.mubr.msk.f32.vlgmr.msra.gmra.mrb[6].mxu1 %vm2444_vm5, %v5819_v2  ;;  %5403 = vmatpush3.bf16.msra.mxu0 %v5402_v11  ;;  %v5820_v27 = vld [vmem:[#allocation4 + $0x2] ss:$8 sps:$4 sm:$0xff]   ;;  %v2720_v11 = vld [vmem:[%s8407_s11 + $0x78] sm:$0xff]  ;;  %v5457_v2 = vpack.c.bf16 %v4291_v13, %v4289_v12  ;;  %v4259_v13 = vld [vmem:[%s8407_s11 + $0xf0] sm:$0xff] }
 0x417   :  { %5404 = vmatprep.subr.bf16.mxu0 %v5881_v60  ;;  %4600 = vmatprep.mubr.msk.f32.mxu0 %vm5882_vm1, %v5880_v7  ;;  %v5431_v14 = vpack.c.bf16 %v2720_v11, %v2718_v3  ;;  %v4260_v3 = vld [vmem:[%s8407_s11 + $0xf8] sm:$0xff]  ;;  %v4257_v12 = vld [vmem:[%s8407_s11 + $0xe0] sm:$0xff] }
 0x418   :  { %2809 = vmatprep.mubr.f32.mxu1 %v5880_v7  ;;  %5422 = vmatpush1.bf16.msra.mxu1 %v5421_v41  ;;  %v4256_v41 = vld [vmem:[%s8407_s11 + $0xd8] sm:$0xff]  ;;  %v5471_v19 = vpack.c.bf16 %v4260_v3, %v4258_v9 }
 0x419   :  { %5424 = vmatprep.subr.bf16.mxu1 %v5423_v47  ;;  %v5467_v44 = vpack.c.bf16 %v4256_v41, %v4254_v40  ;;  %v7685_v47 = vpack.c.bf16 %v3142_v46, %v3140_v45  ;;  %v3146_v11 = vld [vmem:[%s8409_s13 + $0x38] sm:$0xff]  ;;  %v3151_v40 = vld [vmem:[%s8409_s13 + $0x60] sm:$0xff]  ;;  %v3153_v41 = vld [vmem:[%s8409_s13 + $0x70] sm:$0xff] }
 0x41a   :  { %5406 = vmatpush3.bf16.msra.mxu0 %v5405_v15  ;;  %v2717_v15 = vld [vmem:[%s8407_s11 + $0x60] sm:$0xff]  ;;  %v3158_v45 = vld [vmem:[%s8409_s13 + $0x98] sm:$0xff]  ;;  %v4270_v46 = vld [vmem:[%s8407_s11 + $0x148] sm:$0xff] }
 0x41b   :  { %5407 = vmatprep.subr.bf16.mxu0 %v5881_v60  ;;  %v3162_v9 = vld [vmem:[%s8409_s13 + $0xb8] sm:$0xff] }
 0x41c   :  { %5426 = vmatpush1.bf16.msra.mxu1 %v5425_v51 }
 0x41d   :  { %5428 = vmatprep.subr.bf16.mxu1 %v5427_v63 }
 0x41e   :  { %5409 = vmatpush3.bf16.msra.mxu0 %v5408_v18  ;;  %v5433_v18 = vpack.c.bf16 %v2719_v16, %v2717_v15  ;;  %v3145_v15 = vld [vmem:[%s8409_s13 + $0x30] sm:$0xff] }
 0x41f   :  { %5410 = vmatprep.subr.bf16.mxu0 %v5881_v60 }
 0x420   :  { %5430 = vmatpush1.bf16.msra.mxu1 %v5429_v8  ;;  %v3139_v8 = vld [vmem:[%s8409_s13] sm:$0xff] }
 0x421   :  { %5432 = vmatprep.subr.bf16.mxu1 %v5431_v14  ;;  %v7723_v14 = vpack.c.bf16 %v3141_v56, %v3139_v8  ;;  %v3160_v56 = vld [vmem:[%s8409_s13 + $0xa8] sm:$0xff] }
 0x422   :  { %5412 = vmatpush3.bf16.msra.mxu0 %v5411_v21  ;;  %v2724_v21 = vld [vmem:[%s8407_s11 + $0x98] sm:$0xff]  ;;  %v7854_v3 = vpack.c.bf16 %v3162_v9, %v3160_v56  ;;  %v3175_v56 = vld [vmem:[%s8409_s13 + $0x120] sm:$0xff]  ;;  %v3177_v9 = vld [vmem:[%s8409_s13 + $0x130] sm:$0xff] }
 0x423   :  { %5413 = vmatprep.subr.bf16.mxu0 %v5881_v60  ;;  %v5435_v23 = vpack.c.bf16 %v2724_v21, %v2722_v20  ;;  %v3148_v21 = vld [vmem:[%s8409_s13 + $0x48] sm:$0xff] }
 0x424   :  { %5434 = vmatpush1.bf16.msra.mxu1 %v5433_v18 }
 0x425   :  { %5436 = vmatprep.subr.bf16.mxu1 %v5435_v23  ;;  %v4262_v23 = vld [vmem:[%s8407_s11 + $0x108] sm:$0xff] }
 0x426   :  { %5415 = vmatpush3.bf16.msra.mxu0 %v5414_v24  ;;  %v4293_v24 = vld [vmem:[%s8407_s11 + $0x200] sm:$0xff] }
 0x427   :  { %5416 = vmatprep.subr.bf16.mxu0 %v5881_v60  ;;  %v5443_v60 = vpack.c.bf16 %v4280_v29, %v4278_v28  ;;  %v4298_v28 = vld [vmem:[%s8407_s11 + $0x228] sm:$0xff]  ;;  %v4300_v29 = vld [vmem:[%s8407_s11 + $0x238] sm:$0xff] }
 0x42a   :  { %5418 = vmatpush3.bf16.msra.mxu0 %v5417_v26  ;;  %v5461_v26 = vpack.c.bf16 %v4295_v25, %v4293_v24  ;;  %v4264_v24 = vld [vmem:[%s8407_s11 + $0x118] sm:$0xff] }
 0x42b   :  { %5444 = vmatprep.subr.bf16.mxu0 %v5443_v60  ;;  %v5463_v60 = vpack.c.bf16 %v4300_v29, %v4298_v28  ;;  %v3147_v28 = vld [vmem:[%s8409_s13 + $0x40] sm:$0xff]  ;;  %v3149_v29 = vld [vmem:[%s8409_s13 + $0x50] sm:$0xff] }
 0x42d   :  { %4601 = vmatmul.mubr.msk.f32.vlgmr.msra.gmra.mrb[10].mxu0 %vm2444_vm5, %v5820_v27  ;;  %v2723_v27 = vld [vmem:[%s8407_s11 + $0x90] sm:$0xff] }
 0x42e   :  { %2935 = vmatprep.mubr.f32.mxu0 %v5880_v7  ;;  %5446 = vmatpush1.bf16.msra.mxu0 %v5445_v36  ;;  %v5437_v30 = vpack.c.bf16 %v2723_v27, %v2721_v38  ;;  %v4299_v36 = vld [vmem:[%s8407_s11 + $0x230] sm:$0xff]  ;;  %v5473_v38 = vpack.c.bf16 %v4259_v13, %v4257_v12  ;;  %v4357_v13 = vld [vmem:[%s8409_s13 + $0x288] sm:$0xff] }
 0x42f   :  { %5448 = vmatprep.subr.bf16.mxu0 %v5447_v43  ;;  %v5465_v42 = vpack.c.bf16 %v4299_v36, %v4297_v34  ;;  %v5441_v43 = vpack.c.bf16 %v2727_v39, %v2725_v37  ;;  %v4268_v34 = vld [vmem:[%s8407_s11 + $0x138] sm:$0xff]  ;;  %v4265_v37 = vld [vmem:[%s8407_s11 + $0x120] sm:$0xff] }
 0x430   :  { %5438 = vmatpush1.bf16.msra.mxu1 %v5437_v30  ;;  %v5475_v30 = vpack.c.bf16 %v4264_v24, %v4262_v23  ;;  %v3165_v23 = vld [vmem:[%s8409_s13 + $0xd0] sm:$0xff] }
 0x431   :  { %5440 = vmatprep.subr.bf16.mxu1 %v5439_v35  ;;  %v7782_v35 = vpack.c.bf16 %v3149_v29, %v3147_v28  ;;  %v4363_v28 = vld [vmem:[%s8409_s13 + $0x2b8] sm:$0xff]  ;;  %v3168_v29 = vld [vmem:[%s8409_s13 + $0xe8] sm:$0xff] }
 0x432   :  { %5450 = vmatpush1.bf16.msra.mxu0 %v5449_v50 }
 0x433   :  { %5452 = vmatprep.subr.bf16.mxu0 %v5451_v54 }
 0x434   :  { %5442 = vmatpush1.bf16.msra.mxu1 %v5441_v43  ;;  %v4267_v43 = vld [vmem:[%s8407_s11 + $0x130] sm:$0xff] }
 0x435   :  { %5492 = vmatprep.subr.bf16.mxu1 %v7685_v47 }
 0x436   :  { %5454 = vmatpush1.bf16.msra.mxu0 %v5453_v6  ;;  %v4255_v6 = vld [vmem:[%s8407_s11 + $0xd0] sm:$0xff] }
 0x437   :  { %5456 = vmatprep.subr.bf16.mxu0 %v5455_v10  ;;  %v3144_v10 = vld [vmem:[%s8409_s13 + $0x28] sm:$0xff]  ;;  %v5469_v17 = vpack.c.bf16 %v4255_v6, %v4253_v4  ;;  %v4273_v4 = vld [vmem:[%s8407_s11 + $0x160] sm:$0xff]  ;;  %v4275_v6 = vld [vmem:[%s8407_s11 + $0x170] sm:$0xff] }
 0x438   :  { %v7733_v20 = vpack.c.bf16 %v3146_v11, %v3144_v10  ;;  %v5489_v8 = vpack.c.bf16 %v4275_v6, %v4273_v4  ;;  %v3159_v10 = vld [vmem:[%s8409_s13 + $0xa0] sm:$0xff]  ;;  %v3161_v11 = vld [vmem:[%s8409_s13 + $0xb0] sm:$0xff] }
 0x439   :  { %v7862_v12 = vpack.c.bf16 %v3161_v11, %v3159_v10  ;;  %v4368_v4 = vld [vmem:[%s8409_s13 + $0x2e0] sm:$0xff]  ;;  %v4373_v10 = vld [vmem:[%s8409_s13 + $0x308] sm:$0xff]  ;;  %v4375_v11 = vld [vmem:[%s8409_s13 + $0x318] sm:$0xff] }
 0x43a   :  { %5458 = vmatpush1.bf16.msra.mxu0 %v5457_v2  ;;  %v3143_v2 = vld [vmem:[%s8409_s13 + $0x20] sm:$0xff] }
 0x43b   :  { %5460 = vmatprep.subr.bf16.mxu0 %v5459_v22  ;;  %v3150_v22 = vld [vmem:[%s8409_s13 + $0x58] sm:$0xff]  ;;  %v7751_v25 = vpack.c.bf16 %v3145_v15, %v3143_v2 }
 0x43c   :  { %v7757_v27 = vpack.c.bf16 %v3150_v22, %v3148_v21  ;;  %v4359_v2 = vld [vmem:[%s8409_s13 + $0x298] sm:$0xff]  ;;  %v4358_v21 = vld [vmem:[%s8409_s13 + $0x290] sm:$0xff]  ;;  %v3163_v22 = vld [vmem:[%s8409_s13 + $0xc0] sm:$0xff] }
 0x43d   :  { %v7872_v15 = vpack.c.bf16 %v4359_v2, %v4357_v13  ;;  %v8010_v2 = vpack.c.bf16 %v3177_v9, %v3175_v56 }
 0x43e   :  { %5462 = vmatpush1.bf16.msra.mxu0 %v5461_v26  ;;  %v4261_v26 = vld [vmem:[%s8407_s11 + $0x100] sm:$0xff] }
 0x43f   :  { %5464 = vmatprep.subr.bf16.mxu0 %v5463_v60  ;;  %v4263_v60 = vld [vmem:[%s8407_s11 + $0x110] sm:$0xff] }
 0x440   :  { %v5477_v36 = vpack.c.bf16 %v4263_v60, %v4261_v26  ;;  %v4361_v26 = vld [vmem:[%s8409_s13 + $0x2a8] sm:$0xff]  ;;  %v3170_v60 = vld [vmem:[%s8409_s13 + $0xf8] sm:$0xff] }
 0x442   :  { %5466 = vmatpush1.bf16.msra.mxu0 %v5465_v42  ;;  %v5479_v42 = vpack.c.bf16 %v4268_v34, %v4266_v33  ;;  %v7922_v33 = vpack.c.bf16 %v3170_v60, %v3168_v29  ;;  %v4381_v60 = vld [vmem:[%s8409_s13 + $0x348] sm:$0xff] }
 0x443   :  { %5468 = vmatprep.subr.bf16.mxu0 %v5467_v44  ;;  %v3156_v44 = vld [vmem:[%s8409_s13 + $0x88] sm:$0xff] }
 0x4e8   :  { %v2513_v48 = vpop.f32.mrb[8].mxu0 }
 0x4e9   :  { %v2588_v57 = vpop.f32.mrb[6].mxu1  ;;  %v4548_v58 = vpop.f32.mrb[9].mxu0 }
 0x4ea   :  { %v2589_v50 = vadd.f32 %v2588_v57, %v2513_v48  ;;  %v4575_v51 = vpop.f32.mrb[7].mxu1  ;;  %v4272_v48 = vld [vmem:[%s8407_s11 + $0x158] sm:$0xff]  ;;  %v7812_v57 = vpack.c.bf16 %v3153_v41, %v3151_v40  ;;  %v5481_v58 = vpack.c.bf16 %v4267_v43, %v4265_v37  ;;  %v3169_v37 = vld [vmem:[%s8409_s13 + $0xf0] sm:$0xff]  ;;  %v4365_v40 = vld [vmem:[%s8409_s13 + $0x2c8] sm:$0xff] }
 0x4eb   :  { %v3155_v51 = vld [vmem:[%s8409_s13 + $0x80] sm:$0xff]  ;;  %v3172_v43 = vld [vmem:[%s8409_s13 + $0x108] sm:$0xff] }
 0x500   :  { %v2678_v52 = vpop.f32.mrb[10].mxu0 }
 0x501   :  { %v2682_v54 = vadd.f32 %v2678_v52, %v2589_v50  ;;  %v4602_v55 = vpop.f32.mrb[11].mxu0  ;;  %v7815_v50 = vpack.c.bf16 %v3158_v45, %v3156_v44  ;;  %v3157_v52 = vld [vmem:[%s8409_s13 + $0x90] sm:$0xff]  ;;  %v3174_v44 = vld [vmem:[%s8409_s13 + $0x118] sm:$0xff] }
 0x502   :  { %v4271_v55 = vld [vmem:[%s8407_s11 + $0x150] sm:$0xff] }
 0x503   :  { %v2690_v62 = vadd.f32 %v4251_v53, %v2682_v54  ;;  %v5483_v53 = vpack.c.bf16 %v4272_v48, %v4270_v46  ;;  %v4269_v54 = vld [vmem:[%s8407_s11 + $0x140] sm:$0xff]  ;;  %v7950_v46 = vpack.c.bf16 %v3174_v44, %v3172_v43  ;;  %v4387_v43 = vld [vmem:[%s8409_s13 + $0x378] sm:$0xff] }
 0x504   :  { %v4364_v48 = vld [vmem:[%s8409_s13 + $0x2c0] sm:$0xff] }
 0x505   :  { %vm2691_vm7 = vcmp.gt.f32.partialorder %v2690_v62, 0.0  ;;  %v2693_v63 = vmul.f32 %v2692_v61, %v2690_v62  ;;  %v4274_v61 = vld [vmem:[%s8407_s11 + $0x168] sm:$0xff]  ;;  %v4384_v44 = vld [vmem:[%s8409_s13 + $0x360] sm:$0xff] }
 0x507   :  { %v2694_v1 = vsel %vm2691_vm7, %v2690_v62, %v2693_v63  ;;  %v4276_v62 = vld [vmem:[%s8407_s11 + $0x178] sm:$0xff]  ;;  %v7836_v63 = vpack.c.bf16 %v3157_v52, %v3155_v51  ;;  %v3171_v51 = vld [vmem:[%s8409_s13 + $0x100] sm:$0xff] }
 0x508   :  { %v2696_v5 = vcombine.high %v2694_v1, %v2694_v1  ;;  %2698 = vst.msk [vmem:[#allocation5] sm:$0xf] %vm2409_vm4, %v2694_v1  ;;  %v5485_v1 = vpack.c.bf16 %v4271_v55, %v4269_v54  ;;  %v4369_v54 = vld [vmem:[%s8409_s13 + $0x2e8] sm:$0xff]  ;;  %v4371_v55 = vld [vmem:[%s8409_s13 + $0x2f8] sm:$0xff] }
 0x50a   :  { %2699 = vst.msk [vmem:[#allocation5 + $0x8] sm:$0xf] %vm2409_vm4, %v2696_v5  ;;  %v5487_v5 = vpack.c.bf16 %v4276_v62, %v4274_v61  ;;  %v7978_v62 = vpack.c.bf16 %v4371_v55, %v4369_v54 }
 0x511   :  { %v7731_v16 = vld [vmem:[#allocation5] ss:$8 sps:$4 sm:$0xff]  }
 0x512   :  { %v5822_v18 = vld [vmem:[#allocation5 + $0x1] ss:$8 sps:$4 sm:$0xff]   ;;  %4252 = vmatmul.mubr.msk.f32.vlgmr.msra.gmra.mrb[8].mxu1 %vm2444_vm5, %v7731_v16 }
 0x513   :  { %4301 = vmatmul.mubr.msk.f32.vlgmr.msra.gmra.mrb[12].mxu0 %vm2444_vm5, %v5822_v18  ;;  %5494 = vmatpush1.bf16.msra.mxu1 %v7723_v14  ;;  %v4356_v18 = vld [vmem:[%s8409_s13 + $0x280] sm:$0xff] }
 0x514   :  { %5470 = vmatpush1.bf16.msra.mxu0 %v5469_v17  ;;  %3006 = vmatprep.mubr.f32.mxu0 %v5880_v7  ;;  %v3152_v7 = vld [vmem:[%s8409_s13 + $0x68] sm:$0xff]  ;;  %v3166_v17 = vld [vmem:[%s8409_s13 + $0xd8] sm:$0xff]  ;;  %v7895_v24 = vpack.c.bf16 %v4358_v21, %v4356_v18  ;;  %v4374_v18 = vld [vmem:[%s8409_s13 + $0x310] sm:$0xff] }
 0x515   :  { %5472 = vmatprep.subr.bf16.mxu0 %v5471_v19  ;;  %5496 = vmatprep.subr.bf16.mxu1 %v7733_v20  ;;  %v7788_v39 = vpack.c.bf16 %v3154_v32, %v3152_v7  ;;  %v4360_v7 = vld [vmem:[%s8409_s13 + $0x2a0] sm:$0xff]  ;;  %v4362_v32 = vld [vmem:[%s8409_s13 + $0x2b0] sm:$0xff] }
 0x516   :  { %v7924_v34 = vpack.c.bf16 %v4362_v32, %v4360_v7  ;;  %v4383_v7 = vld [vmem:[%s8409_s13 + $0x358] sm:$0xff] }
 0x517   :  { %5498 = vmatpush1.bf16.msra.mxu1 %v7751_v25  ;;  %v8053_v32 = vpack.c.bf16 %v4383_v7, %v4381_v60 }
 0x518   :  { %5474 = vmatpush1.bf16.msra.mxu0 %v5473_v38  ;;  %5500 = vmatprep.subr.bf16.mxu1 %v7757_v27  ;;  %v7897_v38 = vpack.c.bf16 %v3165_v23, %v3163_v22  ;;  %v4377_v22 = vld [vmem:[%s8409_s13 + $0x328] sm:$0xff]  ;;  %v4379_v23 = vld [vmem:[%s8409_s13 + $0x338] sm:$0xff] }
 0x519   :  { %5476 = vmatprep.subr.bf16.mxu0 %v5475_v30  ;;  %v7911_v30 = vpack.c.bf16 %v4363_v28, %v4361_v26  ;;  %v8035_v26 = vpack.c.bf16 %v4379_v23, %v4377_v22  ;;  %v4376_v28 = vld [vmem:[%s8409_s13 + $0x320] sm:$0xff] }
 0x51b   :  { %5502 = vmatpush1.bf16.msra.mxu1 %v7782_v35 }
 0x51c   :  { %5478 = vmatpush1.bf16.msra.mxu0 %v5477_v36  ;;  %5504 = vmatprep.subr.bf16.mxu1 %v7788_v39  ;;  %v3167_v36 = vld [vmem:[%s8409_s13 + $0xe0] sm:$0xff] }
 0x51d   :  { %5480 = vmatprep.subr.bf16.mxu0 %v5479_v42  ;;  %v7936_v41 = vpack.c.bf16 %v3169_v37, %v3167_v36  ;;  %v4367_v42 = vld [vmem:[%s8409_s13 + $0x2d8] sm:$0xff]  ;;  %v4380_v36 = vld [vmem:[%s8409_s13 + $0x340] sm:$0xff]  ;;  %v4382_v37 = vld [vmem:[%s8409_s13 + $0x350] sm:$0xff] }
 0x51e   :  { %v7948_v45 = vpack.c.bf16 %v4367_v42, %v4365_v40  ;;  %v4385_v40 = vld [vmem:[%s8409_s13 + $0x368] sm:$0xff]  ;;  %v8064_v42 = vpack.c.bf16 %v4382_v37, %v4380_v36  ;;  %v5823_v37 = vld [vmem:[#allocation3 + $0x20] ss:$16 sps:$4 sm:$0xff]  }
 0x51f   :  { %5506 = vmatpush1.bf16.msra.mxu1 %v7812_v57 }
 0x520   :  { %5482 = vmatpush1.bf16.msra.mxu0 %v5481_v58  ;;  %5508 = vmatprep.subr.bf16.mxu1 %v7815_v50  ;;  %v4366_v58 = vld [vmem:[%s8409_s13 + $0x2d0] sm:$0xff] }
 0x521   :  { %5484 = vmatprep.subr.bf16.mxu0 %v5483_v53  ;;  %v7963_v52 = vpack.c.bf16 %v4366_v58, %v4364_v48  ;;  %v3173_v53 = vld [vmem:[%s8409_s13 + $0x110] sm:$0xff]  ;;  %v8076_v58 = vpack.c.bf16 %v4387_v43, %v4385_v40 }
 0x522   :  { %v7976_v61 = vpack.c.bf16 %v3173_v53, %v3171_v51  ;;  %v4386_v48 = vld [vmem:[%s8409_s13 + $0x370] sm:$0xff]  ;;  %v4389_v51 = vld [vmem:[%s8409_s13 + $0x388] sm:$0xff]  ;;  %v4391_v53 = vld [vmem:[%s8409_s13 + $0x398] sm:$0xff] }
 0x523   :  { %5510 = vmatpush1.bf16.msra.mxu1 %v7836_v63  ;;  %v8085_v54 = vpack.c.bf16 %v4386_v48, %v4384_v44  ;;  %v8088_v55 = vpack.c.bf16 %v4391_v53, %v4389_v51  ;;  %v5824_v44 = vld [vmem:[#allocation3 + $0x28] ss:$16 sps:$4 sm:$0xff]  }
 0x524   :  { %5486 = vmatpush1.bf16.msra.mxu0 %v5485_v1  ;;  %5512 = vmatprep.subr.bf16.mxu1 %v7854_v3  ;;  %v3176_v1 = vld [vmem:[%s8409_s13 + $0x128] sm:$0xff] }
 0x525   :  { %5488 = vmatprep.subr.bf16.mxu0 %v5487_v5  ;;  %v3178_v5 = vld [vmem:[%s8409_s13 + $0x138] sm:$0xff] }
 0x526   :  { %v7989_v6 = vpack.c.bf16 %v3178_v5, %v3176_v1  ;;  %v4388_v1 = vld [vmem:[%s8409_s13 + $0x380] sm:$0xff]  ;;  %v4390_v5 = vld [vmem:[%s8409_s13 + $0x390] sm:$0xff] }
 0x527   :  { %5514 = vmatpush1.bf16.msra.mxu1 %v7862_v12  ;;  %v8103_v56 = vpack.c.bf16 %v4390_v5, %v4388_v1 }
 0x528   :  { %5490 = vmatpush1.bf16.msra.mxu0 %v5489_v8  ;;  %v4370_v8 = vld [vmem:[%s8409_s13 + $0x2f0] sm:$0xff] }
 0x529   :  { %5532 = vmatprep.subr.bf16.mxu0 %v7872_v15  ;;  %v8008_v13 = vpack.c.bf16 %v4370_v8, %v4368_v4  ;;  %v4393_v4 = vld [vmem:[%s8409_s13 + $0x3a8] sm:$0xff]  ;;  %v4395_v8 = vld [vmem:[%s8409_s13 + $0x3b8] sm:$0xff] }
 0x52a   :  { %v8106_v9 = vpack.c.bf16 %v4395_v8, %v4393_v4 }
 0x52b   :  { %4302 = vmatmul.mubr.msk.f32.vlgmr.msra.gmra.mrb[12].mxu0 %vm2444_vm5, %v7731_v16  ;;  %v3164_v16 = vld [vmem:[%s8409_s13 + $0xc8] sm:$0xff] }
 0x52c   :  { %v7883_v19 = vpack.c.bf16 %v3166_v17, %v3164_v16  ;;  %5534 = vmatpush1.bf16.msra.mxu0 %v7895_v24  ;;  %v8014_v16 = vpack.c.bf16 %v4375_v11, %v4373_v10  ;;  %v4372_v17 = vld [vmem:[%s8409_s13 + $0x300] sm:$0xff]  ;;  %v4394_v11 = vld [vmem:[%s8409_s13 + $0x3b0] sm:$0xff] }
 0x52d   :  { %5536 = vmatprep.subr.bf16.mxu0 %v7911_v30  ;;  %v8024_v21 = vpack.c.bf16 %v4374_v18, %v4372_v17  ;;  %v4392_v10 = vld [vmem:[%s8409_s13 + $0x3a0] sm:$0xff]  ;;  %v4317_v17 = vld [vmem:[%s8409_s13 + $0x148] sm:$0xff]  ;;  %v4319_v18 = vld [vmem:[%s8409_s13 + $0x158] sm:$0xff] }
 0x52e   :  { %5516 = vmatprep.subr.bf16.mxu1 %v7883_v19  ;;  %v8121_v22 = vpack.c.bf16 %v4394_v11, %v4392_v10  ;;  %v8124_v23 = vpack.c.bf16 %v4319_v18, %v4317_v17  ;;  %v5827_v18 = vld [vmem:[#allocation3] ss:$8 sps:$4 sm:$0xee]  }
 0x52f   :  { %5518 = vmatpush1.bf16.msra.mxu1 %v7897_v38 }
 0x530   :  { %5520 = vmatprep.subr.bf16.mxu1 %v7922_v33  ;;  %5538 = vmatpush1.bf16.msra.mxu0 %v7924_v34 }
 0x531   :  { %5540 = vmatprep.subr.bf16.mxu0 %v7948_v45 }
 0x533   :  { %5522 = vmatpush1.bf16.msra.mxu1 %v7936_v41 }
 0x534   :  { %5524 = vmatprep.subr.bf16.mxu1 %v7950_v46  ;;  %5542 = vmatpush1.bf16.msra.mxu0 %v7963_v52 }
 0x535   :  { %5544 = vmatprep.subr.bf16.mxu0 %v7978_v62 }
 0x537   :  { %5526 = vmatpush1.bf16.msra.mxu1 %v7976_v61 }
 0x538   :  { %5528 = vmatprep.subr.bf16.mxu1 %v7989_v6  ;;  %5546 = vmatpush1.bf16.msra.mxu0 %v8008_v13 }
 0x539   :  { %5548 = vmatprep.subr.bf16.mxu0 %v8014_v16 }
 0x53b   :  { %5530 = vmatpush1.bf16.msra.mxu1 %v8010_v2 }
 0x53c   :  { %5612 = vmatprep.subr.bf16.mxu1 %v7685_v47  ;;  %5550 = vmatpush1.bf16.msra.mxu0 %v8024_v21  ;;  %v4378_v47 = vld [vmem:[%s8409_s13 + $0x330] sm:$0xff] }
 0x53d   :  { %v8043_v29 = vpack.c.bf16 %v4378_v47, %v4376_v28  ;;  %5552 = vmatprep.subr.bf16.mxu0 %v8035_v26  ;;  %v2700_v28 = vld [vmem:[%s8408_s12] sm:$0x3] }
 0x53e   :  { %v2733_v47 = vrot.slane %v2700_v28, %v6870_v31  ;;  %v2737_v60 = vrot.slane %v2700_v28, %v6875_v59  ;;  %v5829_v28 = vld [vmem:[#allocation3 + $0x4] ss:$8 sps:$4 sm:$0x11]  }
 0x540   :  { %5554 = vmatpush1.bf16.msra.mxu0 %v8043_v29 }
 0x541   :  { %5556 = vmatprep.subr.bf16.mxu0 %v8053_v32 }
 0x544   :  { %5558 = vmatpush1.bf16.msra.mxu0 %v8064_v42 }
 0x545   :  { %5560 = vmatprep.subr.bf16.mxu0 %v8076_v58 }
 0x548   :  { %5562 = vmatpush1.bf16.msra.mxu0 %v8085_v54 }
 0x549   :  { %5564 = vmatprep.subr.bf16.mxu0 %v8088_v55 }
 0x54c   :  { %5566 = vmatpush1.bf16.msra.mxu0 %v8103_v56 }
 0x54d   :  { %5568 = vmatprep.subr.bf16.mxu0 %v8106_v9 }
 0x550   :  { %5570 = vmatpush1.bf16.msra.mxu0 %v8121_v22 }
 0x551   :  { %5572 = vmatprep.subr.bf16.mxu0 %v8124_v23 }
 0x5e5   :  { %v2811_v7 = vpop.f32.mrb[8].mxu1 }
 0x5e6   :  { %v2812_v36 = vadd.f32 %v2811_v7, %v2733_v47  ;;  %v2813_v40 = vpop.f32.mrb[9].mxu1  ;;  %v5830_v7 = vld [vmem:[#allocation3 + $0x10] ss:$8 sps:$4 sm:$0xee]  }
 0x5e7   :  { %v2814_v43 = vadd.f32 %v2813_v40, %v2737_v60  ;;  %v3039_v40 = vrot.slane %v5829_v28, 5 }
 0x5e8   :  { %v3049_v48 = vadd.f32 %v5823_v37, %v2812_v36  ;;  %v5832_v36 = vld [vmem:[#allocation3 + $0x14] ss:$8 sps:$4 sm:$0x11]   ;;  %v4303_v37 = vrot.slane %v5827_v18, 9 }
 0x5e9   :  { %v3050_v51 = vadd.f32 %v5824_v44, %v2814_v43  ;;  %v4304_v43 = vrot.slane %v5830_v7, 9  ;;  %v3043_v44 = vrot.slane %v5832_v36, 5 }
 0x5ea   :  { %vm3051_vm8 = vcmp.gt.f32.partialorder %v3049_v48, 0.0  ;;  %v3053_v53 = vmul.f32 %v3049_v48, %v7298_v0 }
 0x5eb   :  { %vm3052_vm10 = vcmp.gt.f32.partialorder %v3050_v51, 0.0  ;;  %v3054_v1 = vmul.f32 %v3050_v51, %v7298_v0 }
 0x5ec   :  { %v3055_v5 = vsel %vm3051_vm8, %v3049_v48, %v3053_v53  ;;  %v3040_v53 = vsel %vm6476_vm3, %v4303_v37, %v3039_v40 }
 0x5ed   :  { %v3056_v4 = vsel %vm3052_vm10, %v3050_v51, %v3054_v1  ;;  %v3044_v1 = vsel %vm6476_vm3, %v4304_v43, %v3043_v44  ;;  %v4327_v44 = vld [vmem:[%s8409_s13 + $0x198] sm:$0xff] }
 0x5ee   :  { %v3071_v8 = vcombine.low %v3055_v5, %v3056_v4  ;;  %v3072_v10 = vcombine.high %v3055_v5, %v3056_v4  ;;  %v4307_v11 = vcombine.low %v3056_v4, %v3056_v4  ;;  %v4308_v17 = vcombine.high %v3056_v4, %v3056_v4 }
 0x5f0   :  { %3079 = vst [vmem:[#allocation6] sm:$0xf] %v3071_v8  ;;  %3080 = vst.msk [vmem:[#allocation6 + $0x8] sm:$0xf] %vm1349_vm9, %v4307_v11  ;;  %v3057_v8 = vcombine.low %v3040_v53, %v3044_v1 }
 0x5f1   :  { %3081 = vst [vmem:[#allocation6 + $0x10] sm:$0xf] %v3072_v10  ;;  %3082 = vst.msk [vmem:[#allocation6 + $0x18] sm:$0xf] %vm1349_vm9, %v4308_v17  ;;  %v3058_v17 = vcombine.high %v3040_v53, %v3044_v1  ;;  %v4326_v1 = vld [vmem:[%s8409_s13 + $0x190] sm:$0xff] }
 0x5f8   :  { %v5825_v48 = vld [vmem:[#allocation6 + $0x8] ss:$16 sps:$4 sm:$0xff]   ;;  %v8137_v51 = vld [vmem:[#allocation6] ss:$16 sps:$4 sm:$0xff]  }
 0x5f9   :  { %4315 = vmatprep.mubr.msk.f32.mxu1 %vm282_vm0, %v5825_v48 }
 0x5fa   :  { %3260 = vmatmul.mubr.f32.vlgmr.msra.gmra.mrb[10].mxu1 %v8137_v51 }
 0x5fb   :  { %5614 = vmatpush1.bf16.msra.mxu1 %v7723_v14 }
 0x5fc   :  { %5616 = vmatprep.subr.bf16.mxu1 %v7733_v20 }
 0x5fe   :  { %v3008_v5 = vpop.f32.mrb[12].mxu0 }
 0x5ff   :  { %v3013_v4 = vadd.f32 %v3008_v5, %v2733_v47  ;;  %v3010_v10 = vpop.f32.mrb[13].mxu0  ;;  %5618 = vmatpush1.bf16.msra.mxu1 %v7751_v25  ;;  %v4329_v5 = vld [vmem:[%s8409_s13 + $0x1a8] sm:$0xff] }
 0x600   :  { %v3014_v11 = vadd.f32 %v3010_v10, %v2737_v60  ;;  %5620 = vmatprep.subr.bf16.mxu1 %v7757_v27  ;;  %v4318_v27 = vld [vmem:[%s8409_s13 + $0x150] sm:$0xff] }
 0x601   :  { %v3061_v18 = vadd.f32 %v3057_v8, %v3013_v4  ;;  %v5837_v8 = vld [vmem:[#allocation6 + $0x4] ss:$8 sps:$4 sm:$0x11]   ;;  %v5838_v10 = vld [vmem:[#allocation6 + $0x10] ss:$8 sps:$4 sm:$0xee]  }
 0x602   :  { %v3062_v14 = vadd.f32 %v3058_v17, %v3014_v11  ;;  %v5840_v11 = vld [vmem:[#allocation6 + $0x14] ss:$8 sps:$4 sm:$0x11]  }
 0x603   :  { %vm3063_vm11 = vcmp.gt.f32.partialorder %v3061_v18, 0.0  ;;  %v3065_v28 = vmul.f32 %v3061_v18, %v7298_v0  ;;  %5622 = vmatpush1.bf16.msra.mxu1 %v7782_v35  ;;  %v4321_v35 = vld [vmem:[%s8409_s13 + $0x168] sm:$0xff] }
 0x604   :  { %vm3064_vm12 = vcmp.gt.f32.partialorder %v3062_v14, 0.0  ;;  %v3066_v20 = vmul.f32 %v3062_v14, %v7298_v0  ;;  %5624 = vmatprep.subr.bf16.mxu1 %v7788_v39  ;;  %v4316_v0 = vld [vmem:[%s8409_s13 + $0x140] sm:$0xff]  ;;  %v4323_v39 = vld [vmem:[%s8409_s13 + $0x178] sm:$0xff] }
 0x605   :  { %v3067_v47 = vsel %vm3063_vm11, %v3061_v18, %v3065_v28  ;;  %v8185_v43 = vpack.c.bf16 %v4323_v39, %v4321_v35 }
 0x606   :  { %v3068_v7 = vsel %vm3064_vm12, %v3062_v14, %v3066_v20  ;;  %v4330_v14 = vld [vmem:[%s8409_s13 + $0x1b0] sm:$0xff]  ;;  %v3133_v20 = vrot.slane %v5837_v8, 5 }
 0x607   :  { %v3085_v36 = vcombine.low %v3067_v47, %v3068_v7  ;;  %v3086_v25 = vcombine.high %v3067_v47, %v3068_v7  ;;  %v4309_v60 = vcombine.low %v3068_v7, %v3068_v7  ;;  %v4310_v37 = vcombine.high %v3068_v7, %v3068_v7  ;;  %5626 = vmatpush1.bf16.msra.mxu1 %v7812_v57  ;;  %v4320_v57 = vld [vmem:[%s8409_s13 + $0x160] sm:$0xff]  ;;  %v4346_v8 = vld [vmem:[%s8409_s13 + $0x230] sm:$0xff] }
 0x608   :  { %5628 = vmatprep.subr.bf16.mxu1 %v7815_v50  ;;  %v4322_v50 = vld [vmem:[%s8409_s13 + $0x170] sm:$0xff]  ;;  %v4312_v47 = vrot.slane %v5838_v10, 9  ;;  %v3137_v7 = vrot.slane %v5840_v11, 5  ;;  %v4351_v10 = vld [vmem:[%s8409_s13 + $0x258] sm:$0xff] }
 0x609   :  { %3094 = vst [vmem:[#allocation6 + $0x20] sm:$0xf] %v3085_v36  ;;  %3095 = vst.msk [vmem:[#allocation6 + $0x28] sm:$0xf] %vm1349_vm9, %v4309_v60  ;;  %v8204_v53 = vpack.c.bf16 %v4322_v50, %v4320_v57  ;;  %v4332_v60 = vld [vmem:[%s8409_s13 + $0x1c0] sm:$0xff]  ;;  %v4343_v50 = vld [vmem:[%s8409_s13 + $0x218] sm:$0xff] }
 0x60a   :  { %3096 = vst [vmem:[#allocation6 + $0x30] sm:$0xf] %v3086_v25  ;;  %3097 = vst.msk [vmem:[#allocation6 + $0x38] sm:$0xf] %vm1349_vm9, %v4310_v37  ;;  %v4334_v37 = vld [vmem:[%s8409_s13 + $0x1d0] sm:$0xff]  ;;  %v4336_v57 = vld [vmem:[%s8409_s13 + $0x1e0] sm:$0xff] }
 0x60b   :  { %5630 = vmatpush1.bf16.msra.mxu1 %v7836_v63  ;;  %v8269_v35 = vpack.c.bf16 %v4334_v37, %v4332_v60 }
 0x60c   :  { %5632 = vmatprep.subr.bf16.mxu1 %v7854_v3  ;;  %v8180_v3 = vpack.c.bf16 %v4318_v27, %v4316_v0  ;;  %v8259_v0 = vsel %vm6476_vm3, %v4312_v47, %v3137_v7  ;;  %v4339_v27 = vld [vmem:[%s8409_s13 + $0x1f8] sm:$0xff] }
 0x60f   :  { %5634 = vmatpush1.bf16.msra.mxu1 %v7862_v12  ;;  %v4325_v12 = vld [vmem:[%s8409_s13 + $0x188] sm:$0xff] }
 0x610   :  { %5636 = vmatprep.subr.bf16.mxu1 %v7883_v19  ;;  %v4324_v19 = vld [vmem:[%s8409_s13 + $0x180] sm:$0xff]  ;;  %v8217_v4 = vpack.c.bf16 %v4327_v44, %v4325_v12 }
 0x611   :  { %v8178_v63 = vld [vmem:[#allocation6 + $0x28] ss:$16 sps:$4 sm:$0xff]   ;;  %v8183_v40 = vld [vmem:[#allocation6 + $0x20] ss:$16 sps:$4 sm:$0xff]   ;;  %v8221_v17 = vpack.c.bf16 %v4326_v1, %v4324_v19 }
 0x612   :  { %4398 = vmatprep.mubr.msk.f32.mxu0 %vm282_vm0, %v8178_v63  ;;  %4400 = vmatprep.mubr.msk.f32.mxu1 %vm282_vm0, %v8178_v63  ;;  %v4340_v19 = vld [vmem:[%s8409_s13 + $0x200] sm:$0xff]  ;;  %v4345_v1 = vld [vmem:[%s8409_s13 + $0x228] sm:$0xff] }
 0x613   :  { %3426 = vmatmul.mubr.f32.vlgmr.msra.gmra.mrb[14].mxu0 %v8183_v40  ;;  %5638 = vmatpush1.bf16.msra.mxu1 %v7897_v38  ;;  %v4331_v38 = vld [vmem:[%s8409_s13 + $0x1b8] sm:$0xff] }
 0x614   :  { %5574 = vmatpush1.bf16.msra.mxu0 %v8180_v3  ;;  %4399 = vmatprep.mubr.msk.f32.mxu0 %vm282_vm0, %v5825_v48  ;;  %v5835_v48 = vld [vmem:[#allocation6] ss:$8 sps:$4 sm:$0xee]   ;;  %v8225_v18 = vpack.c.bf16 %v4331_v38, %v4329_v5 }
 0x615   :  { %5576 = vmatprep.subr.bf16.mxu0 %v8185_v43  ;;  %5640 = vmatprep.subr.bf16.mxu1 %v7922_v33  ;;  %v4328_v33 = vld [vmem:[%s8409_s13 + $0x1a0] sm:$0xff]  ;;  %v4311_v28 = vrot.slane %v5835_v48, 9 }
 0x616   :  { %v8241_v36 = vpack.c.bf16 %v4330_v14, %v4328_v33  ;;  %v4344_v48 = vld [vmem:[%s8409_s13 + $0x220] sm:$0xff]  ;;  %v4350_v14 = vld [vmem:[%s8409_s13 + $0x250] sm:$0xff] }
 0x617   :  { %5642 = vmatpush1.bf16.msra.mxu1 %v7936_v41  ;;  %v4333_v41 = vld [vmem:[%s8409_s13 + $0x1c8] sm:$0xff]  ;;  %v4348_v33 = vld [vmem:[%s8409_s13 + $0x240] sm:$0xff] }
 0x618   :  { %5578 = vmatpush1.bf16.msra.mxu0 %v8204_v53  ;;  %5644 = vmatprep.subr.bf16.mxu1 %v7950_v46  ;;  %v4335_v46 = vld [vmem:[%s8409_s13 + $0x1d8] sm:$0xff] }
 0x619   :  { %5580 = vmatprep.subr.bf16.mxu0 %v8217_v4  ;;  %v8245_v25 = vpack.c.bf16 %v4335_v46, %v4333_v41  ;;  %v4353_v41 = vld [vmem:[%s8409_s13 + $0x268] sm:$0xff] }
 0x61b   :  { %5646 = vmatpush1.bf16.msra.mxu1 %v7976_v61  ;;  %v8255_v61 = vsel %vm6476_vm3, %v4311_v28, %v3133_v20  ;;  %v4352_v28 = vld [vmem:[%s8409_s13 + $0x260] sm:$0xff]  ;;  %v4354_v20 = vld [vmem:[%s8409_s13 + $0x270] sm:$0xff] }
 0x61c   :  { %5582 = vmatpush1.bf16.msra.mxu0 %v8221_v17  ;;  %5648 = vmatprep.subr.bf16.mxu1 %v7989_v6  ;;  %v4337_v6 = vld [vmem:[%s8409_s13 + $0x1e8] sm:$0xff]  ;;  %v3715_v49 = vcombine.high %v8255_v61, %v8259_v0  ;;  %v5609_v47 = vpack.c.bf16 %v4354_v20, %v4352_v28 }
 0x61d   :  { %5584 = vmatprep.subr.bf16.mxu0 %v8225_v18  ;;  %v8275_v39 = vpack.c.bf16 %v4339_v27, %v4337_v6 }
 0x61f   :  { %5650 = vmatpush1.bf16.msra.mxu1 %v8010_v2  ;;  %v4338_v2 = vld [vmem:[%s8409_s13 + $0x1f0] sm:$0xff] }
 0x620   :  { %5586 = vmatpush1.bf16.msra.mxu0 %v8241_v36  ;;  %5652 = vmatprep.subr.bf16.mxu1 %v7872_v15  ;;  %v4341_v15 = vld [vmem:[%s8409_s13 + $0x208] sm:$0xff]  ;;  %v8293_v12 = vpack.c.bf16 %v4338_v2, %v4336_v57 }
 0x621   :  { %5588 = vmatprep.subr.bf16.mxu0 %v8245_v25  ;;  %v8297_v44 = vpack.c.bf16 %v4343_v50, %v4341_v15 }
 0x622   :  { %3619 = vmatmul.mubr.f32.vlgmr.msra.gmra.mrb[12].mxu1 %v8183_v40 }
 0x623   :  { %5654 = vmatpush1.bf16.msra.mxu1 %v7895_v24  ;;  %4481 = vmatprep.mubr.msk.f32.mxu1 %vm282_vm0, %v3715_v49  ;;  %v4342_v24 = vld [vmem:[%s8409_s13 + $0x210] sm:$0xff] }
 0x624   :  { %5590 = vmatpush1.bf16.msra.mxu0 %v8269_v35  ;;  %5656 = vmatprep.subr.bf16.mxu1 %v7911_v30  ;;  %v4347_v30 = vld [vmem:[%s8409_s13 + $0x238] sm:$0xff]  ;;  %v5597_v5 = vpack.c.bf16 %v4342_v24, %v4340_v19 }
 0x625   :  { %5592 = vmatprep.subr.bf16.mxu0 %v8275_v39  ;;  %v5599_v38 = vpack.c.bf16 %v4347_v30, %v4345_v1 }
 0x627   :  { %5658 = vmatpush1.bf16.msra.mxu1 %v7924_v34  ;;  %v4349_v34 = vld [vmem:[%s8409_s13 + $0x248] sm:$0xff] }
 0x628   :  { %5594 = vmatpush1.bf16.msra.mxu0 %v8293_v12  ;;  %5660 = vmatprep.subr.bf16.mxu1 %v7948_v45  ;;  %v5601_v45 = vpack.c.bf16 %v4346_v8, %v4344_v48  ;;  %v5603_v11 = vpack.c.bf16 %v4351_v10, %v4349_v34 }
 0x629   :  { %5596 = vmatprep.subr.bf16.mxu0 %v8297_v44 }
 0x62b   :  { %5662 = vmatpush1.bf16.msra.mxu1 %v7963_v52  ;;  %v4355_v52 = vld [vmem:[%s8409_s13 + $0x278] sm:$0xff] }
 0x62c   :  { %5598 = vmatpush1.bf16.msra.mxu0 %v5597_v5  ;;  %5664 = vmatprep.subr.bf16.mxu1 %v7978_v62  ;;  %v5605_v62 = vpack.c.bf16 %v4350_v14, %v4348_v33  ;;  %v5607_v46 = vpack.c.bf16 %v4355_v52, %v4353_v41 }
 0x62d   :  { %5600 = vmatprep.subr.bf16.mxu0 %v5599_v38 }
 0x62f   :  { %5666 = vmatpush1.bf16.msra.mxu1 %v8008_v13  ;;  %v3714_v13 = vcombine.low %v8255_v61, %v8259_v0 }
 0x630   :  { %5602 = vmatpush1.bf16.msra.mxu0 %v5601_v45  ;;  %5668 = vmatprep.subr.bf16.mxu1 %v8014_v16  ;;  %v3098_v16 = vld [vmem:[%s8410_s14] sm:$0x3]  ;;  %s5883_s14 = smov [#allocation10]  }
 0x631   :  { %5604 = vmatprep.subr.bf16.mxu0 %v5603_v11  ;;  %s3877_s26 = sshll.u32 %s5883_s14, 4  ;;  %s3878_s26 = int_to_ptr.vmem [resolvable:$true] %s3877_s26 }
 0x632   :  { %s5853_s27 = scalar_lea.vmem %s3878_s26, 1024  ;;  %p5858_p6 = scmp.lt.s32.totalorder %s3878_s26, %s3878_s26 }
 0x633   :  { %5670 = vmatpush1.bf16.msra.mxu1 %v8024_v21  ;;  %v3183_v21 = vrot.slane %v3098_v16, %v6870_v31  ;;  %p5854_p5 = scmp.ne.s32.totalorder %s3878_s26, %s5853_s27  ;;  %p5859_p7 = scmp.lt.s32.totalorder %s5853_s27, %s5853_s27 }
 0x634   :  { %5606 = vmatpush1.bf16.msra.mxu0 %v5605_v62  ;;  %5672 = vmatprep.subr.bf16.mxu1 %v8035_v26  ;;  %v3187_v26 = vrot.slane %v3098_v16, %v6875_v59 }
 0x635   :  { %5608 = vmatprep.subr.bf16.mxu0 %v5607_v46  ;;  %p5860_p8 = por %p5859_p7, %p5858_p6 }
 0x637   :  { %5674 = vmatpush1.bf16.msra.mxu1 %v8043_v29  ;;  %p5861_p9 = pnand %p5860_p8, %p5854_p5 }
 0x638   :  { %5610 = vmatpush1.bf16.msra.mxu0 %v5609_v47  ;;  %5676 = vmatprep.subr.bf16.mxu1 %v8053_v32 }
 0x63b   :  { %3497 = vmatmul.mubr.f32.vlgmr.msra.gmra.mrb[14].mxu0 %v8137_v51  ;;  %5678 = vmatpush1.bf16.msra.mxu1 %v8064_v42 }
 0x63c   :  { %5680 = vmatprep.subr.bf16.mxu1 %v8076_v58 }
 0x63f   :  { %5682 = vmatpush1.bf16.msra.mxu1 %v8085_v54 }
 0x640   :  { %5684 = vmatprep.subr.bf16.mxu1 %v8088_v55 }
 0x643   :  { %5686 = vmatpush1.bf16.msra.mxu1 %v8103_v56 }
 0x644   :  { %5688 = vmatprep.subr.bf16.mxu1 %v8106_v9 }
 0x647   :  { %5690 = vmatpush1.bf16.msra.mxu1 %v8121_v22 }
 0x648   :  { %5692 = vmatprep.subr.bf16.mxu1 %v8124_v23 }
 0x64a   :  { %3784 = vmatmul.mubr.f32.vlgmr.msra.gmra.mrb[14].mxu1 %v3714_v13 }
 0x64b   :  { %5694 = vmatpush1.bf16.msra.mxu1 %v8180_v3  ;;  %4482 = vmatprep.mubr.msk.f32.mxu1 %vm282_vm0, %v8178_v63 }
 0x64c   :  { %5696 = vmatprep.subr.bf16.mxu1 %v8185_v43 }
 0x64f   :  { %5698 = vmatpush1.bf16.msra.mxu1 %v8204_v53 }
 0x650   :  { %5700 = vmatprep.subr.bf16.mxu1 %v8217_v4 }
 0x653   :  { %5702 = vmatpush1.bf16.msra.mxu1 %v8221_v17 }
 0x654   :  { %5704 = vmatprep.subr.bf16.mxu1 %v8225_v18 }
 0x657   :  { %5706 = vmatpush1.bf16.msra.mxu1 %v8241_v36 }
 0x658   :  { %5708 = vmatprep.subr.bf16.mxu1 %v8245_v25 }
 0x65b   :  { %5710 = vmatpush1.bf16.msra.mxu1 %v8269_v35 }
 0x65c   :  { %5712 = vmatprep.subr.bf16.mxu1 %v8275_v39 }
 0x65f   :  { %5714 = vmatpush1.bf16.msra.mxu1 %v8293_v12 }
 0x660   :  { %5716 = vmatprep.subr.bf16.mxu1 %v8297_v44 }
 0x663   :  { %5718 = vmatpush1.bf16.msra.mxu1 %v5597_v5 }
 0x664   :  { %5720 = vmatprep.subr.bf16.mxu1 %v5599_v38 }
 0x667   :  { %5722 = vmatpush1.bf16.msra.mxu1 %v5601_v45 }
 0x668   :  { %5724 = vmatprep.subr.bf16.mxu1 %v5603_v11 }
 0x66b   :  { %5726 = vmatpush1.bf16.msra.mxu1 %v5605_v62 }
 0x66c   :  { %5728 = vmatprep.subr.bf16.mxu1 %v5607_v46 }
 0x66f   :  { %5730 = vmatpush1.bf16.msra.mxu1 %v5609_v47 }
 0x672   :  { %3855 = vmatmul.mubr.f32.vlgmr.msra.gmra.mrb[14].mxu1 %v8183_v40 }
 0x6cd   :  { %v3261_v29 = vpop.f32.mrb[10].mxu1 }
 0x6ce   :  { %v3262_v32 = vadd.f32 %v3261_v29, %v3183_v21  ;;  %v3263_v42 = vpop.f32.mrb[11].mxu1 }
 0x6cf   :  { %v3264_v58 = vadd.f32 %v3263_v42, %v3187_v26 }
 0x6d1   :  { %v3268_v54 = vcombine.low %v3262_v32, %v3264_v58  ;;  %v3269_v55 = vcombine.high %v3262_v32, %v3264_v58 }
 0x6d3   :  { %3272 = vst [vmem:[#allocation10] sm:$0xff] %v3268_v54  ;;  %3273 = vst [vmem:[#allocation10 + $0x8] sm:$0xff] %v3269_v55 }
 0x6f5   :  { %v3620_v56 = vpop.f32.mrb[12].mxu1 }
 0x6f6   :  { %v3621_v9 = vadd.f32 %v3620_v56, %v3183_v21  ;;  %v3622_v22 = vpop.f32.mrb[13].mxu1 }
 0x6f7   :  { %v3623_v23 = vadd.f32 %v3622_v22, %v3187_v26 }
 0x6f9   :  { %v3627_v51 = vcombine.low %v3621_v9, %v3623_v23  ;;  %v3628_v63 = vcombine.high %v3621_v9, %v3623_v23 }
 0x6fb   :  { %3632 = vst [vmem:[#allocation10 + $0x20] sm:$0xff] %v3627_v51  ;;  %3633 = vst [vmem:[#allocation10 + $0x28] sm:$0xff] %v3628_v63 }
 0x70e   :  { %v3498_v3 = vpop.f32.mrb[14].mxu0 }
 0x70f   :  { %v3503_v31 = vadd.f32 %v3498_v3, %v3183_v21  ;;  %v3500_v40 = vpop.f32.mrb[15].mxu0 }
 0x710   :  { %v3504_v59 = vadd.f32 %v3500_v40, %v3187_v26 }
 0x712   :  { %v3507_v43 = vcombine.low %v3503_v31, %v3504_v59  ;;  %v3508_v53 = vcombine.high %v3503_v31, %v3504_v59 }
 0x714   :  { %3512 = vst [vmem:[#allocation10 + $0x10] sm:$0xff] %v3507_v43  ;;  %3513 = vst [vmem:[#allocation10 + $0x18] sm:$0xff] %v3508_v53 }
 0x745   :  { %v3856_v4 = vpop.f32.mrb[14].mxu1 }
 0x746   :  { %v3861_v17 = vadd.f32 %v3856_v4, %v3183_v21  ;;  %v3858_v18 = vpop.f32.mrb[15].mxu1 }
 0x747   :  { %v3862_v7 = vadd.f32 %v3858_v18, %v3187_v26 }
 0x749   :  { %v3865_v36 = vcombine.low %v3861_v17, %v3862_v7  ;;  %v3866_v25 = vcombine.high %v3861_v17, %v3862_v7 }
 0x74b   :  { %3870 = vst [vmem:[#allocation10 + $0x30] sm:$0xff] %v3865_v36  ;;  %3871 = vst [vmem:[#allocation10 + $0x38] sm:$0xff] %v3866_v25 }
 0x74c   :  { %5864 = shalt.err (!%p5861_p9)
}
 0x74d   :  { %s5865_s3 = scalar_lea.hbm %s8412_s16, 1024 }
 0x74e   :  { %p5866_p10 = scmp.ne.s32.totalorder %s8412_s16, %s5865_s3  ;;  %p5869_p11 = scmp.lt.u32.totalorder %s5865_s3, %s8412_s16 }
 0x750   :  { %p5871_p12 = pnand %p5869_p11, %p5866_p10 }
 0x752   :  { %5874 = shalt.err (!%p5871_p12)
}
 0x753   :  { %s5884_s7 = smov 128   ;;  %s5885_s18 = smov 8  }
 0x754   :  { %3883 = dma.vmem_to_hbm [thread:$0]  %s3878_s26, 1024, %s8412_s16, [#allocation8], %s5884_s7, %s5884_s7, %s5885_s18  }
 0x755   :  { %5877 = dma.done.wait [#allocation8], 1024  }
 0x756   :  { %5878 = vsyncadd [#allocation8], 4294966272 }
 0x757   :  { %3887 = vsyncpa [#allocation8], 1 }
 0x758   :  { %3888 = vsyncpa [#allocation9], 1 }

</bundles_post_ra>
